<compile_context>
chip_gen: v7x
topology: tpu7x:2x2x1
jax: 0.10.0
libtpu: 0.0.40
codegen_flags: <defaults>
</compile_context>

<pallas_src>
import functools
import math

import jax
import jax.numpy as jnp
import numpy as np
from jax import lax
from jax.experimental import pallas as pl
from jax.experimental.pallas import tpu as pltpu


def _gaussian_smearing_kernel(dist_ref, expand_ref, offset_ref, coeff_ref, out_ref,
                              *, start, stop):
    """One grid step.

    dist_ref  : (R, P)    f32 -- P consecutive distances per packed row.
    expand_ref: (P, P*G)  f32 -- one-hot matrix, E[p, p*G+g] = 1 ("repeat x G").
    offset_ref: (1, P*G)  f32 -- offset tiled P times (lane-dense constant).
    coeff_ref : (1, P*G)  f32 -- coeff  tiled P times (lane-dense constant).
    out_ref   : (R, P*G)      -- lane-dense packed output block.
    """
    d = jnp.clip(dist_ref[...], start, stop)            # clamp_min / clamp_max
    # Lane-dense expansion d_exp[r, p*G+g] = d[r, p] on the MXU.  With a 0/1
    # rhs and HIGHEST precision (bf16 multi-pass) every output element is the
    # exact sum of one term multiplied by exactly 1.0 -> bitwise-accurate.
    d_exp = jnp.dot(d, expand_ref[...],
                    precision=lax.Precision.HIGHEST,
                    preferred_element_type=jnp.float32)
    diff = d_exp - offset_ref[...]
    out_ref[...] = jnp.exp(coeff_ref[...] * diff * diff).astype(out_ref.dtype)


def make_gaussian_smearing_params(start=0.0, stop=10.0, num_gaussians=50, type_="exp"):
    """Deterministic parameter construction, mirrors the PyTorch __init__."""
    if type_ == "exp":
        offset = np.exp(
            np.linspace(np.log(start + 1.0), np.log(stop + 1.0), num_gaussians)
        ) - 1.0
    elif type_ == "linear":
        offset = np.linspace(start, stop, num_gaussians)
    else:
        raise NotImplementedError("type_ must be either exp or linear")
    diff = np.diff(offset)
    diff = np.concatenate([diff[:1], diff])
    coeff = -0.5 / diff ** 2
    return jnp.asarray(offset, jnp.float32), jnp.asarray(coeff, jnp.float32)


def _vmem_budget_bytes():
    """Generation-aware scoped-VMEM budget: half the physical VMEM, <= 64 MiB.

    v5e/v6e: 128 MiB physical -> 64 MiB budget; v7x: 64 MiB -> 32 MiB budget.
    """
    cap = 128 << 20
    try:
        info = pltpu.get_tpu_info()
        cap = int(getattr(info, "vmem_capacity_bytes", cap))
    except Exception:
        pass
    return int(min(cap // 2, 64 << 20))


def gaussian_smearing(dist, offset, coeff, *, start=0.0, stop=10.0,
                      target_block_rows=1024, out_dtype=jnp.float32):
    """Pallas-backed GaussianSmearing forward.

    dist: any-shape float array; returns (dist.size, num_gaussians) in out_dtype.
    """
    g = int(offset.shape[0])
    # Pack `pack` consecutive distances per output row so the output lane width
    # (pack * g) is a multiple of 128 (g=50 -> pack=64, cols=3200).
    pack = 128 // math.gcd(g, 128)
    cols = pack * g

    d_flat = jnp.reshape(dist, (-1,)).astype(jnp.float32)
    n = int(d_flat.shape[0])
    n_rows = int(pl.cdiv(n, pack))

    out_b = jnp.dtype(out_dtype).itemsize
    row_align = max(8, 32 // out_b)                 # 8 rows for f32, 16 for bf16

    def est_vmem(rows):
        out_db = 2 * rows * cols * out_b            # double-buffered output block
        in_db = 2 * rows * 128 * 4                  # dist block, lane-padded 64->128
        consts = 2 * pack * cols * 4 + 4 * 8 * cols * 4   # expand + offset/coeff
        interm = 3 * rows * cols * 4 + (1 << 20)    # matmul result + live temps
        return out_db + in_db + consts + interm

    budget = _vmem_budget_bytes()
    block_rows = max(row_align, min(int(target_block_rows), n_rows))
    block_rows = int(pl.cdiv(block_rows, row_align)) * row_align
    while est_vmem(block_rows) > budget and block_rows > row_align:
        block_rows = max(row_align, (block_rows // 2 // row_align) * row_align)

    n_rows_pad = int(pl.cdiv(n_rows, block_rows)) * block_rows
    n_pad = n_rows_pad * pack
    if n_pad != n:
        d_flat = jnp.pad(d_flat, (0, n_pad - n))    # pads clip to finite values; sliced off
    d_packed = d_flat.reshape(n_rows_pad, pack)

    # Lane-dense constants: value at column c = p*g + gg is offset[gg]/coeff[gg].
    offset_t = jnp.tile(offset.astype(jnp.float32), pack)[None, :]     # (1, cols)
    coeff_t = jnp.tile(coeff.astype(jnp.float32), pack)[None, :]       # (1, cols)
    expand = jnp.asarray(np.kron(np.eye(pack, dtype=np.float32),
                                 np.ones((1, g), dtype=np.float32)))   # (pack, cols)

    vmem_limit = int(min(est_vmem(block_rows) + (4 << 20), budget))

    kernel = functools.partial(
        _gaussian_smearing_kernel, start=float(start), stop=float(stop)
    )

    out_packed = pl.pallas_call(
        kernel,
        out_shape=jax.ShapeDtypeStruct((n_rows_pad, cols), out_dtype),
        grid=(n_rows_pad // block_rows,),
        in_specs=[
            pl.BlockSpec((block_rows, pack), lambda i: (i, 0)),
            pl.BlockSpec((pack, cols), lambda i: (0, 0)),   # constant: fetched once
            pl.BlockSpec((1, cols), lambda i: (0, 0)),      # constant: fetched once
            pl.BlockSpec((1, cols), lambda i: (0, 0)),      # constant: fetched once
        ],
        out_specs=pl.BlockSpec((block_rows, cols), lambda i: (i, 0)),
        compiler_params=pltpu.CompilerParams(
            dimension_semantics=("parallel",),              # megacore sharding (v7x)
            vmem_limit_bytes=vmem_limit,
        ),
    )(d_packed, expand, offset_t, coeff_t)

    # (n_rows_pad, pack*g) is byte-identical to row-major (n_pad, g): free reshape.
    return out_packed.reshape(n_pad, g)[:n]


if __name__ == "__main__":
    start, stop, num_gaussians = 0.0, 10.0, 50
    offset, coeff = make_gaussian_smearing_params(start, stop, num_gaussians, "exp")

    def reference(dist):
        d = jnp.clip(jnp.reshape(dist, (-1, 1)).astype(jnp.float32), start, stop)
        return jnp.exp(coeff[None, :] * (d - offset[None, :]) ** 2)

    key = jax.random.PRNGKey(0)
    k1, k2 = jax.random.split(key)

    # Case 1: small input (2 graphs x 64 edges) -> single-block path.
    dist_small = jax.random.uniform(k1, (2, 64), jnp.float32, minval=-1.0, maxval=12.0)
    out_small = jax.block_until_ready(
        gaussian_smearing(dist_small, offset, coeff, start=start, stop=stop)
    )
    assert out_small.shape == (dist_small.size, num_gaussians)
    np.testing.assert_allclose(
        np.asarray(out_small), np.asarray(reference(dist_small)), rtol=1e-5, atol=1e-6
    )

    # Case 2: 2100 distances with a deliberately small row block to exercise the
    # multi-step grid + row/element padding path.
    dist_big = jax.random.uniform(k2, (3, 700), jnp.float32, minval=-1.0, maxval=12.0)
    out_big = jax.block_until_ready(
        gaussian_smearing(dist_big, offset, coeff, start=start, stop=stop,
                          target_block_rows=16)
    )
    assert out_big.shape == (dist_big.size, num_gaussians)
    np.testing.assert_allclose(
        np.asarray(out_big), np.asarray(reference(dist_big)), rtol=1e-5, atol=1e-6
    )

    # Case 3: optional bf16 output (halves the dominant HBM write traffic when
    # the downstream consumer tolerates it; default remains f32 to match torch).
    out_bf16 = jax.block_until_ready(
        gaussian_smearing(dist_small, offset, coeff, start=start, stop=stop,
                          out_dtype=jnp.bfloat16)
    )
    np.testing.assert_allclose(
        np.asarray(out_bf16.astype(jnp.float32)), np.asarray(reference(dist_small)),
        rtol=2e-2, atol=2e-2,
    )

    print("KERNEL_OK")
</pallas_src>

<mosaic_0001>
module attributes {stable_mosaic.version = 11 : i64} {
  func.func @_gaussian_smearing_kernel(%arg0: i32, %arg1: memref<8x64xf32, #tpu.memory_space<vmem>>, %arg2: memref<64x3200xf32, #tpu.memory_space<vmem>>, %arg3: memref<1x3200xf32, #tpu.memory_space<vmem>>, %arg4: memref<1x3200xf32, #tpu.memory_space<vmem>>, %arg5: memref<8x3200xf32, #tpu.memory_space<vmem>>) attributes {dimension_semantics = [#tpu.dimension_semantics<parallel>], iteration_bounds = array<i64: 1>, scalar_prefetch = 0 : i64, scratch_operands = 0 : i64, tpu.core_type = #tpu.core_type<tc>, window_params = [{transform_indices = @transform_0, window_bounds = array<i64: 8, 64>}, {pipeline_mode = #tpu.pipeline_mode<synchronous>, transform_indices = @transform_1, window_bounds = array<i64: 64, 3200>}, {pipeline_mode = #tpu.pipeline_mode<synchronous>, transform_indices = @transform_2, window_bounds = array<i64: 1, 3200>}, {pipeline_mode = #tpu.pipeline_mode<synchronous>, transform_indices = @transform_3, window_bounds = array<i64: 1, 3200>}, {transform_indices = @transform_4, window_bounds = array<i64: 8, 3200>}]} {
    %c0 = arith.constant 0 : index
    %c0_0 = arith.constant 0 : index
    %0 = vector.load %arg1[%c0, %c0_0] : memref<8x64xf32, #tpu.memory_space<vmem>>, vector<8x64xf32>
    %cst = arith.constant 0.000000e+00 : f32
    %cst_1 = arith.constant 1.000000e+01 : f32
    %1 = vector.broadcast %cst : f32 to vector<8x64xf32>
    %2 = arith.maximumf %1, %0 : vector<8x64xf32>
    %3 = vector.broadcast %cst_1 : f32 to vector<8x64xf32>
    %4 = arith.minimumf %3, %2 : vector<8x64xf32>
    %c0_2 = arith.constant 0 : index
    %c0_3 = arith.constant 0 : index
    %5 = vector.load %arg2[%c0_2, %c0_3] : memref<64x3200xf32, #tpu.memory_space<vmem>>, vector<64x3200xf32>
    %cst_4 = arith.constant dense<0.000000e+00> : vector<8x3200xf32>
    %6 = tpu.matmul %4, %5, %cst_4 {dimension_numbers = #tpu.dot_dimension_numbers<[1], [0], [0], [1], [0, 0, 1, 1], [], []>, precision = #tpu.contract_precision<fp32>} : vector<8x64xf32>, vector<64x3200xf32>, vector<8x3200xf32> -> vector<8x3200xf32>
    %c0_5 = arith.constant 0 : index
    %c0_6 = arith.constant 0 : index
    %7 = vector.load %arg3[%c0_5, %c0_6] : memref<1x3200xf32, #tpu.memory_space<vmem>>, vector<1x3200xf32>
    %8 = vector.broadcast %7 : vector<1x3200xf32> to vector<8x3200xf32>
    %9 = arith.subf %6, %8 : vector<8x3200xf32>
    %c0_7 = arith.constant 0 : index
    %c0_8 = arith.constant 0 : index
    %10 = vector.load %arg4[%c0_7, %c0_8] : memref<1x3200xf32, #tpu.memory_space<vmem>>, vector<1x3200xf32>
    %11 = vector.broadcast %10 : vector<1x3200xf32> to vector<8x3200xf32>
    %12 = arith.mulf %11, %9 : vector<8x3200xf32>
    %13 = arith.mulf %12, %9 : vector<8x3200xf32>
    %14 = math.exp %13 : vector<8x3200xf32>
    %c0_9 = arith.constant 0 : index
    %c0_10 = arith.constant 0 : index
    %15 = vector.load %arg5[%c0_9, %c0_10] : memref<8x3200xf32, #tpu.memory_space<vmem>>, vector<8x3200xf32>
    tpu.vector_store %arg5[%c0_9, %c0_10], %14 {strides = array<i32>} : memref<8x3200xf32, #tpu.memory_space<vmem>>, vector<8x3200xf32>,
    return
  }
  func.func @transform_0(%arg0: i32) -> (i32, i32) {
    %c0_i32 = arith.constant 0 : i32
    %c0_i32_0 = arith.constant 0 : i32
    return %arg0, %c0_i32 : i32, i32
  }
  func.func @transform_1(%arg0: i32) -> (i32, i32) {
    %c0_i32 = arith.constant 0 : i32
    %c0_i32_0 = arith.constant 0 : i32
    %c0_i32_1 = arith.constant 0 : i32
    return %c0_i32, %c0_i32_0 : i32, i32
  }
  func.func @transform_2(%arg0: i32) -> (i32, i32) {
    %c0_i32 = arith.constant 0 : i32
    %c0_i32_0 = arith.constant 0 : i32
    %c0_i32_1 = arith.constant 0 : i32
    return %c0_i32, %c0_i32_0 : i32, i32
  }
  func.func @transform_3(%arg0: i32) -> (i32, i32) {
    %c0_i32 = arith.constant 0 : i32
    %c0_i32_0 = arith.constant 0 : i32
    %c0_i32_1 = arith.constant 0 : i32
    return %c0_i32, %c0_i32_0 : i32, i32
  }
  func.func @transform_4(%arg0: i32) -> (i32, i32) {
    %c0_i32 = arith.constant 0 : i32
    %c0_i32_0 = arith.constant 0 : i32
    return %arg0, %c0_i32 : i32, i32
  }
}

</mosaic_0001>

<bundles_post_ra>
// kernel: tpu_custom_call.1
= control target key start
LH: loop header
LB: loop body
LE: loop exit
PB: predicated region body
PF: predicated region fallthrough
CT: control target
= control target key end

     0   :  { %9 = vsyncpa [#allocation3], 0  ;;  %s13537_s0 = inlined_call_operand.hbm [shape: f32[8,64], index: 0, kind: input, shape index: {}]   ;;  %s13538_s1 = inlined_call_operand.hbm [shape: f32[64,3200], index: 1, kind: input, shape index: {}]   ;;  %s13539_s2 = inlined_call_operand.hbm [shape: f32[1,3200], index: 2, kind: input, shape index: {}]   ;;  %s13540_s3 = inlined_call_operand.hbm [shape: f32[1,3200], index: 3, kind: input, shape index: {}]   ;;  %s13541_s4 = inlined_call_operand.hbm [shape: f32[8,3200], index: 4, kind: output, shape index: {}]  }
   0x1   :  { %10 = vsyncpa [#allocation6], 0 }
   0x2   :  { %11 = vsyncpa [#allocation9], 0 }
   0x3   :  { %12 = vsyncpa [#allocation4], 0  ;;  %s10714_s15 = smov [#allocation5]   ;;  %s10596_s19 = scalar_lea.hbm %s13538_s1, 25600 }
   0x4   :  { %s28_s16 = sshll.u32 %s10714_s15, 4  ;;  %p10597_p0 = scmp.ne.s32.totalorder %s13538_s1, %s10596_s19  ;;  %s29_s16 = int_to_ptr.vmem [resolvable:$true] %s28_s16 }
   0x5   :  { %p10600_p1 = scmp.lt.u32.totalorder %s10596_s19, %s13538_s1 }
   0x7   :  { %p10602_p2 = pnand %p10600_p1, %p10597_p0 }
   0x9   :  { %10605 = shalt.err (!%p10602_p2)
}
   0xa   :  { %s10606_s24 = scalar_lea.vmem %s29_s16, 25600  ;;  %p10611_p4 = scmp.lt.s32.totalorder %s29_s16, %s29_s16 }
   0xb   :  { %p10607_p3 = scmp.ne.s32.totalorder %s29_s16, %s10606_s24  ;;  %p10612_p5 = scmp.lt.s32.totalorder %s10606_s24, %s10606_s24 }
   0xd   :  { %p10613_p6 = por %p10612_p5, %p10611_p4 }
   0xf   :  { %p10614_p7 = pnand %p10613_p6, %p10607_p3 }
  0x11   :  { %10617 = shalt.err (!%p10614_p7)
}
  0x12   :  { %s10715_s25 = smov 3200   ;;  %s10716_s26 = smov 200  }
  0x13   :  { %34 = dma.hbm_to_vmem [thread:$0]  %s13538_s1, 25600, %s29_s16, [#allocation6], %s10715_s25, %s10715_s25, %s10716_s26  }
  0x14   :  { %s10717_s29 = smov [#allocation2]   ;;  %s10718_s5 = smov [#allocation7]  }
  0x15   :  { %s19_s30 = sshll.u32 %s10717_s29, 4  ;;  %s41_s6 = sshll.u32 %s10718_s5, 4  ;;  %s20_s30 = int_to_ptr.vmem [resolvable:$true] %s19_s30  ;;  %s42_s6 = int_to_ptr.vmem [resolvable:$true] %s41_s6 }
  0x16   :  { %s10618_s9 = scalar_lea.hbm %s13537_s0, 128 }
  0x17   :  { %p10619_p8 = scmp.ne.s32.totalorder %s13537_s0, %s10618_s9  ;;  %p10622_p9 = scmp.lt.u32.totalorder %s10618_s9, %s13537_s0 }
  0x19   :  { %p10624_p10 = pnand %p10622_p9, %p10619_p8 }
  0x1b   :  { %10627 = shalt.err (!%p10624_p10)
}
  0x1c   :  { %s10628_s1 = scalar_lea.vmem %s20_s30, 128  ;;  %p10633_p12 = scmp.lt.s32.totalorder %s20_s30, %s20_s30 }
  0x1d   :  { %p10629_p11 = scmp.ne.s32.totalorder %s20_s30, %s10628_s1  ;;  %p10634_p13 = scmp.lt.s32.totalorder %s10628_s1, %s10628_s1 }
  0x1f   :  { %p10635_p0 = por %p10634_p13, %p10633_p12 }
  0x21   :  { %p10636_p1 = pnand %p10635_p0, %p10629_p11 }
  0x23   :  { %10639 = shalt.err (!%p10636_p1)
}
  0x24   :  { %22 = dma.hbm_to_vmem [thread:$0]  %s13537_s0, 128, %s20_s30, [#allocation3]  }
  0x25   :  { %s10640_s18 = scalar_lea.hbm %s13539_s2, 400 }
  0x26   :  { %p10641_p2 = scmp.ne.s32.totalorder %s13539_s2, %s10640_s18  ;;  %p10644_p3 = scmp.lt.u32.totalorder %s10640_s18, %s13539_s2 }
  0x28   :  { %p10646_p4 = pnand %p10644_p3, %p10641_p2 }
  0x2a   :  { %10649 = shalt.err (!%p10646_p4)
}
  0x2b   :  { %s10650_s23 = scalar_lea.vmem %s42_s6, 400  ;;  %s10654_s24 = scalar_lea.vmem %s42_s6, 416 }
  0x2c   :  { %p10651_p5 = scmp.ne.s32.totalorder %s42_s6, %s10650_s23  ;;  %p10655_p6 = scmp.lt.s32.totalorder %s42_s6, %s42_s6 }
  0x2d   :  { %p10656_p7 = scmp.lt.s32.totalorder %s10654_s24, %s10650_s23 }
  0x2f   :  { %p10657_p8 = por %p10656_p7, %p10655_p6 }
  0x31   :  { %p10658_p9 = pnand %p10657_p8, %p10651_p5 }
  0x33   :  { %10661 = shalt.err (!%p10658_p9)
}
  0x34   :  { %44 = dma.hbm_to_vmem [thread:$0]  %s13539_s2, 400, %s42_s6, [#allocation6]  }
  0x35   :  { %s10719_s26 = smov [#allocation8]   ;;  %s10662_s30 = scalar_lea.hbm %s13540_s3, 400 }
  0x36   :  { %s51_s27 = sshll.u32 %s10719_s26, 4  ;;  %p10663_p10 = scmp.ne.s32.totalorder %s13540_s3, %s10662_s30  ;;  %s52_s27 = int_to_ptr.vmem [resolvable:$true] %s51_s27 }
  0x37   :  { %p10666_p11 = scmp.lt.u32.totalorder %s10662_s30, %s13540_s3 }
  0x39   :  { %p10668_p12 = pnand %p10666_p11, %p10663_p10 }
  0x3b   :  { %10671 = shalt.err (!%p10668_p12)
}
  0x3c   :  { %s10672_s10 = scalar_lea.vmem %s52_s27, 400  ;;  %s10676_s2 = scalar_lea.vmem %s52_s27, 416 }
  0x3d   :  { %p10673_p13 = scmp.ne.s32.totalorder %s52_s27, %s10672_s10  ;;  %p10677_p0 = scmp.lt.s32.totalorder %s52_s27, %s52_s27 }
  0x3e   :  { %p10678_p1 = scmp.lt.s32.totalorder %s10676_s2, %s10672_s10 }
  0x40   :  { %p10679_p2 = por %p10678_p1, %p10677_p0 }
  0x42   :  { %p10680_p3 = pnand %p10679_p2, %p10673_p13 }
  0x44   :  { %10683 = shalt.err (!%p10680_p3)
}
  0x45   :  { %54 = dma.hbm_to_vmem [thread:$0]  %s13540_s3, 400, %s52_s27, [#allocation9]  }
  0x46   :  { %10706 = dma.done.wait [#allocation3], 128  }
  0x47   :  { %10707 = vsyncadd [#allocation3], 4294967168 }
  0x48   :  { %10708 = dma.done.wait [#allocation6], 26000  }
  0x49   :  { %10709 = vsyncadd [#allocation6], 4294941296 }
  0x4a   :  { %10710 = dma.done.wait [#allocation9], 400  }
  0x4b   :  { %10711 = vsyncadd [#allocation9], 4294966896  ;;  %v13542_v0 = vmov 0.0   ;;  %v71_v1 = vld [vmem:[#allocation5 + $0x8] sm:$0xff]  ;;  %v96_v2 = vld [vmem:[#allocation5 + $0xd0] sm:$0xff]  ;;  %vm270_vm0 = vcmask 523264  }
  0x4c   :  { %354 = vmatprep.mubr.f32.mxu1 %v13542_v0  ;;  %703 = vmatprep.mubr.f32.mxu0 %v13542_v0  ;;  %v70_v3 = vld [vmem:[#allocation5] sm:$0xff]  ;;  %v274_v4 = vand.u32 4294901760, %v71_v1  ;;  %v278_v5 = vand.u32 4294901760, %v96_v2  ;;  %v95_v6 = vld [vmem:[#allocation5 + $0xc8] sm:$0xff]  ;;  %v121_v8 = vld [vmem:[#allocation5 + $0x198] sm:$0xff]  ;;  %vm10722_vm1 = vmmov 0  }
  0x4d   :  { %v276_v7 = vand.u32 4294901760, %v70_v3  ;;  %v146_v9 = vld [vmem:[#allocation5 + $0x260] sm:$0xff]  ;;  %v280_v10 = vand.u32 4294901760, %v95_v6  ;;  %v282_v11 = vand.u32 4294901760, %v121_v8  ;;  %v120_v13 = vld [vmem:[#allocation5 + $0x190] sm:$0xff]  ;;  %v145_v14 = vld [vmem:[#allocation5 + $0x258] sm:$0xff] }
  0x4e   :  { %v286_v12 = vand.u32 4294901760, %v146_v9  ;;  %v171_v15 = vld [vmem:[#allocation5 + $0x328] sm:$0xff]  ;;  %v10799_v16 = vpack.c.bf16 %v278_v5, %v274_v4  ;;  %v10801_v17 = vsub.f32 %v71_v1, %v274_v4  ;;  %v10803_v18 = vsub.f32 %v96_v2, %v278_v5  ;;  %v196_v19 = vld [vmem:[#allocation5 + $0x3f0] sm:$0xff]  ;;  %v170_v20 = vld [vmem:[#allocation5 + $0x320] sm:$0xff]  ;;  %s10723_s3 = smov [#allocation10]  }
  0x4f   :  { %v195_v21 = vld [vmem:[#allocation5 + $0x3e8] sm:$0xff]  ;;  %v10805_v22 = vpack.c.bf16 %v280_v10, %v276_v7  ;;  %v10807_v23 = vsub.f32 %v70_v3, %v276_v7  ;;  %v10809_v24 = vsub.f32 %v95_v6, %v280_v10  ;;  %v221_v26 = vld [vmem:[#allocation5 + $0x4b8] sm:$0xff]  ;;  %v246_v27 = vld [vmem:[#allocation5 + $0x580] sm:$0xff]  ;;  %v10815_v28 = vsub.f32 %v121_v8, %v282_v11  ;;  %s8997_s12 = sshll.u32 %s10723_s3, 4  ;;  %s8998_s12 = int_to_ptr.vmem [resolvable:$true] %s8997_s12 }
  0x50   :  { %v10811_v25 = vpack.c.bf16 %v286_v12, %v282_v11  ;;  %9179 = vmatprep.subr.bf16.mxu1 %v10799_v16  ;;  %9227 = vmatprep.subr.bf16.mxu0 %v10799_v16  ;;  %v284_v29 = vand.u32 4294901760, %v120_v13  ;;  %v288_v30 = vand.u32 4294901760, %v145_v14  ;;  %v290_v31 = vand.u32 4294901760, %v171_v15  ;;  %v220_v40 = vld [vmem:[#allocation5 + $0x4b0] sm:$0xff]  ;;  %v245_v41 = vld [vmem:[#allocation5 + $0x578] sm:$0xff]  ;;  %s10684_s13 = scalar_lea.vmem %s8998_s12, 3200  ;;  %p10689_p5 = scmp.lt.s32.totalorder %s8998_s12, %s8998_s12 }
  0x51   :  { %9181 = vmatpush1.bf16.msra.mxu1 %v10805_v22  ;;  %9229 = vmatpush1.bf16.msra.mxu0 %v10805_v22  ;;  %v294_v32 = vand.u32 4294901760, %v196_v19  ;;  %v292_v33 = vand.u32 4294901760, %v170_v20  ;;  %v296_v34 = vand.u32 4294901760, %v195_v21  ;;  %v298_v35 = vand.u32 4294901760, %v221_v26  ;;  %v67_v46 = vld [vmem:[#allocation2] sm:$0xff]  ;;  %p10685_p4 = scmp.ne.s32.totalorder %s8998_s12, %s10684_s13  ;;  %p10690_p6 = scmp.lt.s32.totalorder %s10684_s13, %s10684_s13 }
  0x52   :  { %9183 = vmatprep.subr.bf16.mxu1 %v10811_v25  ;;  %v10820_v36 = vsub.f32 %v146_v9, %v286_v12  ;;  %9231 = vmatprep.subr.bf16.mxu0 %v10811_v25  ;;  %v10823_v37 = vpack.c.bf16 %v288_v30, %v284_v29  ;;  %v10825_v38 = vsub.f32 %v120_v13, %v284_v29  ;;  %v302_v39 = vand.u32 4294901760, %v246_v27 }
  0x53   :  { %v10827_v42 = vsub.f32 %v145_v14, %v288_v30  ;;  %v10829_v43 = vpack.c.bf16 %v294_v32, %v290_v31  ;;  %v10831_v44 = vsub.f32 %v171_v15, %v290_v31  ;;  %v10833_v45 = vsub.f32 %v196_v19, %v294_v32  ;;  %p10691_p7 = por %p10690_p6, %p10689_p5 }
  0x54   :  { %v10835_v47 = vpack.c.bf16 %v296_v34, %v292_v33  ;;  %v10837_v48 = vsub.f32 %v170_v20, %v292_v33  ;;  %v10839_v49 = vsub.f32 %v195_v21, %v296_v34  ;;  %v10841_v50 = vpack.c.bf16 %v302_v39, %v298_v35 }
  0x55   :  { %9185 = vmatpush1.bf16.msra.mxu1 %v10823_v37  ;;  %9233 = vmatpush1.bf16.msra.mxu0 %v10823_v37  ;;  %v10845_v51 = vsub.f32 %v221_v26, %v298_v35  ;;  %v300_v52 = vand.u32 4294901760, %v220_v40  ;;  %v304_v53 = vand.u32 4294901760, %v245_v41  ;;  %v368_v54 = vand.u32 4294901760, %v10801_v17  ;;  %p10692_p8 = pnand %p10691_p7, %p10685_p4 }
  0x56   :  { %9187 = vmatprep.subr.bf16.mxu1 %v10829_v43  ;;  %9235 = vmatprep.subr.bf16.mxu0 %v10829_v43  ;;  %v380_v55 = vand.u32 4294901760, %v10803_v18  ;;  %v68_v56 = vmax.f32 %v67_v46, 0.0  ;;  %v374_v57 = vand.u32 4294901760, %v10807_v23  ;;  %v386_v58 = vand.u32 4294901760, %v10809_v24 }
  0x57   :  { %v10853_v59 = vsub.f32 %v246_v27, %v302_v39  ;;  %v10855_v60 = vpack.c.bf16 %v304_v53, %v300_v52  ;;  %v10857_v61 = vsub.f32 %v220_v40, %v300_v52  ;;  %v369_v62 = vsub.f32 %v10801_v17, %v368_v54 }
  0x58   :  { %v10860_v63 = vsub.f32 %v245_v41, %v304_v53  ;;  %v381_v1 = vsub.f32 %v10803_v18, %v380_v55  ;;  %v69_v2 = vmin.f32 %v68_v56, 10.0  ;;  %v375_v3 = vsub.f32 %v10807_v23, %v374_v57 }
  0x59   :  { %9189 = vmatpush1.bf16.msra.mxu1 %v10835_v47  ;;  %9237 = vmatpush1.bf16.msra.mxu0 %v10835_v47  ;;  %v370_v4 = vand.u32 4294901760, %v369_v62  ;;  %v9242_v5 = vpack.c.bf16 %v380_v55, %v368_v54  ;;  %v387_v6 = vsub.f32 %v10809_v24, %v386_v58  ;;  %v392_v7 = vand.u32 4294901760, %v10815_v28 }
  0x5a   :  { %9191 = vmatprep.subr.bf16.mxu1 %v10841_v50  ;;  %9239 = vmatprep.subr.bf16.mxu0 %v10841_v50  ;;  %v382_v8 = vand.u32 4294901760, %v381_v1  ;;  %v272_v9 = vsel %vm270_vm0, %v69_v2, 0  ;;  %v376_v10 = vand.u32 4294901760, %v375_v3  ;;  %v404_v11 = vand.u32 4294901760, %v10820_v36 }
  0x5b   :  { %v10872_v12 = vand.u32 4294901760, %v272_v9  ;;  %v388_v13 = vand.u32 4294901760, %v387_v6  ;;  %v393_v14 = vsub.f32 %v10815_v28, %v392_v7  ;;  %v398_v15 = vand.u32 4294901760, %v10825_v38 }
  0x5c   :  { %v9194_v19 = vpack.c.bf16 %v382_v8, %v370_v4  ;;  %v9244_v20 = vpack.c.bf16 %v386_v58, %v374_v57  ;;  %v405_v21 = vsub.f32 %v10820_v36, %v404_v11  ;;  %v410_v26 = vand.u32 4294901760, %v10827_v42 }
  0x5d   :  { %9193 = vmatpush1.bf16.msra.mxu1 %v10855_v60  ;;  %9241 = vmatpush1.bf16.msra.mxu0 %v10855_v60  ;;  %v10881_v27 = vsub.f32 %v272_v9, %v10872_v12  ;;  %v394_v29 = vand.u32 4294901760, %v393_v14  ;;  %v9246_v30 = vpack.c.bf16 %v404_v11, %v392_v7  ;;  %v399_v31 = vsub.f32 %v10825_v38, %v398_v15 }
  0x5e   :  { %9195 = vmatprep.subr.bf16.mxu1 %v9194_v19  ;;  %9243 = vmatprep.subr.bf16.mxu0 %v9242_v5  ;;  %v9196_v32 = vpack.c.bf16 %v388_v13, %v376_v10  ;;  %v406_v33 = vand.u32 4294901760, %v405_v21  ;;  %v411_v34 = vsub.f32 %v10827_v42, %v410_v26  ;;  %v416_v35 = vand.u32 4294901760, %v10831_v44  ;;  %v73_v21 = vld [vmem:[#allocation5 + $0x18] sm:$0xff] }
  0x5f   :  { %13872 = vst [vmem:[#allocation15_spill] sm:$0xff] %v10881_v27  ;;  %v10887_v39 = vand.u32 4294901760, %v10881_v27  ;;  %v400_v40 = vand.u32 4294901760, %v399_v31  ;;  %v428_v41 = vand.u32 4294901760, %v10833_v45  ;;  %v422_v46 = vand.u32 4294901760, %v10837_v48 }
  0x60   :  { %v412_v52 = vand.u32 4294901760, %v411_v34  ;;  %v9248_v53 = vpack.c.bf16 %v410_v26, %v398_v15  ;;  %v417_v54 = vsub.f32 %v10831_v44, %v416_v35  ;;  %v434_v55 = vand.u32 4294901760, %v10839_v49 }
  0x61   :  { %13873 = vst [vmem:[#allocation16_spill] sm:$0xff] %v10887_v39  ;;  %v358_v56 = vsub.f32 %v10881_v27, %v10887_v39  ;;  %707 = vmatmul.mubr.f32.vlgmr.msra.gmra.mrb[0].mxu0 %v10887_v39  ;;  %v9198_v57 = vpack.c.bf16 %v406_v33, %v394_v29  ;;  %v429_v58 = vsub.f32 %v10833_v45, %v428_v41  ;;  %v440_v8 = vand.u32 4294901760, %v10845_v51  ;;  %v175_v39 = vld [vmem:[#allocation5 + $0x348] sm:$0xff] }
  0x62   :  { %v423_v62 = vsub.f32 %v10837_v48, %v422_v46  ;;  %9245 = vmatpush1.bf16.msra.mxu0 %v9244_v20  ;;  %v9200_v1 = vpack.c.bf16 %v412_v52, %v400_v40  ;;  %v418_v2 = vand.u32 4294901760, %v417_v54  ;;  %v9250_v3 = vpack.c.bf16 %v428_v41, %v416_v35  ;;  %825 = vmatprep.mubr.f32.mxu0 %v13542_v0  ;;  %v98_v40 = vld [vmem:[#allocation5 + $0xe0] sm:$0xff]  ;;  %v100_v54 = vld [vmem:[#allocation5 + $0xf0] sm:$0xff] }
  0x63   :  { %v435_v4 = vsub.f32 %v10839_v49, %v434_v55  ;;  %v10900_v5 = vand.u32 4294901760, %v358_v56  ;;  %9247 = vmatprep.subr.bf16.mxu0 %v9246_v30  ;;  %v430_v6 = vand.u32 4294901760, %v429_v58  ;;  %v452_v10 = vand.u32 4294901760, %v10853_v59  ;;  %v147_v58 = vld [vmem:[#allocation5 + $0x268] sm:$0xff]  ;;  %v198_v20 = vld [vmem:[#allocation5 + $0x400] sm:$0xff] }
  0x64   :  { %v424_v7 = vand.u32 4294901760, %v423_v62  ;;  %v446_v11 = vand.u32 4294901760, %v10857_v61  ;;  %v458_v13 = vand.u32 4294901760, %v10860_v63  ;;  %v9252_v15 = vpack.c.bf16 %v434_v55, %v422_v46  ;;  %v72_v55 = vld [vmem:[#allocation5 + $0x10] sm:$0xff]  ;;  %v122_v62 = vld [vmem:[#allocation5 + $0x1a0] sm:$0xff] }
  0x65   :  { %13874 = vst [vmem:[#allocation17_spill] sm:$0xff] %v10900_v5  ;;  %v436_v9 = vand.u32 4294901760, %v435_v4  ;;  %360 = vmatmul.mubr.f32.vlgmr.msra.gmra.mrb[0].mxu1 %v10900_v5  ;;  %v9202_v14 = vpack.c.bf16 %v430_v6, %v418_v2  ;;  %v441_v19 = vsub.f32 %v10845_v51, %v440_v8  ;;  %v453_v29 = vsub.f32 %v10853_v59, %v452_v10  ;;  %v97_v2 = vld [vmem:[#allocation5 + $0xd8] sm:$0xff]  ;;  %v150_v6 = vld [vmem:[#allocation5 + $0x280] sm:$0xff] }
  0x66   :  { %9197 = vmatpush1.bf16.msra.mxu1 %v9196_v32  ;;  %9249 = vmatpush1.bf16.msra.mxu0 %v9248_v53  ;;  %v9254_v33 = vpack.c.bf16 %v452_v10, %v440_v8  ;;  %v447_v34 = vsub.f32 %v10857_v61, %v446_v11  ;;  %v459_v35 = vsub.f32 %v10860_v63, %v458_v13  ;;  %v921_v52 = vand.u32 4294901760, %v73_v21  ;;  %v75_v53 = vld [vmem:[#allocation5 + $0x28] sm:$0xff]  ;;  %v74_v8 = vld [vmem:[#allocation5 + $0x20] sm:$0xff] }
  0x67   :  { %v9204_v26 = vpack.c.bf16 %v436_v9, %v424_v7  ;;  %9199 = vmatprep.subr.bf16.mxu1 %v9198_v57  ;;  %9251 = vmatprep.subr.bf16.mxu0 %v9250_v3  ;;  %v442_v31 = vand.u32 4294901760, %v441_v19  ;;  %v454_v41 = vand.u32 4294901760, %v453_v29  ;;  %v9256_v46 = vpack.c.bf16 %v458_v13, %v446_v11  ;;  %v99_v19 = vld [vmem:[#allocation5 + $0xe8] sm:$0xff] }
  0x68   :  { %510 = vmatprep.mubr.f32.mxu1 %v13542_v0  ;;  %v448_v56 = vand.u32 4294901760, %v447_v34  ;;  %v460_v57 = vand.u32 4294901760, %v459_v35  ;;  %v925_v7 = vand.u32 4294901760, %v98_v40  ;;  %v1568_v10 = vand.u32 4294901760, %v75_v53  ;;  %v148_v35 = vld [vmem:[#allocation5 + $0x270] sm:$0xff] }
  0x69   :  { %v9206_v3 = vpack.c.bf16 %v454_v41, %v442_v31  ;;  %v1572_v11 = vand.u32 4294901760, %v100_v54  ;;  %v923_v13 = vand.u32 4294901760, %v72_v55  ;;  %v10930_v31 = vsub.f32 %v73_v21, %v921_v52  ;;  %v125_v41 = vld [vmem:[#allocation5 + $0x1b8] sm:$0xff] }
  0x6a   :  { %9201 = vmatpush1.bf16.msra.mxu1 %v9200_v1  ;;  %9253 = vmatpush1.bf16.msra.mxu0 %v9252_v15  ;;  %v123_v1 = vld [vmem:[#allocation5 + $0x1a8] sm:$0xff]  ;;  %v9208_v15 = vpack.c.bf16 %v460_v57, %v448_v56  ;;  %v10928_v29 = vpack.c.bf16 %v925_v7, %v921_v52  ;;  %v927_v34 = vand.u32 4294901760, %v97_v2  ;;  %v10932_v4 = vsub.f32 %v98_v40, %v925_v7 }
  0x6b   :  { %9203 = vmatprep.subr.bf16.mxu1 %v9202_v14  ;;  %9255 = vmatprep.subr.bf16.mxu0 %v9254_v33  ;;  %v10934_v14 = vpack.c.bf16 %v1572_v11, %v1568_v10  ;;  %v10936_v33 = vsub.f32 %v75_v53, %v1568_v10  ;;  %v1570_v9 = vand.u32 4294901760, %v74_v8  ;;  %v10938_v56 = vsub.f32 %v100_v54, %v1572_v11  ;;  %v124_v10 = vld [vmem:[#allocation5 + $0x1b0] sm:$0xff]  ;;  %v149_v54 = vld [vmem:[#allocation5 + $0x278] sm:$0xff] }
  0x6c   :  { %13875 = vst [vmem:[#allocation18_spill] sm:$0xff] %v10928_v29  ;;  %v10940_v57 = vpack.c.bf16 %v927_v34, %v923_v13  ;;  %v10942_v21 = vsub.f32 %v72_v55, %v923_v13  ;;  %v1574_v52 = vand.u32 4294901760, %v99_v19  ;;  %v929_v40 = vand.u32 4294901760, %v123_v1  ;;  %v173_v11 = vld [vmem:[#allocation5 + $0x338] sm:$0xff] }
  0x6d   :  { %v933_v7 = vand.u32 4294901760, %v148_v35  ;;  %v1576_v32 = vand.u32 4294901760, %v125_v41  ;;  %v1580_v53 = vand.u32 4294901760, %v150_v6  ;;  %v10945_v30 = vsub.f32 %v97_v2, %v927_v34  ;;  %v200_v2 = vld [vmem:[#allocation5 + $0x410] sm:$0xff] }
  0x6e   :  { %9205 = vmatpush1.bf16.msra.mxu1 %v9204_v26  ;;  %9257 = vmatpush1.bf16.msra.mxu0 %v9256_v46  ;;  %13876 = vst [vmem:[#allocation19_spill] sm:$0xff] %v10940_v57  ;;  %v10947_v0 = vsub.f32 %v74_v8, %v1570_v9  ;;  %v931_v26 = vand.u32 4294901760, %v122_v62  ;;  %v935_v46 = vand.u32 4294901760, %v147_v58  ;;  %v10950_v55 = vpack.c.bf16 %v1574_v52, %v1570_v9  ;;  %v172_v57 = vld [vmem:[#allocation5 + $0x330] sm:$0xff] }
  0x6f   :  { %9207 = vmatprep.subr.bf16.mxu1 %v9206_v3  ;;  %9259 = vmatprep.subr.bf16.mxu0 %v10799_v16  ;;  %v10952_v3 = vsub.f32 %v99_v19, %v1574_v52  ;;  %v10954_v16 = vpack.c.bf16 %v933_v7, %v929_v40  ;;  %v10956_v13 = vsub.f32 %v123_v1, %v929_v40  ;;  %v1578_v9 = vand.u32 4294901760, %v124_v10 }
  0x70   :  { %13877 = vst [vmem:[#allocation20_spill] sm:$0xff] %v10950_v55  ;;  %v10959_v8 = vsub.f32 %v148_v35, %v933_v7  ;;  %v10961_v34 = vpack.c.bf16 %v1580_v53, %v1576_v32  ;;  %v10963_v5 = vsub.f32 %v125_v41, %v1576_v32  ;;  %v13881_v19 = vpack.c.bf16 %v10803_v18, %v10801_v17  ;;  %v197_v35 = vld [vmem:[#allocation5 + $0x3f8] sm:$0xff] }
  0x71   :  { %827 = vmatmul.mubr.f32.vlgmr.msra.gmra.mrb[0].mxu0 %v10872_v12  ;;  %13878 = vst [vmem:[#allocation21_spill] sm:$0xff] %v10954_v16  ;;  %v10969_v1 = vsub.f32 %v150_v6, %v1580_v53  ;;  %v10971_v52 = vpack.c.bf16 %v935_v46, %v931_v26  ;;  %v13883_v40 = vmov 0.0   ;;  %v10974_v7 = vsub.f32 %v122_v62, %v931_v26  ;;  %v199_v53 = vld [vmem:[#allocation5 + $0x408] sm:$0xff] }
  0x72   :  { %9209 = vmatpush1.bf16.msra.mxu1 %v9208_v15  ;;  %9261 = vmatpush1.bf16.msra.mxu0 %v10805_v22  ;;  %13879 = vst [vmem:[#allocation22_spill] sm:$0xff] %v10961_v34  ;;  %13880 = vst [vmem:[#allocation23_spill] sm:$0xff] %v10963_v5  ;;  %v1582_v15 = vand.u32 4294901760, %v149_v54  ;;  %v937_v22 = vand.u32 4294901760, %v173_v11  ;;  %v941_v32 = vand.u32 4294901760, %v198_v20  ;;  %v1584_v41 = vand.u32 4294901760, %v175_v39 }
  0x73   :  { %9211 = vmatprep.subr.bf16.mxu1 %v13881_v19  ;;  %9263 = vmatprep.subr.bf16.mxu0 %v10811_v25  ;;  %13882 = vst [vmem:[#allocation24_spill] sm:$0xff] %v10971_v52  ;;  %13884 = vst [vmem:[#allocation25_spill] sm:$0xff] %v10974_v7  ;;  %v1588_v16 = vand.u32 4294901760, %v200_v2  ;;  %v174_v5 = vld [vmem:[#allocation5 + $0x340] sm:$0xff]  ;;  %v10977_v17 = vsub.f32 %v147_v58, %v935_v46  ;;  %v10981_v25 = vsub.f32 %v124_v10, %v1578_v9  ;;  %v223_v19 = vld [vmem:[#allocation5 + $0x4c8] sm:$0xff] }
  0x74   :  { %913 = vmatprep.mubr.f32.mxu0 %v13883_v40  ;;  %v10979_v18 = vpack.c.bf16 %v1582_v15, %v1578_v9  ;;  %v939_v6 = vand.u32 4294901760, %v172_v57  ;;  %v13887_v52 = vpack.c.bf16 %v10809_v24, %v10807_v23  ;;  %v10987_v62 = vsub.f32 %v149_v54, %v1582_v15  ;;  %v248_v46 = vld [vmem:[#allocation5 + $0x590] sm:$0xff]  ;;  %v250_v10 = vld [vmem:[#allocation5 + $0x5a0] sm:$0xff] }
  0x75   :  { %512 = vmatmul.mubr.f32.vlgmr.msra.gmra.mrb[0].mxu1 %v10872_v12  ;;  %13885 = vst [vmem:[#allocation26_spill] sm:$0xff] %v10977_v17  ;;  %v10989_v26 = vpack.c.bf16 %v941_v32, %v937_v22  ;;  %v10991_v7 = vsub.f32 %v173_v11, %v937_v22  ;;  %v943_v58 = vand.u32 4294901760, %v197_v35  ;;  %v225_v17 = vld [vmem:[#allocation5 + $0x4d8] sm:$0xff]  ;;  %v13889_v9 = vpack.c.bf16 %v10820_v36, %v10815_v28  ;;  %v247_v28 = vld [vmem:[#allocation5 + $0x588] sm:$0xff] }
  0x76   :  { %13886 = vst [vmem:[#allocation27_spill] sm:$0xff] %v10979_v18  ;;  %9213 = vmatpush1.bf16.msra.mxu1 %v13887_v52  ;;  %9265 = vmatpush1.bf16.msra.mxu0 %v10823_v37  ;;  %v10997_v23 = vsub.f32 %v198_v20, %v941_v32  ;;  %v10999_v24 = vpack.c.bf16 %v1588_v16, %v1584_v41  ;;  %v1586_v54 = vand.u32 4294901760, %v174_v5  ;;  %v222_v52 = vld [vmem:[#allocation5 + $0x4c0] sm:$0xff]  ;;  %v1590_v22 = vand.u32 4294901760, %v199_v53 }
  0x77   :  { %13888 = vst [vmem:[#allocation28_spill] sm:$0xff] %v10989_v26  ;;  %9215 = vmatprep.subr.bf16.mxu1 %v13889_v9  ;;  %9267 = vmatprep.subr.bf16.mxu0 %v10829_v43  ;;  %v11001_v37 = vsub.f32 %v175_v39, %v1584_v41  ;;  %v11004_v11 = vsub.f32 %v200_v2, %v1588_v16  ;;  %v945_v26 = vand.u32 4294901760, %v223_v19  ;;  %v949_v43 = vand.u32 4294901760, %v248_v46  ;;  %v224_v9 = vld [vmem:[#allocation5 + $0x4d0] sm:$0xff] }
  0x78   :  { %13890 = vst [vmem:[#allocation29_spill] sm:$0xff] %v10999_v24  ;;  %614 = vmatprep.mubr.f32.mxu1 %v13883_v40  ;;  %v11006_v15 = vsub.f32 %v172_v57, %v939_v6  ;;  %v11008_v36 = vpack.c.bf16 %v943_v58, %v939_v6  ;;  %v1592_v20 = vand.u32 4294901760, %v225_v17  ;;  %v1596_v32 = vand.u32 4294901760, %v250_v10 }
  0x79   :  { %v13893_v39 = vpack.c.bf16 %v10827_v42, %v10825_v38  ;;  %v11014_v41 = vsub.f32 %v197_v35, %v943_v58  ;;  %v11016_v16 = vpack.c.bf16 %v1590_v22, %v1586_v54  ;;  %v11018_v57 = vsub.f32 %v174_v5, %v1586_v54  ;;  %v249_v35 = vld [vmem:[#allocation5 + $0x598] sm:$0xff] }
  0x7a   :  { %13891 = vst [vmem:[#allocation30_spill] sm:$0xff] %v11006_v15  ;;  %13892 = vst [vmem:[#allocation31_spill] sm:$0xff] %v11008_v36  ;;  %9269 = vmatpush1.bf16.msra.mxu0 %v10835_v47  ;;  %v947_v2 = vand.u32 4294901760, %v222_v52  ;;  %v13895_v6 = vpack.c.bf16 %v10833_v45, %v10831_v44  ;;  %v11024_v15 = vsub.f32 %v199_v53, %v1590_v22  ;;  %v951_v47 = vand.u32 4294901760, %v247_v28 }
  0x7b   :  { %9217 = vmatpush1.bf16.msra.mxu1 %v13893_v39  ;;  %13894 = vst [vmem:[#allocation32_spill] sm:$0xff] %v11016_v16  ;;  %9271 = vmatprep.subr.bf16.mxu0 %v10841_v50  ;;  %v11026_v38 = vpack.c.bf16 %v949_v43, %v945_v26  ;;  %v11028_v42 = vsub.f32 %v223_v19, %v945_v26  ;;  %v1594_v50 = vand.u32 4294901760, %v224_v9  ;;  %v13561_v53 = vand.u32 4294901760, %v10930_v31 }
  0x7c   :  { %9219 = vmatprep.subr.bf16.mxu1 %v13895_v6  ;;  %v11030_v58 = vsub.f32 %v248_v46, %v949_v43  ;;  %v11032_v5 = vpack.c.bf16 %v1596_v32, %v1592_v20  ;;  %v11034_v54 = vsub.f32 %v225_v17, %v1592_v20  ;;  %v11036_v39 = vsub.f32 %v250_v10, %v1596_v32 }
  0x7d   :  { %13896 = vst [vmem:[#allocation33_spill] sm:$0xff] %v11026_v38  ;;  %v11038_v44 = vpack.c.bf16 %v951_v47, %v947_v2  ;;  %v11040_v45 = vsub.f32 %v222_v52, %v947_v2  ;;  %v13898_v19 = vpack.c.bf16 %v10839_v49, %v10837_v48  ;;  %v1598_v26 = vand.u32 4294901760, %v249_v35 }
  0x7e   :  { %13897 = vst [vmem:[#allocation34_spill] sm:$0xff] %v11032_v5  ;;  %9273 = vmatpush1.bf16.msra.mxu0 %v10855_v60  ;;  %v13558_v46 = vand.u32 4294901760, %v10932_v4  ;;  %v13564_v17 = vand.u32 4294901760, %v10936_v33  ;;  %v13562_v10 = vand.u32 4294901760, %v10938_v56  ;;  %v13899_v52 = vpack.c.bf16 %v10853_v59, %v10845_v51 }
  0x7f   :  { %9221 = vmatpush1.bf16.msra.mxu1 %v13898_v19  ;;  %9371 = vmatprep.subr.bf16.mxu0 %v10934_v14  ;;  %v11054_v22 = vsub.f32 %v247_v28, %v951_v47  ;;  %v11056_v43 = vsub.f32 %v224_v9, %v1594_v50  ;;  %v1016_v48 = vsub.f32 %v10930_v31, %v13561_v53  ;;  %v13556_v49 = vand.u32 4294901760, %v10942_v21 }
  0x80   :  { %9223 = vmatprep.subr.bf16.mxu1 %v13899_v52  ;;  %v1028_v60 = vsub.f32 %v10932_v4, %v13558_v46  ;;  %v1663_v51 = vsub.f32 %v10936_v33, %v13564_v17  ;;  %v1675_v59 = vsub.f32 %v10938_v56, %v13562_v10  ;;  %v13557_v28 = vand.u32 4294901760, %v10945_v30  ;;  %v13903_v10 = vld [vmem:[#allocation19_spill] sm:$0xff] }
  0x81   :  { %915 = vmatmul.mubr.f32.vlgmr.msra.gmra.mrb[0].mxu0 %v10872_v12  ;;  %v1017_v20 = vand.u32 4294901760, %v1016_v48  ;;  %v1022_v32 = vsub.f32 %v10942_v21, %v13556_v49  ;;  %v13559_v2 = vand.u32 4294901760, %v10947_v0  ;;  %v13560_v9 = vand.u32 4294901760, %v10952_v3 }
  0x82   :  { %v13900_v6 = vpack.c.bf16 %v10860_v63, %v10857_v61  ;;  %9373 = vmatpush1.bf16.msra.mxu0 %v10950_v55  ;;  %v11082_v47 = vpack.c.bf16 %v1598_v26, %v1594_v50  ;;  %v1029_v19 = vand.u32 4294901760, %v1028_v60  ;;  %v1664_v52 = vand.u32 4294901760, %v1663_v51  ;;  %1648 = vmatprep.mubr.f32.mxu0 %v13883_v40 }
  0x83   :  { %v1034_v48 = vsub.f32 %v10945_v30, %v13557_v28  ;;  %9375 = vmatprep.subr.bf16.mxu0 %v10961_v34  ;;  %v1676_v49 = vand.u32 4294901760, %v1675_v59  ;;  %v1669_v61 = vsub.f32 %v10947_v0, %v13559_v2  ;;  %v1681_v63 = vsub.f32 %v10952_v3, %v13560_v9  ;;  %v13902_v9 = vld [vmem:[#allocation23_spill] sm:$0xff] }
  0x84   :  { %9225 = vmatpush1.bf16.msra.mxu1 %v13900_v6  ;;  %13901 = vst [vmem:[#allocation35_spill] sm:$0xff] %v11082_v47  ;;  %v13563_v50 = vand.u32 4294901760, %v10956_v13  ;;  %v11096_v60 = vsub.f32 %v249_v35, %v1598_v26  ;;  %v11098_v51 = vpack.c.bf16 %v1029_v19, %v1017_v20  ;;  %v1023_v6 = vand.u32 4294901760, %v1022_v32  ;;  %v13904_v32 = vld [vmem:[#allocation25_spill] sm:$0xff] }
  0x85   :  { %9275 = vmatprep.subr.bf16.mxu1 %v10928_v29  ;;  %v13567_v28 = vand.u32 4294901760, %v10959_v8  ;;  %v1035_v59 = vand.u32 4294901760, %v1034_v48  ;;  %v1670_v46 = vand.u32 4294901760, %v1669_v61  ;;  %v13568_v53 = vand.u32 4294901760, %v13902_v9  ;;  %v13905_v48 = vld [vmem:[#allocation21_spill] sm:$0xff] }
  0x86   :  { %v1040_v2 = vsub.f32 %v10956_v13, %v13563_v50  ;;  %9377 = vmatpush1.bf16.msra.mxu0 %v10979_v18  ;;  %v1682_v35 = vand.u32 4294901760, %v1681_v63  ;;  %v13571_v20 = vand.u32 4294901760, %v10969_v1  ;;  %v13574_v19 = vand.u32 4294901760, %v13904_v32  ;;  %v13906_v18 = vld [vmem:[#allocation26_spill] sm:$0xff]  ;;  %v13911_v29 = vld [vmem:[#allocation17_spill] sm:$0xff] }
  0x87   :  { %617 = vmatmul.mubr.f32.vlgmr.msra.gmra.mrb[0].mxu1 %v10881_v27  ;;  %v1052_v26 = vsub.f32 %v10959_v8, %v13567_v28  ;;  %9379 = vmatprep.subr.bf16.mxu0 %v10999_v24  ;;  %v9386_v61 = vpack.c.bf16 %v1676_v49, %v1664_v52  ;;  %v1687_v17 = vsub.f32 %v13902_v9, %v13568_v53  ;;  %v13575_v63 = vand.u32 4294901760, %v13906_v18  ;;  %v13907_v24 = vld [vmem:[#allocation24_spill] sm:$0xff] }
  0x88   :  { %9277 = vmatpush1.bf16.msra.mxu1 %v13903_v10  ;;  %v1041_v50 = vand.u32 4294901760, %v1040_v2  ;;  %1001 = vmatprep.mubr.f32.mxu1 %v13883_v40  ;;  %v1699_v28 = vsub.f32 %v10969_v1, %v13571_v20  ;;  %v13576_v49 = vand.u32 4294901760, %v10981_v25  ;;  %v11128_v2 = vpack.c.bf16 %v1035_v59, %v1023_v6  ;;  %v13908_v59 = vld [vmem:[#allocation28_spill] sm:$0xff] }
  0x89   :  { %9279 = vmatprep.subr.bf16.mxu1 %v13905_v48  ;;  %v1053_v10 = vand.u32 4294901760, %v1052_v26  ;;  %v1046_v48 = vsub.f32 %v13904_v32, %v13574_v19  ;;  %v1058_v52 = vsub.f32 %v13906_v18, %v13575_v63  ;;  %v13582_v53 = vand.u32 4294901760, %v10987_v62 }
  0x8a   :  { %9381 = vmatpush1.bf16.msra.mxu0 %v11016_v16  ;;  %v9388_v20 = vpack.c.bf16 %v1682_v35, %v1670_v46  ;;  %v1688_v19 = vand.u32 4294901760, %v1687_v17  ;;  %v1693_v6 = vsub.f32 %v10981_v25, %v13576_v49  ;;  %v1700_v63 = vand.u32 4294901760, %v1699_v28 }
  0x8b   :  { %v11137_v34 = vpack.c.bf16 %v1053_v10, %v1041_v50  ;;  %9383 = vmatprep.subr.bf16.mxu0 %v11032_v5  ;;  %v1705_v26 = vsub.f32 %v10987_v62, %v13582_v53  ;;  %v13581_v10 = vand.u32 4294901760, %v10997_v23  ;;  %v1047_v17 = vand.u32 4294901760, %v1046_v48 }
  0x8c   :  { %9281 = vmatpush1.bf16.msra.mxu1 %v13907_v24  ;;  %v13909_v24 = vand.u32 4294901760, %v10991_v7  ;;  %v1059_v50 = vand.u32 4294901760, %v1058_v52  ;;  %v13589_v35 = vand.u32 4294901760, %v11001_v37  ;;  %v13590_v49 = vand.u32 4294901760, %v11004_v11  ;;  %v13910_v52 = vld [vmem:[#allocation30_spill] sm:$0xff] }
  0x8d   :  { %9283 = vmatprep.subr.bf16.mxu1 %v13908_v59  ;;  %v1694_v16 = vand.u32 4294901760, %v1693_v6  ;;  %v1706_v59 = vand.u32 4294901760, %v1705_v26  ;;  %v1076_v28 = vsub.f32 %v10997_v23, %v13581_v10  ;;  %v13598_v6 = vand.u32 4294901760, %v13910_v52 }
  0x8e   :  { %v1064_v46 = vsub.f32 %v10991_v7, %v13909_v24  ;;  %9385 = vmatpush1.bf16.msra.mxu0 %v11082_v47  ;;  %v1711_v24 = vsub.f32 %v11001_v37, %v13589_v35  ;;  %v1723_v48 = vsub.f32 %v11004_v11, %v13590_v49  ;;  %v13595_v26 = vand.u32 4294901760, %v11014_v41 }
  0x8f   :  { %9387 = vmatprep.subr.bf16.mxu0 %v9386_v61  ;;  %v1077_v10 = vand.u32 4294901760, %v1076_v28  ;;  %v13596_v53 = vand.u32 4294901760, %v11018_v57  ;;  %v13597_v47 = vand.u32 4294901760, %v11024_v15  ;;  %v1070_v49 = vsub.f32 %v13910_v52, %v13598_v6 }
  0x90   :  { %v1065_v5 = vand.u32 4294901760, %v1064_v46  ;;  %9285 = vmatpush1.bf16.msra.mxu1 %v11008_v36  ;;  %v9390_v46 = vpack.c.bf16 %v1700_v63, %v1688_v19  ;;  %v9296_v36 = vpack.c.bf16 %v1059_v50, %v1047_v17  ;;  %v1712_v55 = vand.u32 4294901760, %v1711_v24 }
  0x91   :  { %9287 = vmatprep.subr.bf16.mxu1 %v11026_v38  ;;  %v1724_v35 = vand.u32 4294901760, %v1723_v48  ;;  %1654 = vmatmul.mubr.f32.vlgmr.msra.gmra.mrb[2].mxu0 %v13911_v29  ;;  %v1082_v38 = vsub.f32 %v11014_v41, %v13595_v26  ;;  %v1717_v19 = vsub.f32 %v11018_v57, %v13596_v53  ;;  %v1729_v61 = vsub.f32 %v11024_v15, %v13597_v47 }
  0x92   :  { %v1087_v63 = vand.u32 4294901760, %v11028_v42  ;;  %9389 = vmatpush1.bf16.msra.mxu0 %v9388_v20  ;;  %v9392_v17 = vpack.c.bf16 %v1706_v59, %v1694_v16  ;;  %v9298_v50 = vpack.c.bf16 %v1077_v10, %v1065_v5  ;;  %v1099_v24 = vand.u32 4294901760, %v11030_v58  ;;  %1804 = vmatprep.mubr.f32.mxu0 %v13883_v40 }
  0x93   :  { %v9394_v28 = vpack.c.bf16 %v1724_v35, %v1712_v55  ;;  %9391 = vmatprep.subr.bf16.mxu0 %v9390_v46  ;;  %v1718_v48 = vand.u32 4294901760, %v1717_v19  ;;  %v1730_v26 = vand.u32 4294901760, %v1729_v61  ;;  %v13604_v47 = vand.u32 4294901760, %v11034_v54 }
  0x94   :  { %9289 = vmatpush1.bf16.msra.mxu1 %v11038_v44  ;;  %v1088_v53 = vsub.f32 %v11028_v42, %v1087_v63  ;;  %v1071_v6 = vand.u32 4294901760, %v1070_v49  ;;  %v1100_v16 = vsub.f32 %v11030_v58, %v1099_v24  ;;  %v13602_v55 = vand.u32 4294901760, %v11036_v39 }
  0x95   :  { %9291 = vmatprep.subr.bf16.mxu1 %v11098_v51  ;;  %v13600_v5 = vand.u32 4294901760, %v11040_v45  ;;  %v1083_v51 = vand.u32 4294901760, %v1082_v38  ;;  %v9396_v20 = vpack.c.bf16 %v1730_v26, %v1718_v48  ;;  %v1735_v59 = vsub.f32 %v11034_v54, %v13604_v47 }
  0x96   :  { %v13599_v49 = vand.u32 4294901760, %v11054_v22  ;;  %9393 = vmatpush1.bf16.msra.mxu0 %v9392_v17  ;;  %v1089_v10 = vand.u32 4294901760, %v1088_v53  ;;  %v1747_v35 = vsub.f32 %v11036_v39, %v13602_v55  ;;  %v13601_v38 = vand.u32 4294901760, %v11056_v43 }
  0x97   :  { %1007 = vmatmul.mubr.f32.vlgmr.msra.gmra.mrb[2].mxu1 %v13911_v29  ;;  %v1094_v46 = vsub.f32 %v11040_v45, %v13600_v5  ;;  %9395 = vmatprep.subr.bf16.mxu0 %v9394_v28  ;;  %v1101_v26 = vand.u32 4294901760, %v1100_v16  ;;  %v1736_v19 = vand.u32 4294901760, %v1735_v59  ;;  %v13603_v53 = vand.u32 4294901760, %v11096_v60 }
  0x98   :  { %9293 = vmatpush1.bf16.msra.mxu1 %v11128_v2  ;;  %v1106_v2 = vsub.f32 %v11054_v22, %v13599_v49  ;;  %v1748_v61 = vand.u32 4294901760, %v1747_v35  ;;  %v1741_v17 = vsub.f32 %v11056_v43, %v13601_v38  ;;  %1157 = vmatprep.mubr.f32.mxu1 %v13883_v40  ;;  %v9300_v48 = vpack.c.bf16 %v1083_v51, %v1071_v6 }
  0x99   :  { %9295 = vmatprep.subr.bf16.mxu1 %v11137_v34  ;;  %v1753_v34 = vsub.f32 %v11096_v60, %v13603_v53  ;;  %v1095_v16 = vand.u32 4294901760, %v1094_v46  ;;  %v9302_v5 = vpack.c.bf16 %v1101_v26, %v1089_v10  ;;  %v9402_v38 = vpack.c.bf16 %v10938_v56, %v10936_v33 }
  0x9a   :  { %9397 = vmatpush1.bf16.msra.mxu0 %v9396_v20  ;;  %v9398_v28 = vpack.c.bf16 %v1748_v61, %v1736_v19  ;;  %v1107_v59 = vand.u32 4294901760, %v1106_v2  ;;  %v1742_v49 = vand.u32 4294901760, %v1741_v17  ;;  %v9404_v51 = vpack.c.bf16 %v10952_v3, %v10947_v0 }
  0x9b   :  { %v1754_v35 = vand.u32 4294901760, %v1753_v34  ;;  %v9308_v20 = vpack.c.bf16 %v10945_v30, %v10942_v21  ;;  %v9312_v10 = vpack.c.bf16 %v13906_v18, %v13904_v32  ;;  %v9314_v46 = vpack.c.bf16 %v10997_v23, %v10991_v7  ;;  %v13913_v34 = vld [vmem:[#allocation20_spill] sm:$0xff] }
  0x9c   :  { %9297 = vmatpush1.bf16.msra.mxu1 %v9296_v36  ;;  %9399 = vmatprep.subr.bf16.mxu0 %v9398_v28  ;;  %v9304_v6 = vpack.c.bf16 %v1107_v59, %v1095_v16  ;;  %v9306_v36 = vpack.c.bf16 %v10932_v4, %v10930_v31  ;;  %v9414_v26 = vpack.c.bf16 %v11036_v39, %v11034_v54  ;;  %v13914_v28 = vld [vmem:[#allocation22_spill] sm:$0xff]  ;;  %v13915_v16 = vld [vmem:[#allocation19_spill] sm:$0xff]  ;;  %v13916_v59 = vld [vmem:[#allocation21_spill] sm:$0xff] }
  0x9d   :  { %9299 = vmatprep.subr.bf16.mxu1 %v9298_v50  ;;  %v9400_v55 = vpack.c.bf16 %v1754_v35, %v1742_v49  ;;  %v9406_v50 = vpack.c.bf16 %v10969_v1, %v13902_v9  ;;  %v9410_v49 = vpack.c.bf16 %v11004_v11, %v11001_v37  ;;  %v9316_v19 = vpack.c.bf16 %v11014_v41, %v13910_v52  ;;  %v13917_v35 = vld [vmem:[#allocation27_spill] sm:$0xff] }
  0x9e   :  { %v9318_v2 = vpack.c.bf16 %v11030_v58, %v11028_v42  ;;  %v9416_v61 = vpack.c.bf16 %v11096_v60, %v11056_v43  ;;  %v9320_v17 = vpack.c.bf16 %v11054_v22, %v11040_v45  ;;  %v13956_v42 = vand.u32 4294901760, %v11096_v60 }
  0x9f   :  { %9401 = vmatpush1.bf16.msra.mxu0 %v9400_v55  ;;  %v9310_v55 = vpack.c.bf16 %v10959_v8, %v10956_v13 }
  0xa0   :  { %9301 = vmatpush1.bf16.msra.mxu1 %v9300_v48  ;;  %9403 = vmatprep.subr.bf16.mxu0 %v9402_v38  ;;  %v9412_v38 = vpack.c.bf16 %v11024_v15, %v11018_v57  ;;  %v13912_v48 = vld [vmem:[#allocation18_spill] sm:$0xff] }
  0xa1   :  { %9303 = vmatprep.subr.bf16.mxu1 %v9302_v5  ;;  %v9408_v5 = vpack.c.bf16 %v10987_v62, %v10981_v25 }
  0xa2   :  { %1806 = vmatmul.mubr.f32.vlgmr.msra.gmra.mrb[2].mxu0 %v10872_v12 }
  0xa3   :  { %9405 = vmatpush1.bf16.msra.mxu0 %v9404_v51  ;;  %1908 = vmatprep.mubr.f32.mxu0 %v13883_v40  ;;  %v13920_v51 = vld [vmem:[#allocation28_spill] sm:$0xff] }
  0xa4   :  { %9305 = vmatpush1.bf16.msra.mxu1 %v9304_v6  ;;  %9407 = vmatprep.subr.bf16.mxu0 %v9406_v50  ;;  %v13918_v6 = vld [vmem:[#allocation29_spill] sm:$0xff]  ;;  %v13921_v50 = vld [vmem:[#allocation32_spill] sm:$0xff] }
  0xa5   :  { %9307 = vmatprep.subr.bf16.mxu1 %v9306_v36  ;;  %v13919_v36 = vld [vmem:[#allocation24_spill] sm:$0xff] }
  0xa7   :  { %1159 = vmatmul.mubr.f32.vlgmr.msra.gmra.mrb[2].mxu1 %v10872_v12  ;;  %9409 = vmatpush1.bf16.msra.mxu0 %v9408_v5  ;;  %v13924_v5 = vand.u32 4294901760, %v10938_v56  ;;  %v13933_v56 = vand.u32 4294901760, %v10969_v1  ;;  %v13939_v1 = vand.u32 4294901760, %v10981_v25  ;;  %v13943_v25 = vand.u32 4294901760, %v13904_v32 }
  0xa8   :  { %9309 = vmatpush1.bf16.msra.mxu1 %v9308_v20  ;;  %1261 = vmatprep.mubr.f32.mxu1 %v13883_v40  ;;  %v13922_v20 = vld [vmem:[#allocation34_spill] sm:$0xff]  ;;  %v13949_v32 = vand.u32 4294901760, %v11018_v57 }
  0xa9   :  { %9311 = vmatprep.subr.bf16.mxu1 %v9310_v55  ;;  %9411 = vmatprep.subr.bf16.mxu0 %v9410_v49  ;;  %v13923_v55 = vand.u32 4294901760, %v10936_v33  ;;  %v13932_v33 = vand.u32 4294901760, %v13902_v9  ;;  %v13938_v9 = vand.u32 4294901760, %v10959_v8  ;;  %v152_v57 = vld [vmem:[#allocation5 + $0x290] sm:$0xff] }
  0xab   :  { %9413 = vmatpush1.bf16.msra.mxu0 %v9412_v38  ;;  %v9434_v49 = vpack.c.bf16 %v13924_v5, %v13923_v55  ;;  %v13927_v38 = vld [vmem:[#allocation35_spill] sm:$0xff]  ;;  %v9438_v55 = vpack.c.bf16 %v13933_v56, %v13932_v33  ;;  %v13934_v5 = vand.u32 4294901760, %v10942_v21  ;;  %v79_v21 = vld [vmem:[#allocation5 + $0x48] sm:$0xff]  ;;  %v13942_v33 = vand.u32 4294901760, %v11004_v11 }
  0xac   :  { %9313 = vmatpush1.bf16.msra.mxu1 %v9312_v10  ;;  %9415 = vmatprep.subr.bf16.mxu0 %v9414_v26  ;;  %v13925_v10 = vld [vmem:[#allocation31_spill] sm:$0xff]  ;;  %v13928_v26 = vand.u32 4294901760, %v10930_v31  ;;  %v13935_v31 = vand.u32 4294901760, %v10945_v30  ;;  %v13941_v30 = vand.u32 4294901760, %v11001_v37  ;;  %v2862_v37 = vand.u32 4294901760, %v79_v21 }
  0xad   :  { %9315 = vmatprep.subr.bf16.mxu1 %v9314_v46  ;;  %v13926_v46 = vld [vmem:[#allocation33_spill] sm:$0xff]  ;;  %v13945_v11 = vand.u32 4294901760, %v10991_v7  ;;  %v9350_v7 = vpack.c.bf16 %v1099_v24, %v1087_v63  ;;  %v154_v24 = vld [vmem:[#allocation5 + $0x2a0] sm:$0xff] }
  0xae   :  { %v9340_v47 = vpack.c.bf16 %v13935_v31, %v13934_v5  ;;  %v9442_v56 = vpack.c.bf16 %v13942_v33, %v13941_v30  ;;  %v13946_v31 = vand.u32 4294901760, %v10997_v23  ;;  %v78_v30 = vld [vmem:[#allocation5 + $0x40] sm:$0xff]  ;;  %v103_v33 = vld [vmem:[#allocation5 + $0x108] sm:$0xff]  ;;  %v13951_v23 = vand.u32 4294901760, %v11034_v54 }
  0xaf   :  { %9417 = vmatpush1.bf16.msra.mxu0 %v9416_v61  ;;  %v13930_v61 = vand.u32 4294901760, %v10947_v0  ;;  %v102_v0 = vld [vmem:[#allocation5 + $0x100] sm:$0xff] }
  0xb0   :  { %9317 = vmatpush1.bf16.msra.mxu1 %v9316_v19  ;;  %9419 = vmatprep.subr.bf16.mxu0 %v10934_v14  ;;  %v13929_v19 = vand.u32 4294901760, %v10932_v4  ;;  %v13936_v4 = vld [vmem:[#allocation16_spill] sm:$0xff]  ;;  %v2219_v8 = vand.u32 4294901760, %v102_v0 }
  0xb1   :  { %9319 = vmatprep.subr.bf16.mxu1 %v9318_v2 }
  0xb2   :  { %1911 = vmatmul.mubr.f32.vlgmr.msra.gmra.mrb[2].mxu0 %v10881_v27  ;;  %v9338_v2 = vpack.c.bf16 %v13929_v19, %v13928_v26  ;;  %v77_v26 = vld [vmem:[#allocation5 + $0x38] sm:$0xff]  ;;  %v13940_v19 = vand.u32 4294901760, %v10987_v62  ;;  %v13944_v62 = vand.u32 4294901760, %v13906_v18  ;;  %v13950_v18 = vand.u32 4294901760, %v11024_v15 }
  0xb3   :  { %9421 = vmatpush1.bf16.msra.mxu0 %v13913_v34  ;;  %1997 = vmatprep.mubr.f32.mxu0 %v13883_v40  ;;  %v13953_v15 = vand.u32 4294901760, %v11040_v45  ;;  %v2864_v45 = vand.u32 4294901760, %v78_v30 }
  0xb4   :  { %9321 = vmatpush1.bf16.msra.mxu1 %v9320_v17  ;;  %9423 = vmatprep.subr.bf16.mxu0 %v13914_v28  ;;  %v13931_v17 = vand.u32 4294901760, %v10952_v3  ;;  %v13937_v3 = vand.u32 4294901760, %v10956_v13  ;;  %v2215_v13 = vand.u32 4294901760, %v77_v26  ;;  %v9344_v5 = vpack.c.bf16 %v13944_v62, %v13943_v25  ;;  %v127_v25 = vld [vmem:[#allocation5 + $0x1c8] sm:$0xff] }
  0xb5   :  { %9323 = vmatprep.subr.bf16.mxu1 %v13912_v48  ;;  %v13954_v62 = vand.u32 4294901760, %v11054_v22  ;;  %v126_v22 = vld [vmem:[#allocation5 + $0x1c0] sm:$0xff] }
  0xb6   :  { %v9436_v53 = vpack.c.bf16 %v13931_v17, %v13930_v61  ;;  %v9440_v61 = vpack.c.bf16 %v13940_v19, %v13939_v1  ;;  %v104_v17 = vld [vmem:[#allocation5 + $0x110] sm:$0xff]  ;;  %v9444_v19 = vpack.c.bf16 %v13950_v18, %v13949_v32  ;;  %v11345_v63 = vpack.c.bf16 %v2219_v8, %v2215_v13  ;;  %v151_v32 = vld [vmem:[#allocation5 + $0x288] sm:$0xff] }
  0xb7   :  { %1264 = vmatmul.mubr.f32.vlgmr.msra.gmra.mrb[2].mxu1 %v10881_v27  ;;  %9425 = vmatpush1.bf16.msra.mxu0 %v13917_v35  ;;  %v11347_v54 = vsub.f32 %v77_v26, %v2215_v13  ;;  %v2223_v18 = vand.u32 4294901760, %v127_v25  ;;  %v2227_v26 = vand.u32 4294901760, %v152_v57  ;;  %v128_v13 = vld [vmem:[#allocation5 + $0x1d0] sm:$0xff] }
  0xb8   :  { %9325 = vmatpush1.bf16.msra.mxu1 %v13915_v16  ;;  %1350 = vmatprep.mubr.f32.mxu1 %v13883_v40  ;;  %13957 = vst [vmem:[#allocation23_spill] sm:$0xff] %v11345_v63 }
  0xb9   :  { %9327 = vmatprep.subr.bf16.mxu1 %v13916_v59  ;;  %9427 = vmatprep.subr.bf16.mxu0 %v13918_v6 }
  0xbb   :  { %9429 = vmatpush1.bf16.msra.mxu0 %v13921_v50 }
  0xbc   :  { %9329 = vmatpush1.bf16.msra.mxu1 %v13919_v36  ;;  %9431 = vmatprep.subr.bf16.mxu0 %v13922_v20 }
  0xbd   :  { %9331 = vmatprep.subr.bf16.mxu1 %v13920_v51 }
  0xbf   :  { %9433 = vmatpush1.bf16.msra.mxu0 %v13927_v38 }
  0xc0   :  { %9333 = vmatpush1.bf16.msra.mxu1 %v13925_v10  ;;  %9435 = vmatprep.subr.bf16.mxu0 %v9434_v49  ;;  %v9342_v49 = vpack.c.bf16 %v13938_v9, %v13937_v3  ;;  %v9346_v3 = vpack.c.bf16 %v13946_v31, %v13945_v11  ;;  %v13947_v9 = vand.u32 4294901760, %v13910_v52  ;;  %v13952_v52 = vand.u32 4294901760, %v11036_v39  ;;  %v129_v39 = vld [vmem:[#allocation5 + $0x1d8] sm:$0xff] }
  0xc1   :  { %9335 = vmatprep.subr.bf16.mxu1 %v13926_v46  ;;  %v9352_v11 = vpack.c.bf16 %v13954_v62, %v13953_v15  ;;  %v11349_v31 = vsub.f32 %v102_v0, %v2219_v8  ;;  %v2870_v8 = vand.u32 4294901760, %v129_v39  ;;  %v11363_v62 = vsub.f32 %v78_v30, %v2864_v45 }
  0xc2   :  { %2001 = vmatmul.mubr.f32.vlgmr.msra.gmra.mrb[2].mxu0 %v13936_v4  ;;  %v11373_v30 = vsub.f32 %v152_v57, %v2227_v26 }
  0xc3   :  { %9437 = vmatpush1.bf16.msra.mxu0 %v9436_v53  ;;  %2119 = vmatprep.mubr.f32.mxu0 %v13883_v40  ;;  %v76_v53 = vld [vmem:[#allocation5 + $0x30] sm:$0xff] }
  0xc4   :  { %9337 = vmatpush1.bf16.msra.mxu1 %v11038_v44  ;;  %9439 = vmatprep.subr.bf16.mxu0 %v9438_v55  ;;  %v2866_v55 = vand.u32 4294901760, %v104_v17 }
  0xc5   :  { %9339 = vmatprep.subr.bf16.mxu1 %v9338_v2  ;;  %v101_v2 = vld [vmem:[#allocation5 + $0xf8] sm:$0xff] }
  0xc6   :  { %v11355_v60 = vsub.f32 %v104_v17, %v2866_v55  ;;  %v202_v17 = vld [vmem:[#allocation5 + $0x420] sm:$0xff] }
  0xc7   :  { %1354 = vmatmul.mubr.f32.vlgmr.msra.gmra.mrb[2].mxu1 %v13936_v4  ;;  %9441 = vmatpush1.bf16.msra.mxu0 %v9440_v61  ;;  %v2221_v61 = vand.u32 4294901760, %v101_v2  ;;  %v201_v4 = vld [vmem:[#allocation5 + $0x418] sm:$0xff] }
  0xc8   :  { %9341 = vmatpush1.bf16.msra.mxu1 %v9340_v47  ;;  %1472 = vmatprep.mubr.f32.mxu1 %v13883_v40  ;;  %v13948_v47 = vand.u32 4294901760, %v11014_v41  ;;  %v2217_v41 = vand.u32 4294901760, %v76_v53 }
  0xc9   :  { %9343 = vmatprep.subr.bf16.mxu1 %v9342_v49  ;;  %9443 = vmatprep.subr.bf16.mxu0 %v9442_v56  ;;  %v9446_v49 = vpack.c.bf16 %v13952_v52, %v13951_v23  ;;  %v13955_v56 = vand.u32 4294901760, %v11056_v43  ;;  %v11353_v43 = vsub.f32 %v79_v21, %v2862_v37  ;;  %v153_v23 = vld [vmem:[#allocation5 + $0x298] sm:$0xff]  ;;  %v2874_v52 = vand.u32 4294901760, %v154_v24 }
  0xca   :  { %v9348_v1 = vpack.c.bf16 %v13948_v47, %v13947_v9  ;;  %v11351_v9 = vpack.c.bf16 %v2866_v55, %v2862_v37  ;;  %v2868_v47 = vand.u32 4294901760, %v103_v33  ;;  %v11359_v0 = vsub.f32 %v76_v53, %v2217_v41  ;;  %v177_v37 = vld [vmem:[#allocation5 + $0x358] sm:$0xff]  ;;  %v204_v53 = vld [vmem:[#allocation5 + $0x430] sm:$0xff] }
  0xcb   :  { %v9448_v58 = vpack.c.bf16 %v13956_v42, %v13955_v56  ;;  %9445 = vmatpush1.bf16.msra.mxu0 %v9444_v19  ;;  %v11361_v15 = vsub.f32 %v101_v2, %v2221_v61  ;;  %v2229_v21 = vand.u32 4294901760, %v151_v32  ;;  %v2876_v56 = vand.u32 4294901760, %v153_v23  ;;  %v179_v42 = vld [vmem:[#allocation5 + $0x368] sm:$0xff] }
  0xcc   :  { %9345 = vmatpush1.bf16.msra.mxu1 %v9344_v5  ;;  %13958 = vst [vmem:[#allocation25_spill] sm:$0xff] %v11351_v9  ;;  %9447 = vmatprep.subr.bf16.mxu0 %v9446_v49  ;;  %v11357_v5 = vpack.c.bf16 %v2221_v61, %v2217_v41  ;;  %v11365_v55 = vpack.c.bf16 %v2868_v47, %v2864_v45  ;;  %v2872_v49 = vand.u32 4294901760, %v128_v13  ;;  %v176_v61 = vld [vmem:[#allocation5 + $0x350] sm:$0xff]  ;;  %v2882_v29 = vand.u32 4294901760, %v204_v53 }
  0xcd   :  { %9347 = vmatprep.subr.bf16.mxu1 %v9346_v3  ;;  %v2225_v3 = vand.u32 4294901760, %v126_v22  ;;  %v11367_v19 = vsub.f32 %v103_v33, %v2868_v47  ;;  %v11369_v41 = vpack.c.bf16 %v2227_v26, %v2223_v18  ;;  %v11371_v2 = vsub.f32 %v127_v25, %v2223_v18  ;;  %v178_v25 = vld [vmem:[#allocation5 + $0x360] sm:$0xff]  ;;  %v203_v18 = vld [vmem:[#allocation5 + $0x428] sm:$0xff] }
  0xce   :  { %13959 = vst [vmem:[#allocation26_spill] sm:$0xff] %v11357_v5  ;;  %13960 = vst [vmem:[#allocation30_spill] sm:$0xff] %v11365_v55  ;;  %v11378_v45 = vsub.f32 %v129_v39, %v2870_v8  ;;  %v2231_v33 = vand.u32 4294901760, %v177_v37  ;;  %v2235_v47 = vand.u32 4294901760, %v202_v17  ;;  %v11380_v27 = vsub.f32 %v154_v24, %v2874_v52 }
  0xcf   :  { %9449 = vmatpush1.bf16.msra.mxu0 %v9448_v58  ;;  %13961 = vst [vmem:[#allocation18_spill] sm:$0xff] %v11369_v41  ;;  %v2878_v58 = vand.u32 4294901760, %v179_v42  ;;  %v11385_v57 = vsub.f32 %v126_v22, %v2225_v3  ;;  %v11389_v39 = vpack.c.bf16 %v2876_v56, %v2872_v49  ;;  %v2233_v26 = vand.u32 4294901760, %v176_v61  ;;  %v252_v41 = vld [vmem:[#allocation5 + $0x5b0] sm:$0xff]  ;;  %v229_v22 = vld [vmem:[#allocation5 + $0x4f8] sm:$0xff] }
  0xd0   :  { %9349 = vmatpush1.bf16.msra.mxu1 %v9348_v1  ;;  %9451 = vmatprep.subr.bf16.mxu0 %v10934_v14  ;;  %v11376_v1 = vpack.c.bf16 %v2874_v52, %v2870_v8  ;;  %v11387_v14 = vsub.f32 %v151_v32, %v2229_v21  ;;  %v227_v8 = vld [vmem:[#allocation5 + $0x4e8] sm:$0xff]  ;;  %v11393_v24 = vsub.f32 %v128_v13, %v2872_v49 }
  0xd1   :  { %9351 = vmatprep.subr.bf16.mxu1 %v9350_v7  ;;  %v11382_v7 = vpack.c.bf16 %v2229_v21, %v2225_v3  ;;  %13964 = vst [vmem:[#allocation19_spill] sm:$0xff] %v11385_v57  ;;  %13966 = vst [vmem:[#allocation27_spill] sm:$0xff] %v11389_v39  ;;  %v11395_v52 = vsub.f32 %v153_v23, %v2876_v56  ;;  %v254_v3 = vld [vmem:[#allocation5 + $0x5c0] sm:$0xff]  ;;  %v11401_v32 = vpack.c.bf16 %v2235_v47, %v2231_v33 }
  0xd2   :  { %13962 = vst [vmem:[#allocation20_spill] sm:$0xff] %v11376_v1  ;;  %2121 = vmatmul.mubr.f32.vlgmr.msra.gmra.mrb[2].mxu0 %v10872_v12  ;;  %13965 = vst [vmem:[#allocation21_spill] sm:$0xff] %v11387_v14  ;;  %v11403_v21 = vsub.f32 %v202_v17, %v2235_v47  ;;  %v2884_v39 = vand.u32 4294901760, %v203_v18  ;;  %v11408_v13 = vsub.f32 %v179_v42, %v2878_v58  ;;  %v2239_v23 = vand.u32 4294901760, %v227_v8 }
  0xd3   :  { %13963 = vst [vmem:[#allocation22_spill] sm:$0xff] %v11382_v7  ;;  %9453 = vmatpush1.bf16.msra.mxu0 %v13913_v34  ;;  %v2237_v7 = vand.u32 4294901760, %v201_v4  ;;  %2207 = vmatprep.mubr.f32.mxu0 %v13883_v40  ;;  %13967 = vst [vmem:[#allocation29_spill] sm:$0xff] %v11401_v32  ;;  %v11406_v34 = vpack.c.bf16 %v2882_v29, %v2878_v58  ;;  %v11414_v49 = vsub.f32 %v176_v61, %v2233_v26  ;;  %v228_v61 = vld [vmem:[#allocation5 + $0x4f0] sm:$0xff] }
  0xd4   :  { %9353 = vmatpush1.bf16.msra.mxu1 %v9352_v11  ;;  %v11397_v11 = vsub.f32 %v177_v37, %v2231_v33  ;;  %9455 = vmatprep.subr.bf16.mxu0 %v13914_v28  ;;  %v2243_v37 = vand.u32 4294901760, %v252_v41  ;;  %v11412_v28 = vsub.f32 %v204_v53, %v2882_v29  ;;  %v2886_v17 = vand.u32 4294901760, %v229_v22  ;;  %v226_v33 = vld [vmem:[#allocation5 + $0x4e0] sm:$0xff] }
  0xd5   :  { %9355 = vmatprep.subr.bf16.mxu1 %v13912_v48  ;;  %v2880_v48 = vand.u32 4294901760, %v178_v25  ;;  %13968 = vst [vmem:[#allocation24_spill] sm:$0xff] %v11406_v34  ;;  %13969 = vst [vmem:[#allocation28_spill] sm:$0xff] %v11414_v49  ;;  %v2890_v56 = vand.u32 4294901760, %v254_v3  ;;  %v11418_v47 = vpack.c.bf16 %v2237_v7, %v2233_v26  ;;  %v11420_v42 = vsub.f32 %v201_v4, %v2237_v7  ;;  %v253_v49 = vld [vmem:[#allocation5 + $0x5b8] sm:$0xff] }
  0xd6   :  { %v11427_v53 = vsub.f32 %v203_v18, %v2884_v39  ;;  %v13614_v32 = vand.u32 4294901760, %v11347_v54  ;;  %v11433_v26 = vsub.f32 %v227_v8, %v2239_v23  ;;  %v11435_v4 = vsub.f32 %v252_v41, %v2243_v37 }
  0xd7   :  { %1474 = vmatmul.mubr.f32.vlgmr.msra.gmra.mrb[2].mxu1 %v10872_v12  ;;  %9457 = vmatpush1.bf16.msra.mxu0 %v13917_v35  ;;  %13970 = vst [vmem:[#allocation32_spill] sm:$0xff] %v11418_v47  ;;  %v11422_v58 = vsub.f32 %v178_v25, %v2880_v48  ;;  %v11425_v29 = vpack.c.bf16 %v2884_v39, %v2880_v48  ;;  %v2241_v7 = vand.u32 4294901760, %v226_v33  ;;  %v2888_v48 = vand.u32 4294901760, %v228_v61 }
  0xd8   :  { %9357 = vmatpush1.bf16.msra.mxu1 %v13915_v16  ;;  %1560 = vmatprep.mubr.f32.mxu1 %v13883_v40  ;;  %v251_v16 = vld [vmem:[#allocation5 + $0x5a8] sm:$0xff]  ;;  %v11431_v35 = vpack.c.bf16 %v2243_v37, %v2239_v23  ;;  %v11440_v25 = vsub.f32 %v229_v22, %v2886_v17  ;;  %v11442_v18 = vsub.f32 %v254_v3, %v2890_v56  ;;  %v13619_v8 = vand.u32 4294901760, %v11353_v43 }
  0xd9   :  { %9359 = vmatprep.subr.bf16.mxu1 %v13916_v59  ;;  %9459 = vmatprep.subr.bf16.mxu0 %v13918_v6  ;;  %13971 = vst [vmem:[#allocation34_spill] sm:$0xff] %v11425_v29  ;;  %v11438_v6 = vpack.c.bf16 %v2890_v56, %v2886_v17  ;;  %v2245_v39 = vand.u32 4294901760, %v251_v16  ;;  %v2892_v59 = vand.u32 4294901760, %v253_v49  ;;  %v13974_v22 = vand.u32 4294901760, %v11349_v31 }
  0xda   :  { %13972 = vst [vmem:[#allocation31_spill] sm:$0xff] %v11431_v35  ;;  %v11457_v23 = vsub.f32 %v226_v33, %v2241_v7  ;;  %v13617_v37 = vand.u32 4294901760, %v11363_v62  ;;  %v13618_v17 = vand.u32 4294901760, %v11367_v19  ;;  %v11467_v41 = vsub.f32 %v228_v61, %v2888_v48 }
  0xdb   :  { %13973 = vst [vmem:[#allocation33_spill] sm:$0xff] %v11438_v6  ;;  %9461 = vmatpush1.bf16.msra.mxu0 %v13921_v50  ;;  %v2322_v3 = vsub.f32 %v11349_v31, %v13974_v22  ;;  %v13616_v50 = vand.u32 4294901760, %v11361_v15  ;;  %v11463_v56 = vpack.c.bf16 %v2245_v39, %v2241_v7  ;;  %v13620_v22 = vand.u32 4294901760, %v11373_v30 }
  0xdc   :  { %9361 = vmatpush1.bf16.msra.mxu1 %v13919_v36  ;;  %9463 = vmatprep.subr.bf16.mxu0 %v13922_v20  ;;  %v2310_v36 = vsub.f32 %v11347_v54, %v13614_v32  ;;  %v11465_v32 = vsub.f32 %v251_v16, %v2245_v39  ;;  %v11472_v33 = vpack.c.bf16 %v2892_v59, %v2888_v48 }
  0xdd   :  { %9363 = vmatprep.subr.bf16.mxu1 %v13920_v51  ;;  %v13615_v51 = vand.u32 4294901760, %v11359_v0  ;;  %13975 = vst [vmem:[#allocation35_spill] sm:$0xff] %v11463_v56  ;;  %v2957_v20 = vsub.f32 %v11353_v43, %v13619_v8  ;;  %v2323_v61 = vand.u32 4294901760, %v2322_v3  ;;  %v2963_v39 = vsub.f32 %v11363_v62, %v13617_v37 }
  0xde   :  { %13976 = vst [vmem:[#allocation36_spill] sm:$0xff] %v11472_v33  ;;  %v2311_v16 = vand.u32 4294901760, %v2310_v36  ;;  %v2975_v48 = vsub.f32 %v11367_v19, %v13618_v17  ;;  %v13979_v8 = vand.u32 4294901760, %v11378_v45 }
  0xdf   :  { %9465 = vmatpush1.bf16.msra.mxu0 %v13927_v38  ;;  %v2328_v38 = vsub.f32 %v11361_v15, %v13616_v50  ;;  %v2346_v50 = vsub.f32 %v11373_v30, %v13620_v22  ;;  %v2964_v3 = vand.u32 4294901760, %v2963_v39 }
  0xe0   :  { %9365 = vmatpush1.bf16.msra.mxu1 %v13925_v10  ;;  %v13977_v10 = vand.u32 4294901760, %v11355_v60  ;;  %9563 = vmatprep.subr.bf16.mxu0 %v11351_v9  ;;  %v13641_v9 = vand.u32 4294901760, %v11403_v21 }
  0xe1   :  { %9367 = vmatprep.subr.bf16.mxu1 %v13926_v46  ;;  %v2316_v46 = vsub.f32 %v11359_v0, %v13615_v51  ;;  %v11499_v51 = vsub.f32 %v253_v49, %v2892_v59  ;;  %v11512_v59 = vpack.c.bf16 %v2323_v61, %v2311_v16  ;;  %v2329_v17 = vand.u32 4294901760, %v2328_v38 }
  0xe2   :  { %v2969_v7 = vsub.f32 %v11355_v60, %v13977_v10  ;;  %v13978_v10 = vand.u32 4294901760, %v11371_v2  ;;  %2209 = vmatmul.mubr.f32.vlgmr.msra.gmra.mrb[2].mxu0 %v10872_v12  ;;  %v2347_v16 = vand.u32 4294901760, %v2346_v50  ;;  %v13980_v61 = vand.u32 4294901760, %v11380_v27 }
  0xe3   :  { %9565 = vmatpush1.bf16.msra.mxu0 %v11365_v55  ;;  %2942 = vmatprep.mubr.f32.mxu0 %v13883_v40  ;;  %v2317_v37 = vand.u32 4294901760, %v2316_v46  ;;  %v2976_v55 = vand.u32 4294901760, %v2975_v48  ;;  %v13981_v46 = vand.u32 4294901760, %v11385_v57  ;;  %v13982_v48 = vld [vmem:[#allocation18_spill] sm:$0xff]  ;;  %v13985_v50 = vand.u32 4294901760, %v11393_v24 }
  0xe4   :  { %v2334_v36 = vsub.f32 %v11371_v2, %v13978_v10  ;;  %9369 = vmatpush1.bf16.msra.mxu1 %v11038_v44  ;;  %v2958_v10 = vand.u32 4294901760, %v2957_v20  ;;  %9567 = vmatprep.subr.bf16.mxu0 %v11376_v1  ;;  %v2970_v22 = vand.u32 4294901760, %v2969_v7  ;;  %v2981_v44 = vsub.f32 %v11378_v45, %v13979_v8 }
  0xe5   :  { %9467 = vmatprep.subr.bf16.mxu1 %v11345_v63  ;;  %v2993_v7 = vsub.f32 %v11380_v27, %v13980_v61  ;;  %v11527_v38 = vsub.f32 %v11385_v57, %v13981_v46  ;;  %v13984_v8 = vand.u32 4294901760, %v11387_v14  ;;  %v2987_v61 = vsub.f32 %v11393_v24, %v13985_v50  ;;  %v13987_v50 = vld [vmem:[#allocation22_spill] sm:$0xff] }
  0xe6   :  { %v2335_v20 = vand.u32 4294901760, %v2334_v36  ;;  %v13983_v36 = vld [vmem:[#allocation27_spill] sm:$0xff]  ;;  %v9578_v39 = vpack.c.bf16 %v2970_v22, %v2958_v10  ;;  %v11544_v1 = vpack.c.bf16 %v2329_v17, %v2317_v37  ;;  %v9580_v63 = vpack.c.bf16 %v2976_v55, %v2964_v3  ;;  %v13989_v22 = vld [vmem:[#allocation29_spill] sm:$0xff] }
  0xe7   :  { %1562 = vmatmul.mubr.f32.vlgmr.msra.gmra.mrb[2].mxu1 %v10872_v12  ;;  %9569 = vmatpush1.bf16.msra.mxu0 %v13983_v36  ;;  %v11535_v49 = vsub.f32 %v11387_v14, %v13984_v8  ;;  %v13637_v36 = vand.u32 4294901760, %v11408_v13  ;;  %v2982_v8 = vand.u32 4294901760, %v2981_v44  ;;  %v13642_v14 = vand.u32 4294901760, %v11422_v58 }
  0xe8   :  { %9469 = vmatpush1.bf16.msra.mxu1 %v11357_v5  ;;  %2295 = vmatprep.mubr.f32.mxu1 %v13883_v40  ;;  %v13986_v5 = vand.u32 4294901760, %v11395_v52  ;;  %v11551_v57 = vpack.c.bf16 %v2347_v16, %v2335_v20  ;;  %v2341_v55 = vand.u32 4294901760, %v11527_v38  ;;  %v2988_v10 = vand.u32 4294901760, %v2987_v61  ;;  %v13990_v38 = vld [vmem:[#allocation28_spill] sm:$0xff] }
  0xe9   :  { %9471 = vmatprep.subr.bf16.mxu1 %v13982_v48  ;;  %9571 = vmatprep.subr.bf16.mxu0 %v11406_v34  ;;  %v13638_v48 = vand.u32 4294901760, %v11412_v28  ;;  %v13988_v34 = vand.u32 4294901760, %v11397_v11  ;;  %v2353_v3 = vand.u32 4294901760, %v11535_v49  ;;  %v3005_v20 = vsub.f32 %v11408_v13, %v13637_v36 }
  0xea   :  { %v2999_v46 = vsub.f32 %v11395_v52, %v13986_v5  ;;  %v2994_v5 = vand.u32 4294901760, %v2993_v7  ;;  %v2370_v49 = vsub.f32 %v11403_v21, %v13641_v9  ;;  %v3011_v36 = vsub.f32 %v11422_v58, %v13642_v14 }
  0xeb   :  { %v2358_v37 = vsub.f32 %v11397_v11, %v13988_v34  ;;  %9573 = vmatpush1.bf16.msra.mxu0 %v11425_v29  ;;  %v3017_v34 = vsub.f32 %v11412_v28, %v13638_v48  ;;  %v13991_v16 = vand.u32 4294901760, %v11427_v53  ;;  %v13995_v61 = vand.u32 4294901760, %v11420_v42 }
  0xec   :  { %9473 = vmatpush1.bf16.msra.mxu1 %v13987_v50  ;;  %v3000_v44 = vand.u32 4294901760, %v2999_v46  ;;  %9575 = vmatprep.subr.bf16.mxu0 %v11438_v6  ;;  %v9582_v17 = vpack.c.bf16 %v2994_v5, %v2982_v8  ;;  %v3006_v8 = vand.u32 4294901760, %v3005_v20  ;;  %v13993_v6 = vand.u32 4294901760, %v11442_v18  ;;  %v13996_v20 = vld [vmem:[#allocation17_spill] sm:$0xff] }
  0xed   :  { %9475 = vmatprep.subr.bf16.mxu1 %v13989_v22  ;;  %v2359_v48 = vand.u32 4294901760, %v2358_v37  ;;  %v3023_v7 = vsub.f32 %v11427_v53, %v13991_v16  ;;  %v3018_v5 = vand.u32 4294901760, %v3017_v34  ;;  %v13992_v37 = vand.u32 4294901760, %v11440_v25 }
  0xee   :  { %v9584_v9 = vpack.c.bf16 %v3000_v44, %v2988_v10  ;;  %v13994_v10 = vand.u32 4294901760, %v13990_v38  ;;  %v2376_v14 = vsub.f32 %v11420_v42, %v13995_v61  ;;  %v13999_v61 = vand.u32 4294901760, %v11467_v41 }
  0xef   :  { %9577 = vmatpush1.bf16.msra.mxu0 %v11472_v33  ;;  %v3029_v16 = vsub.f32 %v11440_v25, %v13992_v37  ;;  %v3024_v34 = vand.u32 4294901760, %v3023_v7  ;;  %v13997_v37 = vand.u32 4294901760, %v11433_v26  ;;  %v14000_v7 = vand.u32 4294901760, %v11499_v51 }
  0xf0   :  { %9477 = vmatpush1.bf16.msra.mxu1 %v11418_v47  ;;  %9579 = vmatprep.subr.bf16.mxu0 %v9578_v39  ;;  %v2371_v47 = vand.u32 4294901760, %v2370_v49  ;;  %v2364_v44 = vsub.f32 %v13990_v38, %v13994_v10  ;;  %v3012_v39 = vand.u32 4294901760, %v3011_v36  ;;  %v13998_v10 = vand.u32 4294901760, %v11435_v4 }
  0xf1   :  { %9479 = vmatprep.subr.bf16.mxu1 %v11431_v35  ;;  %v3041_v35 = vsub.f32 %v11442_v18, %v13993_v6  ;;  %v2382_v46 = vsub.f32 %v11433_v26, %v13997_v37  ;;  %v3047_v33 = vsub.f32 %v11499_v51, %v14000_v7  ;;  %v9586_v37 = vpack.c.bf16 %v3018_v5, %v3006_v8 }
  0xf2   :  { %2948 = vmatmul.mubr.f32.vlgmr.msra.gmra.mrb[4].mxu0 %v13996_v20  ;;  %v2394_v36 = vsub.f32 %v11435_v4, %v13998_v10  ;;  %v3030_v6 = vand.u32 4294901760, %v3029_v16  ;;  %v2365_v49 = vand.u32 4294901760, %v2364_v44  ;;  %v2377_v10 = vand.u32 4294901760, %v2376_v14 }
  0xf3   :  { %9581 = vmatpush1.bf16.msra.mxu0 %v9580_v63  ;;  %v3042_v29 = vand.u32 4294901760, %v3041_v35  ;;  %3098 = vmatprep.mubr.f32.mxu0 %v13883_v40  ;;  %v9488_v63 = vpack.c.bf16 %v2353_v3, %v2341_v55  ;;  %v9588_v22 = vpack.c.bf16 %v3024_v34, %v3012_v39  ;;  %v2383_v35 = vand.u32 4294901760, %v2382_v46  ;;  %v14003_v34 = vld [vmem:[#allocation19_spill] sm:$0xff] }
  0xf4   :  { %9481 = vmatpush1.bf16.msra.mxu1 %v11463_v56  ;;  %v3035_v56 = vsub.f32 %v11467_v41, %v13999_v61  ;;  %9583 = vmatprep.subr.bf16.mxu0 %v9582_v17  ;;  %v14001_v61 = vand.u32 4294901760, %v11457_v23  ;;  %v14002_v17 = vand.u32 4294901760, %v11465_v32  ;;  %v3048_v55 = vand.u32 4294901760, %v3047_v33 }
  0xf5   :  { %9483 = vmatprep.subr.bf16.mxu1 %v11512_v59  ;;  %v9490_v59 = vpack.c.bf16 %v2371_v47, %v2359_v48  ;;  %v2395_v47 = vand.u32 4294901760, %v2394_v36  ;;  %v9492_v14 = vpack.c.bf16 %v2377_v10, %v2365_v49  ;;  %v9594_v39 = vpack.c.bf16 %v11355_v60, %v11353_v43 }
  0xf6   :  { %v2388_v50 = vsub.f32 %v11457_v23, %v14001_v61  ;;  %v2400_v8 = vsub.f32 %v11465_v32, %v14002_v17  ;;  %v3036_v48 = vand.u32 4294901760, %v3035_v56  ;;  %v9598_v56 = vpack.c.bf16 %v11380_v27, %v11378_v45  ;;  %v14005_v17 = vld [vmem:[#allocation25_spill] sm:$0xff] }
  0xf7   :  { %2301 = vmatmul.mubr.f32.vlgmr.msra.gmra.mrb[4].mxu1 %v13996_v20  ;;  %9585 = vmatpush1.bf16.msra.mxu0 %v9584_v9  ;;  %v9494_v16 = vpack.c.bf16 %v2395_v47, %v2383_v35  ;;  %v9500_v33 = vpack.c.bf16 %v11361_v15, %v11359_v0  ;;  %v9602_v46 = vpack.c.bf16 %v11412_v28, %v11408_v13  ;;  %v14007_v35 = vld [vmem:[#allocation23_spill] sm:$0xff]  ;;  %v14008_v47 = vld [vmem:[#allocation30_spill] sm:$0xff]  ;;  %v207_v20 = vld [vmem:[#allocation5 + $0x448] sm:$0xff] }
  0xf8   :  { %9485 = vmatpush1.bf16.msra.mxu1 %v11544_v1  ;;  %2451 = vmatprep.mubr.f32.mxu1 %v13883_v40  ;;  %v9590_v1 = vpack.c.bf16 %v3042_v29, %v3030_v6  ;;  %v2389_v3 = vand.u32 4294901760, %v2388_v50  ;;  %v2401_v5 = vand.u32 4294901760, %v2400_v8  ;;  %v9592_v44 = vpack.c.bf16 %v3048_v55, %v3036_v48  ;;  %v14004_v6 = vld [vmem:[#allocation21_spill] sm:$0xff]  ;;  %v14006_v8 = vld [vmem:[#allocation15_spill] sm:$0xff]  ;;  %v14009_v48 = vld [vmem:[#allocation20_spill] sm:$0xff] }
  0xf9   :  { %9487 = vmatprep.subr.bf16.mxu1 %v11551_v57  ;;  %9587 = vmatprep.subr.bf16.mxu0 %v9586_v37  ;;  %v9498_v57 = vpack.c.bf16 %v11349_v31, %v11347_v54  ;;  %v9596_v29 = vpack.c.bf16 %v11367_v19, %v11363_v62  ;;  %v9502_v50 = vpack.c.bf16 %v11373_v30, %v11371_v2  ;;  %v14010_v55 = vld [vmem:[#allocation26_spill] sm:$0xff] }
  0xfa   :  { %v9496_v9 = vpack.c.bf16 %v2401_v5, %v2389_v3  ;;  %v9504_v49 = vpack.c.bf16 %v14004_v6, %v14003_v34  ;;  %v9506_v36 = vpack.c.bf16 %v11403_v21, %v11397_v11  ;;  %v9604_v7 = vpack.c.bf16 %v11427_v53, %v11422_v58  ;;  %v14013_v3 = vld [vmem:[#allocation24_spill] sm:$0xff]  ;;  %v14014_v5 = vld [vmem:[#allocation22_spill] sm:$0xff] }
  0xfb   :  { %9589 = vmatpush1.bf16.msra.mxu0 %v9588_v22  ;;  %v9600_v22 = vpack.c.bf16 %v11395_v52, %v11393_v24  ;;  %v9606_v37 = vpack.c.bf16 %v11442_v18, %v11440_v25  ;;  %v9608_v10 = vpack.c.bf16 %v11499_v51, %v11467_v41  ;;  %v9512_v61 = vpack.c.bf16 %v11465_v32, %v11457_v23 }
  0xfc   :  { %9489 = vmatpush1.bf16.msra.mxu1 %v9488_v63  ;;  %9591 = vmatprep.subr.bf16.mxu0 %v9590_v1  ;;  %v9508_v63 = vpack.c.bf16 %v11420_v42, %v13990_v38  ;;  %v14011_v1 = vld [vmem:[#allocation18_spill] sm:$0xff] }
  0xfd   :  { %9491 = vmatprep.subr.bf16.mxu1 %v9490_v59  ;;  %v9510_v59 = vpack.c.bf16 %v11435_v4, %v11433_v26 }
  0xff   :  { %9593 = vmatpush1.bf16.msra.mxu0 %v9592_v44  ;;  %v14016_v44 = vld [vmem:[#allocation34_spill] sm:$0xff] }
 0x100   :  { %9493 = vmatpush1.bf16.msra.mxu1 %v9492_v14  ;;  %9595 = vmatprep.subr.bf16.mxu0 %v9594_v39  ;;  %v14012_v14 = vld [vmem:[#allocation27_spill] sm:$0xff]  ;;  %v14017_v39 = vld [vmem:[#allocation33_spill] sm:$0xff] }
 0x101   :  { %9495 = vmatprep.subr.bf16.mxu1 %v9494_v16  ;;  %v14015_v16 = vld [vmem:[#allocation29_spill] sm:$0xff] }
 0x102   :  { %3100 = vmatmul.mubr.f32.vlgmr.msra.gmra.mrb[4].mxu0 %v10872_v12 }
 0x103   :  { %9597 = vmatpush1.bf16.msra.mxu0 %v9596_v29  ;;  %3202 = vmatprep.mubr.f32.mxu0 %v13883_v40 }
 0x104   :  { %9497 = vmatpush1.bf16.msra.mxu1 %v9496_v9  ;;  %9599 = vmatprep.subr.bf16.mxu0 %v9598_v56  ;;  %v14018_v9 = vand.u32 4294901760, %v11353_v43  ;;  %v14020_v56 = vld [vmem:[#allocation32_spill] sm:$0xff]  ;;  %v14027_v43 = vand.u32 4294901760, %v11378_v45  ;;  %v14034_v45 = vand.u32 4294901760, %v11373_v30 }
 0x105   :  { %9499 = vmatprep.subr.bf16.mxu1 %v9498_v57  ;;  %v14019_v57 = vand.u32 4294901760, %v11355_v60  ;;  %v14028_v60 = vand.u32 4294901760, %v11380_v27  ;;  %v14035_v27 = vand.u32 4294901760, %v11393_v24  ;;  %v14039_v24 = vand.u32 4294901760, %v14003_v34 }
 0x106   :  { %v14044_v34 = vand.u32 4294901760, %v11420_v42  ;;  %v14051_v42 = vand.u32 4294901760, %v11457_v23 }
 0x107   :  { %2453 = vmatmul.mubr.f32.vlgmr.msra.gmra.mrb[4].mxu1 %v10872_v12  ;;  %9601 = vmatpush1.bf16.msra.mxu0 %v9600_v22  ;;  %v9626_v29 = vpack.c.bf16 %v14019_v57, %v14018_v9  ;;  %v14023_v22 = vand.u32 4294901760, %v11347_v54  ;;  %v14031_v54 = vand.u32 4294901760, %v11361_v15  ;;  %v81_v9 = vld [vmem:[#allocation5 + $0x58] sm:$0xff]  ;;  %v14037_v15 = vand.u32 4294901760, %v11408_v13 }
 0x108   :  { %9501 = vmatpush1.bf16.msra.mxu1 %v9500_v33  ;;  %2555 = vmatprep.mubr.f32.mxu1 %v13883_v40  ;;  %v14021_v33 = vld [vmem:[#allocation31_spill] sm:$0xff]  ;;  %v14042_v13 = vand.u32 4294901760, %v11403_v21  ;;  %v14047_v21 = vand.u32 4294901760, %v11433_v26 }
 0x109   :  { %9503 = vmatprep.subr.bf16.mxu1 %v9502_v50  ;;  %9603 = vmatprep.subr.bf16.mxu0 %v9602_v46  ;;  %v14022_v50 = vld [vmem:[#allocation36_spill] sm:$0xff]  ;;  %v14024_v46 = vand.u32 4294901760, %v11349_v31 }
 0x10a   :  { %v14032_v31 = vld [vmem:[#allocation16_spill] sm:$0xff] }
 0x10b   :  { %9605 = vmatpush1.bf16.msra.mxu0 %v9604_v7  ;;  %v14026_v7 = vand.u32 4294901760, %v11367_v19  ;;  %v14033_v19 = vand.u32 4294901760, %v11371_v2  ;;  %v3509_v2 = vand.u32 4294901760, %v81_v9  ;;  %v158_v26 = vld [vmem:[#allocation5 + $0x2c0] sm:$0xff] }
 0x10c   :  { %9505 = vmatpush1.bf16.msra.mxu1 %v9504_v49  ;;  %9607 = vmatprep.subr.bf16.mxu0 %v9606_v37  ;;  %v9530_v49 = vpack.c.bf16 %v14024_v46, %v14023_v22  ;;  %v108_v46 = vld [vmem:[#allocation5 + $0x130] sm:$0xff] }
 0x10d   :  { %9507 = vmatprep.subr.bf16.mxu1 %v9506_v36  ;;  %v14025_v36 = vand.u32 4294901760, %v11363_v62  ;;  %v106_v62 = vld [vmem:[#allocation5 + $0x120] sm:$0xff]  ;;  %v9534_v57 = vpack.c.bf16 %v14034_v45, %v14033_v19  ;;  %v107_v19 = vld [vmem:[#allocation5 + $0x128] sm:$0xff] }
 0x10e   :  { %v3513_v30 = vand.u32 4294901760, %v106_v62 }
 0x10f   :  { %9609 = vmatpush1.bf16.msra.mxu0 %v9608_v10  ;;  %v9628_v37 = vpack.c.bf16 %v14026_v7, %v14025_v36  ;;  %v14030_v10 = vand.u32 4294901760, %v11359_v0  ;;  %v83_v0 = vld [vmem:[#allocation5 + $0x68] sm:$0xff]  ;;  %v14038_v36 = vand.u32 4294901760, %v11412_v28 }
 0x110   :  { %9509 = vmatpush1.bf16.msra.mxu1 %v9508_v63  ;;  %9611 = vmatprep.subr.bf16.mxu0 %v14005_v17  ;;  %v9630_v63 = vpack.c.bf16 %v14028_v60, %v14027_v43  ;;  %v14041_v60 = vand.u32 4294901760, %v11397_v11  ;;  %v14046_v11 = vand.u32 4294901760, %v11427_v53  ;;  %v11756_v23 = vsub.f32 %v106_v62, %v3513_v30 }
 0x111   :  { %9511 = vmatprep.subr.bf16.mxu1 %v9510_v59  ;;  %v14029_v59 = vld [vmem:[#allocation35_spill] sm:$0xff]  ;;  %v9634_v7 = vpack.c.bf16 %v14038_v36, %v14037_v15  ;;  %v131_v36 = vld [vmem:[#allocation5 + $0x1e8] sm:$0xff] }
 0x112   :  { %3205 = vmatmul.mubr.f32.vlgmr.msra.gmra.mrb[4].mxu0 %v14006_v8  ;;  %v9538_v28 = vpack.c.bf16 %v14042_v13, %v14041_v60  ;;  %v156_v60 = vld [vmem:[#allocation5 + $0x2b0] sm:$0xff]  ;;  %v133_v13 = vld [vmem:[#allocation5 + $0x1f8] sm:$0xff] }
 0x113   :  { %9613 = vmatpush1.bf16.msra.mxu0 %v14008_v47  ;;  %3291 = vmatprep.mubr.f32.mxu0 %v13883_v40 }
 0x114   :  { %9513 = vmatpush1.bf16.msra.mxu1 %v9512_v61  ;;  %9615 = vmatprep.subr.bf16.mxu0 %v14009_v48  ;;  %v9532_v61 = vpack.c.bf16 %v14031_v54, %v14030_v10  ;;  %v4160_v10 = vand.u32 4294901760, %v108_v46  ;;  %v82_v54 = vld [vmem:[#allocation5 + $0x60] sm:$0xff] }
 0x115   :  { %9515 = vmatprep.subr.bf16.mxu1 %v14007_v35 }
 0x117   :  { %2558 = vmatmul.mubr.f32.vlgmr.msra.gmra.mrb[4].mxu1 %v14006_v8  ;;  %9617 = vmatpush1.bf16.msra.mxu0 %v14012_v14  ;;  %v182_v8 = vld [vmem:[#allocation5 + $0x380] sm:$0xff] }
 0x118   :  { %9517 = vmatpush1.bf16.msra.mxu1 %v14010_v55  ;;  %2644 = vmatprep.mubr.f32.mxu1 %v13883_v40 }
 0x119   :  { %9519 = vmatprep.subr.bf16.mxu1 %v14011_v1  ;;  %9619 = vmatprep.subr.bf16.mxu0 %v14013_v3 }
 0x11b   :  { %9621 = vmatpush1.bf16.msra.mxu0 %v14016_v44 }
 0x11c   :  { %9521 = vmatpush1.bf16.msra.mxu1 %v14014_v5  ;;  %9623 = vmatprep.subr.bf16.mxu0 %v14017_v39 }
 0x11d   :  { %9523 = vmatprep.subr.bf16.mxu1 %v14015_v16 }
 0x11f   :  { %9625 = vmatpush1.bf16.msra.mxu0 %v14022_v50 }
 0x120   :  { %9525 = vmatpush1.bf16.msra.mxu1 %v14020_v56  ;;  %9627 = vmatprep.subr.bf16.mxu0 %v9626_v29  ;;  %v14036_v29 = vand.u32 4294901760, %v11395_v52  ;;  %v14040_v52 = vand.u32 4294901760, %v14004_v6  ;;  %v14045_v6 = vand.u32 4294901760, %v11422_v58 }
 0x121   :  { %9527 = vmatprep.subr.bf16.mxu1 %v14021_v33 }
 0x122   :  { %3295 = vmatmul.mubr.f32.vlgmr.msra.gmra.mrb[4].mxu0 %v14032_v31  ;;  %v9632_v22 = vpack.c.bf16 %v14036_v29, %v14035_v27  ;;  %v9536_v43 = vpack.c.bf16 %v14040_v52, %v14039_v24  ;;  %v9636_v27 = vpack.c.bf16 %v14046_v11, %v14045_v6  ;;  %v14048_v29 = vand.u32 4294901760, %v11435_v4 }
 0x123   :  { %9629 = vmatpush1.bf16.msra.mxu0 %v9628_v37  ;;  %3413 = vmatprep.mubr.f32.mxu0 %v13883_v40  ;;  %v105_v37 = vld [vmem:[#allocation5 + $0x118] sm:$0xff]  ;;  %v14052_v24 = vand.u32 4294901760, %v11465_v32  ;;  %v14053_v4 = vand.u32 4294901760, %v11467_v41  ;;  %v11754_v6 = vsub.f32 %v81_v9, %v3509_v2  ;;  %v3517_v41 = vand.u32 4294901760, %v131_v36 }
 0x124   :  { %9529 = vmatpush1.bf16.msra.mxu1 %v14029_v59  ;;  %9631 = vmatprep.subr.bf16.mxu0 %v9630_v63  ;;  %v4156_v63 = vand.u32 4294901760, %v83_v0  ;;  %v9542_v15 = vpack.c.bf16 %v14048_v29, %v14047_v21  ;;  %v3515_v53 = vand.u32 4294901760, %v105_v37  ;;  %v130_v21 = vld [vmem:[#allocation5 + $0x1e0] sm:$0xff]  ;;  %v155_v29 = vld [vmem:[#allocation5 + $0x2a8] sm:$0xff] }
 0x125   :  { %9531 = vmatprep.subr.bf16.mxu1 %v9530_v49  ;;  %v80_v49 = vld [vmem:[#allocation5 + $0x50] sm:$0xff]  ;;  %v9544_v58 = vpack.c.bf16 %v14052_v24, %v14051_v42  ;;  %v157_v24 = vld [vmem:[#allocation5 + $0x2b8] sm:$0xff] }
 0x126   :  { %v3511_v52 = vand.u32 4294901760, %v80_v49  ;;  %v11758_v32 = vpack.c.bf16 %v4160_v10, %v4156_v63  ;;  %v11760_v11 = vsub.f32 %v83_v0, %v4156_v63  ;;  %v132_v42 = vld [vmem:[#allocation5 + $0x1f0] sm:$0xff]  ;;  %v3523_v63 = vand.u32 4294901760, %v155_v29 }
 0x127   :  { %2648 = vmatmul.mubr.f32.vlgmr.msra.gmra.mrb[4].mxu1 %v14032_v31  ;;  %9633 = vmatpush1.bf16.msra.mxu0 %v9632_v22  ;;  %v14050_v22 = vand.u32 4294901760, %v11442_v18  ;;  %v4162_v18 = vand.u32 4294901760, %v107_v19  ;;  %v183_v31 = vld [vmem:[#allocation5 + $0x388] sm:$0xff] }
 0x128   :  { %9533 = vmatpush1.bf16.msra.mxu1 %v9532_v61  ;;  %2766 = vmatprep.mubr.f32.mxu1 %v13883_v40  ;;  %v14043_v61 = vand.u32 4294901760, %v13990_v38  ;;  %14056 = vst [vmem:[#allocation19_spill] sm:$0xff] %v11758_v32  ;;  %v11764_v9 = vpack.c.bf16 %v3515_v53, %v3511_v52  ;;  %v11766_v62 = vsub.f32 %v80_v49, %v3511_v52  ;;  %v208_v49 = vld [vmem:[#allocation5 + $0x450] sm:$0xff] }
 0x129   :  { %9535 = vmatprep.subr.bf16.mxu1 %v9534_v57  ;;  %9635 = vmatprep.subr.bf16.mxu0 %v9634_v7  ;;  %v14049_v57 = vand.u32 4294901760, %v11440_v25  ;;  %v4158_v25 = vand.u32 4294901760, %v82_v54 }
 0x12a   :  { %v9540_v45 = vpack.c.bf16 %v14044_v34, %v14043_v61  ;;  %v14054_v61 = vand.u32 4294901760, %v11499_v51  ;;  %v11752_v34 = vpack.c.bf16 %v3513_v30, %v3509_v2  ;;  %v3521_v51 = vand.u32 4294901760, %v156_v60  ;;  %14057 = vst [vmem:[#allocation21_spill] sm:$0xff] %v11764_v9  ;;  %v233_v9 = vld [vmem:[#allocation5 + $0x518] sm:$0xff] }
 0x12b   :  { %v9638_v38 = vpack.c.bf16 %v14050_v22, %v14049_v57  ;;  %9637 = vmatpush1.bf16.msra.mxu0 %v9636_v27  ;;  %v4164_v57 = vand.u32 4294901760, %v133_v13  ;;  %v4168_v22 = vand.u32 4294901760, %v158_v26  ;;  %v11768_v2 = vsub.f32 %v105_v37, %v3515_v53  ;;  %v181_v27 = vld [vmem:[#allocation5 + $0x378] sm:$0xff]  ;;  %v180_v53 = vld [vmem:[#allocation5 + $0x370] sm:$0xff] }
 0x12c   :  { %v9640_v7 = vpack.c.bf16 %v14054_v61, %v14053_v4  ;;  %14055 = vst [vmem:[#allocation28_spill] sm:$0xff] %v11752_v34  ;;  %9537 = vmatpush1.bf16.msra.mxu1 %v9536_v43  ;;  %v11762_v43 = vsub.f32 %v108_v46, %v4160_v10  ;;  %v11770_v0 = vpack.c.bf16 %v4162_v18, %v4158_v25  ;;  %v206_v4 = vld [vmem:[#allocation5 + $0x440] sm:$0xff]  ;;  %v4166_v46 = vand.u32 4294901760, %v132_v42 }
 0x12d   :  { %9539 = vmatprep.subr.bf16.mxu1 %v9538_v28  ;;  %9639 = vmatprep.subr.bf16.mxu0 %v9638_v38  ;;  %v11772_v30 = vsub.f32 %v82_v54, %v4158_v25  ;;  %v3519_v28 = vand.u32 4294901760, %v130_v21  ;;  %v11774_v61 = vsub.f32 %v107_v19, %v4162_v18  ;;  %v11776_v38 = vsub.f32 %v131_v36, %v3517_v41  ;;  %v205_v25 = vld [vmem:[#allocation5 + $0x438] sm:$0xff] }
 0x12e   :  { %14058 = vst [vmem:[#allocation25_spill] sm:$0xff] %v11770_v0  ;;  %v4170_v10 = vand.u32 4294901760, %v157_v24  ;;  %v11778_v37 = vpack.c.bf16 %v3521_v51, %v3517_v41  ;;  %v11780_v52 = vsub.f32 %v156_v60, %v3521_v51  ;;  %v11782_v54 = vpack.c.bf16 %v4168_v22, %v4164_v57  ;;  %v231_v51 = vld [vmem:[#allocation5 + $0x508] sm:$0xff] }
 0x12f   :  { %9641 = vmatpush1.bf16.msra.mxu0 %v9640_v7  ;;  %v11785_v19 = vsub.f32 %v133_v13, %v4164_v57  ;;  %v3525_v36 = vand.u32 4294901760, %v181_v27  ;;  %v3529_v18 = vand.u32 4294901760, %v206_v4  ;;  %v11791_v7 = vsub.f32 %v130_v21, %v3519_v28 }
 0x130   :  { %9541 = vmatpush1.bf16.msra.mxu1 %v9540_v45  ;;  %14059 = vst [vmem:[#allocation23_spill] sm:$0xff] %v11778_v37  ;;  %14060 = vst [vmem:[#allocation30_spill] sm:$0xff] %v11782_v54  ;;  %9643 = vmatprep.subr.bf16.mxu0 %v14005_v17  ;;  %v11787_v45 = vsub.f32 %v158_v26, %v4168_v22  ;;  %v4172_v60 = vand.u32 4294901760, %v183_v31  ;;  %v4176_v41 = vand.u32 4294901760, %v208_v49  ;;  %v256_v37 = vld [vmem:[#allocation5 + $0x5d0] sm:$0xff]  ;;  %v3527_v26 = vand.u32 4294901760, %v180_v53 }
 0x131   :  { %9543 = vmatprep.subr.bf16.mxu1 %v9542_v15  ;;  %v11789_v15 = vpack.c.bf16 %v3523_v63, %v3519_v28  ;;  %v11794_v17 = vsub.f32 %v155_v29, %v3523_v63  ;;  %v11796_v13 = vpack.c.bf16 %v4170_v10, %v4166_v46  ;;  %v3531_v57 = vand.u32 4294901760, %v205_v25 }
 0x132   :  { %3415 = vmatmul.mubr.f32.vlgmr.msra.gmra.mrb[4].mxu0 %v10872_v12  ;;  %v11800_v22 = vsub.f32 %v132_v42, %v4166_v46  ;;  %v11802_v21 = vsub.f32 %v157_v24, %v4170_v10  ;;  %v4174_v28 = vand.u32 4294901760, %v182_v8  ;;  %v11806_v29 = vpack.c.bf16 %v3529_v18, %v3525_v36  ;;  %v230_v10 = vld [vmem:[#allocation5 + $0x500] sm:$0xff] }
 0x133   :  { %14061 = vst [vmem:[#allocation20_spill] sm:$0xff] %v11789_v15  ;;  %14062 = vst [vmem:[#allocation26_spill] sm:$0xff] %v11796_v13  ;;  %9645 = vmatpush1.bf16.msra.mxu0 %v14008_v47  ;;  %v4178_v15 = vand.u32 4294901760, %v207_v20  ;;  %3501 = vmatprep.mubr.f32.mxu0 %v13883_v40  ;;  %v11808_v63 = vsub.f32 %v181_v27, %v3525_v36  ;;  %v3533_v13 = vand.u32 4294901760, %v231_v51 }
 0x134   :  { %9545 = vmatpush1.bf16.msra.mxu1 %v9544_v58  ;;  %v258_v58 = vld [vmem:[#allocation5 + $0x5e0] sm:$0xff]  ;;  %9647 = vmatprep.subr.bf16.mxu0 %v14009_v48  ;;  %14063 = vst [vmem:[#allocation18_spill] sm:$0xff] %v11806_v29  ;;  %v11811_v47 = vsub.f32 %v206_v4, %v3529_v18  ;;  %v11813_v42 = vpack.c.bf16 %v4176_v41, %v4172_v60  ;;  %v255_v48 = vld [vmem:[#allocation5 + $0x5c8] sm:$0xff]  ;;  %v4180_v29 = vand.u32 4294901760, %v233_v9  ;;  %v232_v4 = vld [vmem:[#allocation5 + $0x510] sm:$0xff] }
 0x135   :  { %9547 = vmatprep.subr.bf16.mxu1 %v14007_v35  ;;  %14064 = vst [vmem:[#allocation27_spill] sm:$0xff] %v11808_v63  ;;  %v3537_v35 = vand.u32 4294901760, %v256_v37  ;;  %v11815_v24 = vsub.f32 %v183_v31, %v4172_v60  ;;  %v11817_v46 = vsub.f32 %v208_v49, %v4176_v41  ;;  %v11821_v27 = vpack.c.bf16 %v3531_v57, %v3527_v26 }
 0x136   :  { %14065 = vst [vmem:[#allocation24_spill] sm:$0xff] %v11811_v47  ;;  %14066 = vst [vmem:[#allocation22_spill] sm:$0xff] %v11813_v42  ;;  %v11823_v36 = vsub.f32 %v180_v53, %v3527_v26  ;;  %v4184_v63 = vand.u32 4294901760, %v258_v58  ;;  %v11827_v31 = vsub.f32 %v205_v25, %v3531_v57  ;;  %v11829_v49 = vpack.c.bf16 %v4178_v15, %v4174_v28  ;;  %v257_v26 = vld [vmem:[#allocation5 + $0x5d8] sm:$0xff] }
 0x137   :  { %2768 = vmatmul.mubr.f32.vlgmr.msra.gmra.mrb[4].mxu1 %v10872_v12  ;;  %14067 = vst [vmem:[#allocation29_spill] sm:$0xff] %v11821_v27  ;;  %9649 = vmatpush1.bf16.msra.mxu0 %v14012_v14  ;;  %v11831_v18 = vsub.f32 %v182_v8, %v4174_v28  ;;  %v11836_v60 = vpack.c.bf16 %v3537_v35, %v3533_v13  ;;  %v3535_v53 = vand.u32 4294901760, %v230_v10  ;;  %v3539_v41 = vand.u32 4294901760, %v255_v48 }
 0x138   :  { %9549 = vmatpush1.bf16.msra.mxu1 %v14010_v55  ;;  %2854 = vmatprep.mubr.f32.mxu1 %v13883_v40  ;;  %14068 = vst [vmem:[#allocation34_spill] sm:$0xff] %v11829_v49  ;;  %v11834_v55 = vsub.f32 %v207_v20, %v4178_v15  ;;  %v11838_v27 = vsub.f32 %v231_v51, %v3533_v13  ;;  %v4182_v14 = vand.u32 4294901760, %v232_v4  ;;  %v13664_v25 = vand.u32 4294901760, %v11754_v6 }
 0x139   :  { %9551 = vmatprep.subr.bf16.mxu1 %v14011_v1  ;;  %9651 = vmatprep.subr.bf16.mxu0 %v14013_v3  ;;  %14069 = vst [vmem:[#allocation33_spill] sm:$0xff] %v11836_v60  ;;  %v11840_v1 = vsub.f32 %v256_v37, %v3537_v35  ;;  %v11844_v8 = vpack.c.bf16 %v4184_v63, %v4180_v29  ;;  %v13663_v20 = vand.u32 4294901760, %v11756_v23  ;;  %v13671_v3 = vand.u32 4294901760, %v11760_v11 }
 0x13a   :  { %14070 = vst [vmem:[#allocation32_spill] sm:$0xff] %v11838_v27  ;;  %v11846_v57 = vsub.f32 %v233_v9, %v4180_v29  ;;  %v11852_v15 = vsub.f32 %v258_v58, %v4184_v63  ;;  %v4186_v37 = vand.u32 4294901760, %v257_v26  ;;  %v13668_v51 = vand.u32 4294901760, %v11762_v43 }
 0x13b   :  { %14071 = vst [vmem:[#allocation31_spill] sm:$0xff] %v11840_v1  ;;  %14072 = vst [vmem:[#allocation36_spill] sm:$0xff] %v11844_v8  ;;  %9653 = vmatpush1.bf16.msra.mxu0 %v14016_v44  ;;  %v13665_v13 = vand.u32 4294901760, %v11766_v62  ;;  %v13666_v9 = vand.u32 4294901760, %v11768_v2  ;;  %v13667_v28 = vand.u32 4294901760, %v11772_v30  ;;  %v3604_v44 = vsub.f32 %v11754_v6, %v13664_v25 }
 0x13c   :  { %9553 = vmatpush1.bf16.msra.mxu1 %v14014_v5  ;;  %9655 = vmatprep.subr.bf16.mxu0 %v14017_v39  ;;  %v11857_v5 = vpack.c.bf16 %v3539_v41, %v3535_v53  ;;  %v13669_v58 = vand.u32 4294901760, %v11776_v38  ;;  %v13670_v63 = vand.u32 4294901760, %v11780_v52  ;;  %v11870_v39 = vsub.f32 %v255_v48, %v3539_v41 }
 0x13d   :  { %9555 = vmatprep.subr.bf16.mxu1 %v14015_v16  ;;  %v11862_v16 = vsub.f32 %v230_v10, %v3535_v53  ;;  %v11872_v35 = vsub.f32 %v232_v4, %v4182_v14  ;;  %v3616_v29 = vsub.f32 %v11756_v23, %v13663_v20  ;;  %v4251_v10 = vsub.f32 %v11760_v11, %v13671_v3 }
 0x13e   :  { %14073 = vst [vmem:[#allocation35_spill] sm:$0xff] %v11857_v5  ;;  %v11882_v53 = vpack.c.bf16 %v4186_v37, %v4182_v14  ;;  %v3610_v48 = vsub.f32 %v11766_v62, %v13665_v13  ;;  %v3622_v4 = vsub.f32 %v11768_v2, %v13666_v9  ;;  %v8583_v14 = vlaneseq }
 0x13f   :  { %14074 = vst [vmem:[#allocation37_spill] sm:$0xff] %v11872_v35  ;;  %9657 = vmatpush1.bf16.msra.mxu0 %v14022_v50  ;;  %v14076_v50 = vand.u32 4294901760, %v11774_v61  ;;  %v11900_v20 = vsub.f32 %v257_v26, %v4186_v37  ;;  %v3605_v25 = vand.u32 4294901760, %v3604_v44  ;;  %v3628_v13 = vsub.f32 %v11776_v38, %v13669_v58  ;;  %v14078_v58 = vld [vmem:[#allocation21_spill] sm:$0xff] }
 0x140   :  { %9557 = vmatpush1.bf16.msra.mxu1 %v14020_v56  ;;  %14075 = vst [vmem:[#allocation38_spill] sm:$0xff] %v11882_v53  ;;  %v4263_v56 = vsub.f32 %v11762_v43, %v13668_v51  ;;  %9755 = vmatprep.subr.bf16.mxu0 %v11758_v32  ;;  %v3640_v9 = vsub.f32 %v11780_v52, %v13670_v63  ;;  %v4252_v51 = vand.u32 4294901760, %v4251_v10  ;;  %v3611_v44 = vand.u32 4294901760, %v3610_v48  ;;  %v14095_v32 = vld [vmem:[#allocation29_spill] sm:$0xff] }
 0x141   :  { %9559 = vmatprep.subr.bf16.mxu1 %v14021_v33  ;;  %v4257_v33 = vsub.f32 %v11772_v30, %v13667_v28  ;;  %v4269_v41 = vsub.f32 %v11774_v61, %v14076_v50  ;;  %v3617_v28 = vand.u32 4294901760, %v3616_v29  ;;  %v11918_v3 = vshrl.u32 %v8583_v14, 7 }
 0x142   :  { %3503 = vmatmul.mubr.f32.vlgmr.msra.gmra.mrb[4].mxu0 %v10872_v12  ;;  %v4264_v37 = vand.u32 4294901760, %v4263_v56  ;;  %v3629_v26 = vand.u32 4294901760, %v3628_v13  ;;  %v3641_v50 = vand.u32 4294901760, %v3640_v9  ;;  %v14081_v13 = vld [vmem:[#allocation27_spill] sm:$0xff]  ;;  %v14083_v56 = vld [vmem:[#allocation26_spill] sm:$0xff] }
 0x143   :  { %9757 = vmatpush1.bf16.msra.mxu0 %v11770_v0  ;;  %4236 = vmatprep.mubr.f32.mxu0 %v13883_v40  ;;  %v4258_v29 = vand.u32 4294901760, %v4257_v33  ;;  %v4270_v10 = vand.u32 4294901760, %v4269_v41  ;;  %14077 = vst [vmem:[#allocation39_spill] sm:$0xff] %v11918_v3  ;;  %v11925_v63 = vpack.c.bf16 %v3617_v28, %v3605_v25  ;;  %v14080_v41 = vand.u32 4294901760, %v11787_v45 }
 0x144   :  { %9561 = vmatpush1.bf16.msra.mxu1 %v14029_v59  ;;  %9759 = vmatprep.subr.bf16.mxu0 %v11782_v54  ;;  %v3623_v59 = vand.u32 4294901760, %v3622_v4  ;;  %v14079_v4 = vand.u32 4294901760, %v11785_v19  ;;  %v14082_v54 = vld [vmem:[#allocation23_spill] sm:$0xff]  ;;  %v9770_v48 = vpack.c.bf16 %v4264_v37, %v4252_v51  ;;  %v14085_v28 = vand.u32 4294901760, %v11794_v17 }
 0x145   :  { %9659 = vmatprep.subr.bf16.mxu1 %v11752_v34  ;;  %v4287_v14 = vsub.f32 %v11787_v45, %v14080_v41  ;;  %v9772_v9 = vpack.c.bf16 %v4270_v10, %v4258_v29  ;;  %v11953_v37 = vsub.s32 0, %v11918_v3  ;;  %v14088_v0 = vand.u32 4294901760, %v11802_v21 }
 0x146   :  { %v4275_v33 = vsub.f32 %v11785_v19, %v14079_v4  ;;  %v11944_v4 = vsub.f32 %v11794_v17, %v14085_v28  ;;  %v11948_v41 = vpack.c.bf16 %v3623_v59, %v3611_v44  ;;  %v14089_v44 = vld [vmem:[#allocation20_spill] sm:$0xff]  ;;  %v14090_v10 = vand.u32 4294901760, %v14081_v13 }
 0x147   :  { %2856 = vmatmul.mubr.f32.vlgmr.msra.gmra.mrb[4].mxu1 %v10872_v12  ;;  %9761 = vmatpush1.bf16.msra.mxu0 %v14083_v56  ;;  %14086 = vst [vmem:[#allocation40_spill] sm:$0xff] %v11953_v37  ;;  %v4288_v29 = vand.u32 4294901760, %v4287_v14  ;;  %v14093_v14 = vand.u32 4294901760, %v11815_v24  ;;  %v14094_v56 = vand.u32 4294901760, %v11817_v46 }
 0x148   :  { %9661 = vmatpush1.bf16.msra.mxu1 %v14078_v58  ;;  %3589 = vmatprep.mubr.f32.mxu1 %v13883_v40  ;;  %v14084_v58 = vand.u32 4294901760, %v11791_v7  ;;  %v4276_v59 = vand.u32 4294901760, %v4275_v33  ;;  %v3652_v51 = vsub.f32 %v14081_v13, %v14090_v10 }
 0x149   :  { %9663 = vmatprep.subr.bf16.mxu1 %v14082_v54  ;;  %9763 = vmatprep.subr.bf16.mxu0 %v11813_v42  ;;  %v14087_v54 = vand.u32 4294901760, %v11800_v22  ;;  %v4293_v42 = vsub.f32 %v11802_v21, %v14088_v0  ;;  %v14092_v0 = vand.u32 4294901760, %v11811_v47  ;;  %v4299_v10 = vsub.f32 %v11815_v24, %v14093_v14 }
 0x14a   :  { %v11939_v25 = vsub.f32 %v11791_v7, %v14084_v58  ;;  %v11955_v58 = vpack.c.bf16 %v3641_v50, %v3629_v26  ;;  %v14091_v50 = vld [vmem:[#allocation18_spill] sm:$0xff]  ;;  %v3647_v26 = vand.u32 4294901760, %v11944_v4  ;;  %v13694_v4 = vand.u32 4294901760, %v11852_v15 }
 0x14b   :  { %v4281_v28 = vsub.f32 %v11800_v22, %v14087_v54  ;;  %9765 = vmatpush1.bf16.msra.mxu0 %v11829_v49  ;;  %v4311_v49 = vsub.f32 %v11817_v46, %v14094_v56  ;;  %v4294_v34 = vand.u32 4294901760, %v4293_v42  ;;  %v14096_v14 = vand.u32 4294901760, %v11831_v18 }
 0x14c   :  { %9665 = vmatpush1.bf16.msra.mxu1 %v14089_v44  ;;  %v3635_v54 = vand.u32 4294901760, %v11939_v25  ;;  %v3664_v44 = vsub.f32 %v11811_v47, %v14092_v0  ;;  %9767 = vmatprep.subr.bf16.mxu0 %v11844_v8  ;;  %v13693_v25 = vand.u32 4294901760, %v11846_v57  ;;  %v9774_v8 = vpack.c.bf16 %v4288_v29, %v4276_v59 }
 0x14d   :  { %9667 = vmatprep.subr.bf16.mxu1 %v14091_v50  ;;  %v4282_v50 = vand.u32 4294901760, %v4281_v28  ;;  %v3653_v47 = vand.u32 4294901760, %v3652_v51  ;;  %v4305_v13 = vsub.f32 %v11831_v18, %v14096_v14  ;;  %v14097_v42 = vand.u32 4294901760, %v11834_v55 }
 0x14e   :  { %v4300_v59 = vand.u32 4294901760, %v4299_v10  ;;  %v4312_v29 = vand.u32 4294901760, %v4311_v49  ;;  %v4323_v14 = vsub.f32 %v11846_v57, %v13693_v25  ;;  %v4335_v56 = vsub.f32 %v11852_v15, %v13694_v4  ;;  %v14100_v49 = vld [vmem:[#allocation17_spill] sm:$0xff]  ;;  %v12014_v10 = vld [vmem:[#allocation7] sm:$0xff] }
 0x14f   :  { %9769 = vmatpush1.bf16.msra.mxu0 %v11882_v53  ;;  %v4317_v28 = vsub.f32 %v11834_v55, %v14097_v42  ;;  %v9776_v53 = vpack.c.bf16 %v4294_v34, %v4282_v50  ;;  %v14098_v42 = vand.u32 4294901760, %v11823_v36  ;;  %v14099_v0 = vand.u32 4294901760, %v11827_v31  ;;  %14101 = vst [vmem:[#allocation41_spill] sm:$0xff] %v12014_v10 }
 0x150   :  { %9669 = vmatpush1.bf16.msra.mxu1 %v14095_v32  ;;  %9771 = vmatprep.subr.bf16.mxu0 %v9770_v48  ;;  %v4306_v25 = vand.u32 4294901760, %v4305_v13  ;;  %v14102_v51 = vand.u32 4294901760, %v11838_v27  ;;  %v14105_v32 = vand.u32 4294901760, %v11900_v20  ;;  %v9680_v50 = vpack.c.bf16 %v3647_v26, %v3635_v54 }
 0x151   :  { %9671 = vmatprep.subr.bf16.mxu1 %v11836_v60  ;;  %v3665_v60 = vand.u32 4294901760, %v3664_v44  ;;  %v3658_v33 = vsub.f32 %v11823_v36, %v14098_v42  ;;  %v3670_v48 = vsub.f32 %v11827_v31, %v14099_v0  ;;  %v4318_v42 = vand.u32 4294901760, %v4317_v28 }
 0x152   :  { %4242 = vmatmul.mubr.f32.vlgmr.msra.gmra.mrb[6].mxu0 %v14100_v49  ;;  %v3676_v34 = vsub.f32 %v11838_v27, %v14102_v51  ;;  %v14103_v0 = vand.u32 4294901760, %v11840_v1  ;;  %v4341_v51 = vsub.f32 %v11900_v20, %v14105_v32  ;;  %v12032_v44 = vsub.s32 1, %v11918_v3  ;;  %v12039_v32 = vld [vmem:[#allocation8] sm:$0xff] }
 0x153   :  { %9773 = vmatpush1.bf16.msra.mxu0 %v9772_v9  ;;  %v4324_v9 = vand.u32 4294901760, %v4323_v14  ;;  %v4336_v28 = vand.u32 4294901760, %v4335_v56  ;;  %4392 = vmatprep.mubr.f32.mxu0 %v13883_v40  ;;  %14107 = vst [vmem:[#allocation43_spill] sm:$0xff] %v12039_v32  ;;  %v3671_v3 = vand.u32 4294901760, %v3670_v48 }
 0x154   :  { %9673 = vmatpush1.bf16.msra.mxu1 %v11857_v5  ;;  %v3688_v4 = vsub.f32 %v11840_v1, %v14103_v0  ;;  %v14104_v5 = vand.u32 4294901760, %v11872_v35  ;;  %v916_v27 = vpop.f32.mrb[0].mxu0  ;;  %14106 = vst [vmem:[#allocation42_spill] sm:$0xff] %v12032_v44  ;;  %9775 = vmatprep.subr.bf16.mxu0 %v9774_v8  ;;  %v8586_v0 = vrot.slane %v12014_v10, %v11953_v37  ;;  %v3659_v1 = vand.u32 4294901760, %v3658_v33 }
 0x155   :  { %9675 = vmatprep.subr.bf16.mxu1 %v11925_v63  ;;  %v9778_v63 = vpack.c.bf16 %v4312_v29, %v4300_v59  ;;  %v3677_v8 = vand.u32 4294901760, %v3676_v34  ;;  %v14108_v59 = vand.u32 4294901760, %v11862_v16  ;;  %v14109_v29 = vand.u32 4294901760, %v11870_v39 }
 0x156   :  { %v4329_v13 = vsub.f32 %v11872_v35, %v14104_v5  ;;  %v918_v5 = vpop.f32.mrb[1].mxu0  ;;  %v9682_v35 = vpack.c.bf16 %v3665_v60, %v3653_v47  ;;  %v9780_v47 = vpack.c.bf16 %v4318_v42, %v4306_v25  ;;  %v3689_v60 = vand.u32 4294901760, %v3688_v4 }
 0x157   :  { %3595 = vmatmul.mubr.f32.vlgmr.msra.gmra.mrb[6].mxu1 %v14100_v49  ;;  %v3682_v56 = vsub.f32 %v11862_v16, %v14108_v59  ;;  %v3694_v14 = vsub.f32 %v11870_v39, %v14109_v29  ;;  %9777 = vmatpush1.bf16.msra.mxu0 %v9776_v53  ;;  %v4342_v54 = vand.u32 4294901760, %v4341_v51  ;;  %v8590_v33 = vrot.slane %v12014_v10, %v12032_v44 }
 0x158   :  { %9677 = vmatpush1.bf16.msra.mxu1 %v11948_v41  ;;  %3745 = vmatprep.mubr.f32.mxu1 %v13883_v40  ;;  %v4330_v41 = vand.u32 4294901760, %v4329_v13  ;;  %v9782_v48 = vpack.c.bf16 %v4336_v28, %v4324_v9  ;;  %v8744_v59 = vrot.slane %v12039_v32, %v11953_v37  ;;  %v8748_v49 = vrot.slane %v12039_v32, %v12032_v44  ;;  %v112_v37 = vld [vmem:[#allocation5 + $0x150] sm:$0xff] }
 0x159   :  { %9679 = vmatprep.subr.bf16.mxu1 %v11955_v58  ;;  %9779 = vmatprep.subr.bf16.mxu0 %v9778_v63  ;;  %v9684_v53 = vpack.c.bf16 %v3671_v3, %v3659_v1  ;;  %v3683_v25 = vand.u32 4294901760, %v3682_v56  ;;  %v3695_v4 = vand.u32 4294901760, %v3694_v14  ;;  %v9686_v13 = vpack.c.bf16 %v3689_v60, %v3677_v8  ;;  %v14111_v60 = vld [vmem:[#allocation24_spill] sm:$0xff] }
 0x15a   :  { %v618_v26 = vpop.f32.mrb[0].mxu1  ;;  %v9784_v51 = vpack.c.bf16 %v4342_v54, %v4330_v41  ;;  %v9690_v1 = vpack.c.bf16 %v11756_v23, %v11754_v6  ;;  %v9788_v3 = vpack.c.bf16 %v11774_v61, %v11772_v30  ;;  %v9694_v8 = vpack.c.bf16 %v11780_v52, %v11776_v38 }
 0x15b   :  { %v10402_v34 = vadd.f32 %v916_v27, %v618_v26  ;;  %v620_v29 = vpop.f32.mrb[1].mxu1  ;;  %9781 = vmatpush1.bf16.msra.mxu0 %v9780_v47  ;;  %v9786_v27 = vpack.c.bf16 %v11762_v43, %v11760_v11  ;;  %v9688_v26 = vpack.c.bf16 %v3695_v4, %v3683_v25  ;;  %v9792_v56 = vpack.c.bf16 %v11802_v21, %v11800_v22  ;;  %v14110_v47 = vld [vmem:[#allocation27_spill] sm:$0xff] }
 0x15c   :  { %v10403_v58 = vadd.f32 %v918_v5, %v620_v29  ;;  %9681 = vmatpush1.bf16.msra.mxu1 %v9680_v50  ;;  %9783 = vmatprep.subr.bf16.mxu0 %v9782_v48  ;;  %v9790_v50 = vpack.c.bf16 %v11787_v45, %v11785_v19  ;;  %v9696_v14 = vpack.c.bf16 %v11794_v17, %v11791_v7 }
 0x15d   :  { %v8708_v42 = vsub.f32 %v10402_v34, %v8586_v0  ;;  %9683 = vmatprep.subr.bf16.mxu1 %v9682_v35  ;;  %v9698_v41 = vpack.c.bf16 %v14111_v60, %v14110_v47  ;;  %v9796_v54 = vpack.c.bf16 %v11834_v55, %v11831_v18  ;;  %v9700_v48 = vpack.c.bf16 %v11827_v31, %v11823_v36  ;;  %v14112_v34 = vld [vmem:[#allocation32_spill] sm:$0xff] }
 0x15e   :  { %v8709_v63 = vsub.f32 %v10403_v58, %v8590_v33  ;;  %v9798_v33 = vpack.c.bf16 %v11852_v15, %v11846_v57  ;;  %v14114_v58 = vld [vmem:[#allocation37_spill] sm:$0xff] }
 0x15f   :  { %v8866_v9 = vmul.f32 %v8744_v59, %v8708_v42  ;;  %9785 = vmatpush1.bf16.msra.mxu0 %v9784_v51  ;;  %v14113_v59 = vld [vmem:[#allocation31_spill] sm:$0xff] }
 0x160   :  { %v8867_v28 = vmul.f32 %v8748_v49, %v8709_v63  ;;  %9685 = vmatpush1.bf16.msra.mxu1 %v9684_v53  ;;  %9787 = vmatprep.subr.bf16.mxu0 %v9786_v27  ;;  %v9692_v49 = vpack.c.bf16 %v11768_v2, %v11766_v62  ;;  %v9702_v29 = vpack.c.bf16 %v14113_v59, %v14112_v34  ;;  %v14116_v51 = vld [vmem:[#allocation15_spill] sm:$0xff]  ;;  %v14118_v27 = vld [vmem:[#allocation25_spill] sm:$0xff] }
 0x161   :  { %v8891_v44 = vmul.f32 %v8866_v9, %v8708_v42  ;;  %9687 = vmatprep.subr.bf16.mxu1 %v9686_v13  ;;  %v9800_v53 = vpack.c.bf16 %v11900_v20, %v14114_v58  ;;  %v9704_v42 = vpack.c.bf16 %v11870_v39, %v11862_v16  ;;  %v14115_v13 = vld [vmem:[#allocation19_spill] sm:$0xff]  ;;  %v14119_v9 = vld [vmem:[#allocation30_spill] sm:$0xff] }
 0x162   :  { %v8892_v35 = vmul.f32 %v8867_v28, %v8709_v63  ;;  %4394 = vmatmul.mubr.f32.vlgmr.msra.gmra.mrb[6].mxu0 %v10872_v12  ;;  %v14117_v63 = vld [vmem:[#allocation28_spill] sm:$0xff]  ;;  %v14120_v28 = vld [vmem:[#allocation21_spill] sm:$0xff] }
 0x163   :  { %v8916_v0 = vmul.f32 1.442695, %v8891_v44  ;;  %9789 = vmatpush1.bf16.msra.mxu0 %v9788_v3  ;;  %v9794_v44 = vpack.c.bf16 %v11817_v46, %v11815_v24  ;;  %4496 = vmatprep.mubr.f32.mxu0 %v13883_v40  ;;  %v14123_v3 = vld [vmem:[#allocation22_spill] sm:$0xff] }
 0x164   :  { %v8918_v5 = vmul.f32 1.442695, %v8892_v35  ;;  %9689 = vmatpush1.bf16.msra.mxu1 %v9688_v26  ;;  %9791 = vmatprep.subr.bf16.mxu0 %v9790_v50  ;;  %v14121_v26 = vld [vmem:[#allocation23_spill] sm:$0xff]  ;;  %v14124_v35 = vld [vmem:[#allocation20_spill] sm:$0xff]  ;;  %v14125_v50 = vld [vmem:[#allocation18_spill] sm:$0xff] }
 0x165   :  { %10542 = vpow2.f32 %v8916_v0  ;;  %9691 = vmatprep.subr.bf16.mxu1 %v9690_v1  ;;  %v14122_v1 = vld [vmem:[#allocation26_spill] sm:$0xff] }
 0x166   :  { %10544 = vpow2.f32 %v8918_v5  ;;  %v14126_v0 = vld [vmem:[#allocation34_spill] sm:$0xff]  ;;  %v14127_v5 = vld [vmem:[#allocation36_spill] sm:$0xff] }
 0x167   :  { %3747 = vmatmul.mubr.f32.vlgmr.msra.gmra.mrb[6].mxu1 %v10872_v12  ;;  %9793 = vmatpush1.bf16.msra.mxu0 %v9792_v56 }
 0x168   :  { %9693 = vmatpush1.bf16.msra.mxu1 %v9692_v49  ;;  %3849 = vmatprep.mubr.f32.mxu1 %v13883_v40  ;;  %v14128_v49 = vand.u32 4294901760, %v11760_v11  ;;  %v14137_v11 = vand.u32 4294901760, %v11785_v19  ;;  %v14144_v19 = vand.u32 4294901760, %v11780_v52 }
 0x169   :  { %9695 = vmatprep.subr.bf16.mxu1 %v9694_v8  ;;  %9795 = vmatprep.subr.bf16.mxu0 %v9794_v44  ;;  %v14129_v8 = vand.u32 4294901760, %v11762_v43  ;;  %v14130_v44 = vld [vmem:[#allocation29_spill] sm:$0xff]  ;;  %v14138_v43 = vand.u32 4294901760, %v11787_v45 }
 0x16a   :  { %v84_v45 = vld [vmem:[#allocation5 + $0x70] sm:$0xff] }
 0x16b   :  { %9797 = vmatpush1.bf16.msra.mxu0 %v9796_v54  ;;  %v9818_v56 = vpack.c.bf16 %v14129_v8, %v14128_v49  ;;  %v14133_v54 = vand.u32 4294901760, %v11754_v6  ;;  %v110_v49 = vld [vmem:[#allocation5 + $0x140] sm:$0xff]  ;;  %v87_v8 = vld [vmem:[#allocation5 + $0x88] sm:$0xff]  ;;  %v14140_v6 = vand.u32 4294901760, %v11766_v62  ;;  %v14147_v62 = vand.u32 4294901760, %v11800_v22 }
 0x16c   :  { %9697 = vmatpush1.bf16.msra.mxu1 %v9696_v14  ;;  %9799 = vmatprep.subr.bf16.mxu0 %v9798_v33  ;;  %v14131_v14 = vld [vmem:[#allocation33_spill] sm:$0xff]  ;;  %v14134_v33 = vand.u32 4294901760, %v11756_v23  ;;  %v14141_v23 = vand.u32 4294901760, %v11768_v2  ;;  %v14148_v2 = vand.u32 4294901760, %v11802_v21  ;;  %v14151_v22 = vand.u32 4294901760, %v14110_v47 }
 0x16d   :  { %9699 = vmatprep.subr.bf16.mxu1 %v9698_v41  ;;  %v14132_v41 = vld [vmem:[#allocation38_spill] sm:$0xff]  ;;  %v14152_v21 = vand.u32 4294901760, %v14111_v60  ;;  %v14157_v47 = vand.u32 4294901760, %v14112_v34  ;;  %v14158_v60 = vand.u32 4294901760, %v14113_v59  ;;  %v14163_v34 = vand.u32 4294901760, %v14114_v58  ;;  %v134_v58 = vld [vmem:[#allocation5 + $0x200] sm:$0xff] }
 0x16e   :  { %v14164_v59 = vand.u32 4294901760, %v11900_v20  ;;  %v159_v20 = vld [vmem:[#allocation5 + $0x2c8] sm:$0xff] }
 0x16f   :  { %v10543_v25 = vpop.eup %10542  ;;  %9801 = vmatpush1.bf16.msra.mxu0 %v9800_v53  ;;  %v14136_v53 = vand.u32 4294901760, %v11774_v61  ;;  %v14143_v61 = vand.u32 4294901760, %v11776_v38  ;;  %v14150_v38 = vand.u32 4294901760, %v11817_v46  ;;  %v14154_v46 = vand.u32 4294901760, %v11827_v31 }
 0x170   :  { %v10545_v4 = vpop.eup %10544  ;;  %8966 = vst [vmem:[#allocation10] sm:$0xff] %v10543_v25  ;;  %9701 = vmatpush1.bf16.msra.mxu1 %v9700_v48  ;;  %9803 = vmatprep.subr.bf16.mxu0 %v14115_v13  ;;  %v9722_v48 = vpack.c.bf16 %v14134_v33, %v14133_v54  ;;  %v14142_v54 = vld [vmem:[#allocation16_spill] sm:$0xff]  ;;  %v109_v33 = vld [vmem:[#allocation5 + $0x138] sm:$0xff] }
 0x171   :  { %8967 = vst [vmem:[#allocation10 + $0x8] sm:$0xff] %v10545_v4  ;;  %9703 = vmatprep.subr.bf16.mxu1 %v9702_v29  ;;  %v14135_v29 = vand.u32 4294901760, %v11772_v30  ;;  %v9822_v4 = vpack.c.bf16 %v14138_v43, %v14137_v11  ;;  %v9724_v30 = vpack.c.bf16 %v14141_v23, %v14140_v6  ;;  %v9824_v43 = vpack.c.bf16 %v14148_v2, %v14147_v62  ;;  %v86_v23 = vld [vmem:[#allocation5 + $0x80] sm:$0xff]  ;;  %v135_v62 = vld [vmem:[#allocation5 + $0x208] sm:$0xff]  ;;  %v160_v2 = vld [vmem:[#allocation5 + $0x2d0] sm:$0xff] }
 0x172   :  { %4499 = vmatmul.mubr.f32.vlgmr.msra.gmra.mrb[6].mxu0 %v14116_v51  ;;  %v14149_v6 = vand.u32 4294901760, %v11815_v24  ;;  %v14153_v24 = vand.u32 4294901760, %v11823_v36  ;;  %v5452_v36 = vand.u32 4294901760, %v86_v23 }
 0x173   :  { %9805 = vmatpush1.bf16.msra.mxu0 %v14118_v27  ;;  %4585 = vmatprep.mubr.f32.mxu0 %v13883_v40  ;;  %v9820_v25 = vpack.c.bf16 %v14136_v53, %v14135_v29  ;;  %v14145_v29 = vand.u32 4294901760, %v11791_v7  ;;  %v14146_v53 = vand.u32 4294901760, %v11794_v17  ;;  %v4807_v7 = vand.u32 4294901760, %v110_v49 }
 0x174   :  { %9705 = vmatpush1.bf16.msra.mxu1 %v9704_v42  ;;  %9807 = vmatprep.subr.bf16.mxu0 %v14119_v9  ;;  %v85_v42 = vld [vmem:[#allocation5 + $0x78] sm:$0xff]  ;;  %v9826_v52 = vpack.c.bf16 %v14150_v38, %v14149_v6  ;;  %v5454_v17 = vand.u32 4294901760, %v112_v37  ;;  %v14155_v6 = vand.u32 4294901760, %v11831_v18  ;;  %v14156_v38 = vand.u32 4294901760, %v11834_v55 }
 0x175   :  { %9707 = vmatprep.subr.bf16.mxu1 %v14117_v63  ;;  %v9728_v11 = vpack.c.bf16 %v14146_v53, %v14145_v29  ;;  %v9732_v29 = vpack.c.bf16 %v14154_v46, %v14153_v24  ;;  %v4805_v53 = vand.u32 4294901760, %v84_v45  ;;  %v14161_v18 = vand.u32 4294901760, %v11862_v16 }
 0x176   :  { %v14162_v55 = vand.u32 4294901760, %v11870_v39  ;;  %v12187_v16 = vsub.f32 %v110_v49, %v4807_v7  ;;  %v210_v49 = vld [vmem:[#allocation5 + $0x460] sm:$0xff] }
 0x177   :  { %3852 = vmatmul.mubr.f32.vlgmr.msra.gmra.mrb[6].mxu1 %v14116_v51  ;;  %9809 = vmatpush1.bf16.msra.mxu0 %v14122_v1  ;;  %v14139_v51 = vld [vmem:[#allocation35_spill] sm:$0xff] }
 0x178   :  { %9709 = vmatpush1.bf16.msra.mxu1 %v14120_v28  ;;  %3938 = vmatprep.mubr.f32.mxu1 %v13883_v40  ;;  %v12175_v46 = vpack.c.bf16 %v14162_v55, %v14161_v18  ;;  %14168 = vst [vmem:[#allocation31_spill] sm:$0xff] %v12187_v16  ;;  %v12195_v18 = vsub.f32 %v84_v45, %v4805_v53 }
 0x179   :  { %9711 = vmatprep.subr.bf16.mxu1 %v14121_v26  ;;  %9811 = vmatprep.subr.bf16.mxu0 %v14123_v3 }
 0x17a   :  { %14171 = vst [vmem:[#allocation28_spill] sm:$0xff] %v12195_v18 }
 0x17b   :  { %9813 = vmatpush1.bf16.msra.mxu0 %v14126_v0 }
 0x17c   :  { %9713 = vmatpush1.bf16.msra.mxu1 %v14124_v35  ;;  %9815 = vmatprep.subr.bf16.mxu0 %v14127_v5 }
 0x17d   :  { %9715 = vmatprep.subr.bf16.mxu1 %v14125_v50 }
 0x17f   :  { %9817 = vmatpush1.bf16.msra.mxu0 %v14132_v41 }
 0x180   :  { %9717 = vmatpush1.bf16.msra.mxu1 %v14130_v44  ;;  %9819 = vmatprep.subr.bf16.mxu0 %v9818_v56  ;;  %v9726_v56 = vpack.c.bf16 %v14144_v19, %v14143_v61  ;;  %v111_v61 = vld [vmem:[#allocation5 + $0x148] sm:$0xff]  ;;  %v9730_v19 = vpack.c.bf16 %v14152_v21, %v14151_v22  ;;  %v9734_v22 = vpack.c.bf16 %v14158_v60, %v14157_v47  ;;  %v14159_v21 = vand.u32 4294901760, %v11846_v57  ;;  %v162_v47 = vld [vmem:[#allocation5 + $0x2e0] sm:$0xff] }
 0x181   :  { %9719 = vmatprep.subr.bf16.mxu1 %v14131_v14  ;;  %v5456_v31 = vand.u32 4294901760, %v111_v61  ;;  %v4811_v57 = vand.u32 4294901760, %v135_v62 }
 0x182   :  { %4589 = vmatmul.mubr.f32.vlgmr.msra.gmra.mrb[6].mxu0 %v14142_v54 }
 0x183   :  { %9821 = vmatpush1.bf16.msra.mxu0 %v9820_v25  ;;  %4707 = vmatprep.mubr.f32.mxu0 %v13883_v40  ;;  %v5450_v25 = vand.u32 4294901760, %v87_v8 }
 0x184   :  { %9721 = vmatpush1.bf16.msra.mxu1 %v14139_v51  ;;  %9823 = vmatprep.subr.bf16.mxu0 %v9822_v4  ;;  %v4809_v4 = vand.u32 4294901760, %v109_v33 }
 0x185   :  { %9723 = vmatprep.subr.bf16.mxu1 %v9722_v48  ;;  %v4803_v48 = vand.u32 4294901760, %v85_v42  ;;  %v12189_v39 = vsub.f32 %v87_v8, %v5450_v25  ;;  %v12201_v8 = vsub.f32 %v86_v23, %v5452_v36  ;;  %v4823_v23 = vand.u32 4294901760, %v210_v49 }
 0x186   :  { %v12197_v55 = vsub.f32 %v109_v33, %v4809_v4  ;;  %v12207_v33 = vsub.f32 %v135_v62, %v4811_v57 }
 0x187   :  { %3942 = vmatmul.mubr.f32.vlgmr.msra.gmra.mrb[6].mxu1 %v14142_v54  ;;  %v9828_v54 = vpack.c.bf16 %v14156_v38, %v14155_v6  ;;  %9825 = vmatpush1.bf16.msra.mxu0 %v9824_v43  ;;  %v9832_v6 = vpack.c.bf16 %v14164_v59, %v14163_v34  ;;  %v12181_v38 = vpack.c.bf16 %v4807_v7, %v4803_v48  ;;  %v4815_v43 = vand.u32 4294901760, %v160_v2 }
 0x188   :  { %9725 = vmatpush1.bf16.msra.mxu1 %v9724_v30  ;;  %4060 = vmatprep.mubr.f32.mxu1 %v13883_v40  ;;  %v14160_v30 = vand.u32 4294901760, %v11852_v15  ;;  %v137_v15 = vld [vmem:[#allocation5 + $0x218] sm:$0xff]  ;;  %v12185_v60 = vsub.f32 %v85_v42, %v4803_v48  ;;  %14172 = vst [vmem:[#allocation25_spill] sm:$0xff] %v12197_v55  ;;  %v12199_v34 = vpack.c.bf16 %v5456_v31, %v5452_v36  ;;  %v5462_v59 = vand.u32 4294901760, %v162_v47 }
 0x189   :  { %9727 = vmatprep.subr.bf16.mxu1 %v9726_v56  ;;  %9827 = vmatprep.subr.bf16.mxu0 %v9826_v52  ;;  %14165 = vst [vmem:[#allocation27_spill] sm:$0xff] %v12181_v38  ;;  %v12183_v56 = vpack.c.bf16 %v5454_v17, %v5450_v25  ;;  %v12193_v52 = vsub.f32 %v112_v37, %v5454_v17  ;;  %v161_v42 = vld [vmem:[#allocation5 + $0x2d8] sm:$0xff]  ;;  %v5458_v25 = vand.u32 4294901760, %v137_v15  ;;  %v212_v37 = vld [vmem:[#allocation5 + $0x470] sm:$0xff]  ;;  %v4813_v17 = vand.u32 4294901760, %v134_v58 }
 0x18a   :  { %v9830_v24 = vpack.c.bf16 %v14160_v30, %v14159_v21  ;;  %14167 = vst [vmem:[#allocation32_spill] sm:$0xff] %v12185_v60  ;;  %v12191_v21 = vpack.c.bf16 %v4809_v4, %v4805_v53  ;;  %v136_v30 = vld [vmem:[#allocation5 + $0x210] sm:$0xff]  ;;  %14173 = vst [vmem:[#allocation30_spill] sm:$0xff] %v12199_v34  ;;  %v185_v48 = vld [vmem:[#allocation5 + $0x398] sm:$0xff]  ;;  %v12203_v7 = vsub.f32 %v111_v61, %v5456_v31  ;;  %v4817_v53 = vand.u32 4294901760, %v159_v20 }
 0x18b   :  { %14166 = vst [vmem:[#allocation24_spill] sm:$0xff] %v12183_v56  ;;  %14170 = vst [vmem:[#allocation19_spill] sm:$0xff] %v12193_v52  ;;  %9829 = vmatpush1.bf16.msra.mxu0 %v9828_v54  ;;  %v12205_v45 = vpack.c.bf16 %v4815_v43, %v4811_v57  ;;  %v184_v4 = vld [vmem:[#allocation5 + $0x390] sm:$0xff]  ;;  %v5460_v32 = vand.u32 4294901760, %v136_v30  ;;  %v4819_v54 = vand.u32 4294901760, %v185_v48  ;;  %v12209_v61 = vsub.f32 %v160_v2, %v4815_v43  ;;  %v186_v43 = vld [vmem:[#allocation5 + $0x3a0] sm:$0xff] }
 0x18c   :  { %14169 = vst [vmem:[#allocation37_spill] sm:$0xff] %v12191_v21  ;;  %9729 = vmatpush1.bf16.msra.mxu1 %v9728_v11  ;;  %v187_v11 = vld [vmem:[#allocation5 + $0x3a8] sm:$0xff]  ;;  %9831 = vmatprep.subr.bf16.mxu0 %v9830_v24  ;;  %v209_v21 = vld [vmem:[#allocation5 + $0x458] sm:$0xff]  ;;  %v12211_v36 = vsub.f32 %v137_v15, %v5458_v25  ;;  %v5470_v10 = vand.u32 4294901760, %v212_v37  ;;  %v12213_v24 = vpack.c.bf16 %v5462_v59, %v5458_v25  ;;  %v4821_v57 = vand.u32 4294901760, %v184_v4 }
 0x18d   :  { %9731 = vmatprep.subr.bf16.mxu1 %v9730_v19  ;;  %14174 = vst [vmem:[#allocation21_spill] sm:$0xff] %v12205_v45  ;;  %v5464_v19 = vand.u32 4294901760, %v161_v42  ;;  %v5466_v31 = vand.u32 4294901760, %v187_v11  ;;  %v12215_v62 = vsub.f32 %v162_v47, %v5462_v59  ;;  %v4825_v45 = vand.u32 4294901760, %v209_v21  ;;  %v211_v15 = vld [vmem:[#allocation5 + $0x468] sm:$0xff] }
 0x18e   :  { %14175 = vst [vmem:[#allocation23_spill] sm:$0xff] %v12213_v24  ;;  %v12218_v34 = vpack.c.bf16 %v4817_v53, %v4813_v17  ;;  %v12220_v38 = vsub.f32 %v134_v58, %v4813_v17  ;;  %v12224_v2 = vsub.f32 %v136_v30, %v5460_v32  ;;  %v12230_v47 = vpack.c.bf16 %v4823_v23, %v4819_v54  ;;  %v235_v59 = vld [vmem:[#allocation5 + $0x528] sm:$0xff]  ;;  %v262_v17 = vld [vmem:[#allocation5 + $0x600] sm:$0xff] }
 0x18f   :  { %9833 = vmatpush1.bf16.msra.mxu0 %v9832_v6  ;;  %v12228_v6 = vsub.f32 %v161_v42, %v5464_v19  ;;  %v12232_v25 = vsub.f32 %v185_v48, %v4819_v54  ;;  %v12236_v58 = vsub.f32 %v210_v49, %v4823_v23  ;;  %v12240_v30 = vsub.f32 %v187_v11, %v5466_v31  ;;  %v234_v42 = vld [vmem:[#allocation5 + $0x520] sm:$0xff] }
 0x190   :  { %9733 = vmatpush1.bf16.msra.mxu1 %v9732_v29  ;;  %9835 = vmatprep.subr.bf16.mxu0 %v14115_v13  ;;  %14176 = vst [vmem:[#allocation26_spill] sm:$0xff] %v12218_v34  ;;  %v12222_v29 = vsub.f32 %v159_v20, %v4817_v53  ;;  %14178 = vst [vmem:[#allocation20_spill] sm:$0xff] %v12230_v47  ;;  %v260_v13 = vld [vmem:[#allocation5 + $0x5f0] sm:$0xff]  ;;  %v12238_v20 = vpack.c.bf16 %v5470_v10, %v5466_v31  ;;  %v4827_v54 = vand.u32 4294901760, %v235_v59 }
 0x191   :  { %9735 = vmatprep.subr.bf16.mxu1 %v9734_v22  ;;  %v12226_v22 = vpack.c.bf16 %v5464_v19, %v5460_v32  ;;  %v237_v32 = vld [vmem:[#allocation5 + $0x538] sm:$0xff]  ;;  %v12244_v48 = vsub.f32 %v212_v37, %v5470_v10  ;;  %v12246_v53 = vpack.c.bf16 %v4825_v45, %v4821_v57  ;;  %v5472_v19 = vand.u32 4294901760, %v211_v15  ;;  %v259_v37 = vld [vmem:[#allocation5 + $0x5e8] sm:$0xff] }
 0x192   :  { %4709 = vmatmul.mubr.f32.vlgmr.msra.gmra.mrb[6].mxu0 %v10872_v12  ;;  %14179 = vst [vmem:[#allocation18_spill] sm:$0xff] %v12238_v20  ;;  %v12250_v49 = vsub.f32 %v184_v4, %v4821_v57  ;;  %v12252_v11 = vsub.f32 %v209_v21, %v4825_v45  ;;  %v4831_v23 = vand.u32 4294901760, %v260_v13  ;;  %v5474_v10 = vand.u32 4294901760, %v237_v32  ;;  %v236_v21 = vld [vmem:[#allocation5 + $0x530] sm:$0xff] }
 0x193   :  { %14177 = vst [vmem:[#allocation22_spill] sm:$0xff] %v12226_v22  ;;  %9837 = vmatpush1.bf16.msra.mxu0 %v14118_v27  ;;  %14180 = vst [vmem:[#allocation34_spill] sm:$0xff] %v12246_v53  ;;  %4795 = vmatprep.mubr.f32.mxu0 %v13883_v40  ;;  %v5478_v27 = vand.u32 4294901760, %v262_v17  ;;  %v4829_v31 = vand.u32 4294901760, %v234_v42  ;;  %v4833_v4 = vand.u32 4294901760, %v259_v37 }
 0x194   :  { %9737 = vmatpush1.bf16.msra.mxu1 %v12175_v46  ;;  %v5468_v46 = vand.u32 4294901760, %v186_v43  ;;  %9839 = vmatprep.subr.bf16.mxu0 %v14119_v9  ;;  %14181 = vst [vmem:[#allocation36_spill] sm:$0xff] %v12250_v49  ;;  %14182 = vst [vmem:[#allocation29_spill] sm:$0xff] %v12252_v11  ;;  %v12272_v9 = vpack.c.bf16 %v4831_v23, %v4827_v54  ;;  %v12276_v11 = vsub.f32 %v235_v59, %v4827_v54 }
 0x195   :  { %9739 = vmatprep.subr.bf16.mxu1 %v14117_v63  ;;  %v14190_v59 = vand.u32 4294901760, %v12189_v39  ;;  %v14191_v54 = vand.u32 4294901760, %v12193_v52 }
 0x196   :  { %v12255_v63 = vsub.f32 %v186_v43, %v5468_v46  ;;  %v12265_v57 = vpack.c.bf16 %v5472_v19, %v5468_v46  ;;  %v12267_v43 = vsub.f32 %v211_v15, %v5472_v19  ;;  %14184 = vst [vmem:[#allocation38_spill] sm:$0xff] %v12272_v9  ;;  %14185 = vst [vmem:[#allocation35_spill] sm:$0xff] %v12276_v11  ;;  %v261_v19 = vld [vmem:[#allocation5 + $0x5f8] sm:$0xff] }
 0x197   :  { %4062 = vmatmul.mubr.f32.vlgmr.msra.gmra.mrb[6].mxu1 %v10872_v12  ;;  %9841 = vmatpush1.bf16.msra.mxu0 %v14122_v1  ;;  %v12278_v1 = vsub.f32 %v260_v13, %v4831_v23  ;;  %v12280_v15 = vpack.c.bf16 %v5478_v27, %v5474_v10  ;;  %v12282_v46 = vsub.f32 %v237_v32, %v5474_v10  ;;  %v5476_v23 = vand.u32 4294901760, %v236_v21 }
 0x198   :  { %9741 = vmatpush1.bf16.msra.mxu1 %v14120_v28  ;;  %4148 = vmatprep.mubr.f32.mxu1 %v13883_v40  ;;  %14183 = vst [vmem:[#allocation33_spill] sm:$0xff] %v12265_v57  ;;  %v14189_v28 = vand.u32 4294901760, %v12187_v16  ;;  %v5545_v13 = vsub.f32 %v12189_v39, %v14190_v59  ;;  %v5557_v32 = vsub.f32 %v12193_v52, %v14191_v54  ;;  %v14192_v10 = vand.u32 4294901760, %v12195_v18 }
 0x199   :  { %9743 = vmatprep.subr.bf16.mxu1 %v14121_v26  ;;  %9843 = vmatprep.subr.bf16.mxu0 %v14123_v3  ;;  %14186 = vst [vmem:[#allocation44_spill] sm:$0xff] %v12278_v1  ;;  %14187 = vst [vmem:[#allocation45_spill] sm:$0xff] %v12280_v15  ;;  %v14188_v3 = vand.u32 4294901760, %v12185_v60  ;;  %v12308_v59 = vpack.c.bf16 %v4833_v4, %v4829_v31  ;;  %v5480_v54 = vand.u32 4294901760, %v261_v19 }
 0x19a   :  { %v4910_v45 = vsub.f32 %v12187_v16, %v14189_v28  ;;  %v14193_v28 = vand.u32 4294901760, %v12197_v55  ;;  %v12316_v16 = vsub.f32 %v234_v42, %v4829_v31  ;;  %v5558_v52 = vand.u32 4294901760, %v5557_v32 }
 0x19b   :  { %v4898_v53 = vsub.f32 %v12185_v60, %v14188_v3  ;;  %9845 = vmatpush1.bf16.msra.mxu0 %v14126_v0  ;;  %v4904_v3 = vsub.f32 %v12195_v18, %v14192_v10  ;;  %14194 = vst [vmem:[#allocation46_spill] sm:$0xff] %v12308_v59  ;;  %v12318_v10 = vsub.f32 %v259_v37, %v4833_v4  ;;  %v13733_v18 = vand.u32 4294901760, %v12207_v33 }
 0x19c   :  { %9745 = vmatpush1.bf16.msra.mxu1 %v14124_v35  ;;  %v12299_v35 = vsub.f32 %v262_v17, %v5478_v27  ;;  %v4916_v26 = vsub.f32 %v12197_v55, %v14193_v28  ;;  %9847 = vmatprep.subr.bf16.mxu0 %v14127_v5  ;;  %v14196_v17 = vand.u32 4294901760, %v12203_v7  ;;  %v13732_v28 = vand.u32 4294901760, %v12209_v61 }
 0x19d   :  { %9747 = vmatprep.subr.bf16.mxu1 %v14125_v50  ;;  %v14195_v50 = vand.u32 4294901760, %v12201_v8  ;;  %v4899_v5 = vand.u32 4294901760, %v4898_v53  ;;  %v4911_v55 = vand.u32 4294901760, %v4910_v45  ;;  %v5546_v60 = vand.u32 4294901760, %v5545_v13  ;;  %v14197_v53 = vld [vmem:[#allocation39_spill] sm:$0xff] }
 0x19e   :  { %v5563_v27 = vsub.f32 %v12203_v7, %v14196_v17  ;;  %v4917_v17 = vand.u32 4294901760, %v4916_v26  ;;  %v13735_v42 = vand.u32 4294901760, %v12211_v36  ;;  %v13734_v37 = vand.u32 4294901760, %v12215_v62 }
 0x19f   :  { %v5551_v0 = vsub.f32 %v12201_v8, %v14195_v50  ;;  %9849 = vmatpush1.bf16.msra.mxu0 %v14132_v41  ;;  %v4905_v50 = vand.u32 4294901760, %v4904_v3  ;;  %v12328_v31 = vsub.f32 %v236_v21, %v5476_v23  ;;  %v12331_v45 = vsub.s32 2, %v14197_v53 }
 0x1a0   :  { %9749 = vmatpush1.bf16.msra.mxu1 %v14130_v44  ;;  %9947 = vmatprep.subr.bf16.mxu0 %v12183_v56  ;;  %v5564_v44 = vand.u32 4294901760, %v5563_v27  ;;  %v12333_v13 = vpack.c.bf16 %v5480_v54, %v5476_v23  ;;  %v4934_v41 = vsub.f32 %v12209_v61, %v13732_v28  ;;  %v13739_v26 = vand.u32 4294901760, %v12220_v38  ;;  %v14202_v27 = vld [vmem:[#allocation30_spill] sm:$0xff] }
 0x1a1   :  { %9751 = vmatprep.subr.bf16.mxu1 %v14131_v14  ;;  %v5552_v4 = vand.u32 4294901760, %v5551_v0  ;;  %14198 = vst [vmem:[#allocation47_spill] sm:$0xff] %v12331_v45  ;;  %v4922_v14 = vsub.f32 %v12207_v33, %v13733_v18  ;;  %v12344_v21 = vsub.f32 %v261_v19, %v5480_v54  ;;  %v12346_v32 = vpack.c.bf16 %v4911_v55, %v4899_v5  ;;  %v14201_v0 = vld [vmem:[#allocation27_spill] sm:$0xff]  ;;  %v14203_v19 = vld [vmem:[#allocation41_spill] sm:$0xff] }
 0x1a2   :  { %14199 = vst [vmem:[#allocation48_spill] sm:$0xff] %v12333_v13  ;;  %4797 = vmatmul.mubr.f32.vlgmr.msra.gmra.mrb[6].mxu0 %v10872_v12  ;;  %v12348_v23 = vpack.c.bf16 %v5558_v52, %v5546_v60  ;;  %v12351_v3 = vsub.s32 4, %v14197_v53  ;;  %v12355_v28 = vpack.c.bf16 %v4917_v17, %v4905_v50  ;;  %v5581_v55 = vsub.f32 %v12215_v62, %v13734_v37  ;;  %v14204_v5 = vld [vmem:[#allocation43_spill] sm:$0xff] }
 0x1a3   :  { %9949 = vmatpush1.bf16.msra.mxu0 %v14202_v27  ;;  %5530 = vmatprep.mubr.f32.mxu0 %v13883_v40  ;;  %v12366_v52 = vpack.c.bf16 %v5564_v44, %v5552_v4  ;;  %v12373_v17 = vsub.s32 3, %v14197_v53  ;;  %v12377_v18 = vsub.s32 5, %v14197_v53  ;;  %v4923_v37 = vand.u32 4294901760, %v4922_v14  ;;  %v14207_v44 = vld [vmem:[#allocation37_spill] sm:$0xff] }
 0x1a4   :  { %9753 = vmatpush1.bf16.msra.mxu1 %v14139_v51  ;;  %14200 = vst [vmem:[#allocation49_spill] sm:$0xff] %v12351_v3  ;;  %v5569_v51 = vsub.f32 %v12211_v36, %v13735_v42  ;;  %9951 = vmatprep.subr.bf16.mxu0 %v12213_v24  ;;  %v4935_v42 = vand.u32 4294901760, %v4934_v41  ;;  %v12382_v4 = vsub.f32 %v12220_v38, %v13739_v26  ;;  %v14208_v24 = vld [vmem:[#allocation21_spill] sm:$0xff]  ;;  %v5582_v26 = vand.u32 4294901760, %v5581_v55 }
 0x1a5   :  { %9851 = vmatprep.subr.bf16.mxu1 %v14201_v0  ;;  %14205 = vst [vmem:[#allocation41_spill] sm:$0xff] %v12373_v17  ;;  %14206 = vst [vmem:[#allocation43_spill] sm:$0xff] %v12377_v18  ;;  %v14210_v60 = vand.u32 4294901760, %v12224_v2  ;;  %v14211_v54 = vand.u32 4294901760, %v12228_v6  ;;  %v14213_v55 = vand.u32 4294901760, %v12236_v58 }
 0x1a6   :  { %v5570_v41 = vand.u32 4294901760, %v5569_v51  ;;  %v12408_v14 = vpack.c.bf16 %v4935_v42, %v4923_v37 }
 0x1a7   :  { %4150 = vmatmul.mubr.f32.vlgmr.msra.gmra.mrb[6].mxu1 %v10872_v12  ;;  %9953 = vmatpush1.bf16.msra.mxu0 %v12226_v22  ;;  %v5575_v53 = vsub.f32 %v12224_v2, %v14210_v60  ;;  %v5587_v50 = vsub.f32 %v12228_v6, %v14211_v54  ;;  %v4958_v42 = vsub.f32 %v12236_v58, %v14213_v55  ;;  %v14214_v54 = vand.u32 4294901760, %v12240_v30 }
 0x1a8   :  { %9853 = vmatpush1.bf16.msra.mxu1 %v14207_v44  ;;  %4883 = vmatprep.mubr.f32.mxu1 %v13883_v40  ;;  %v14209_v44 = vand.u32 4294901760, %v12222_v29  ;;  %v9966_v37 = vpack.c.bf16 %v5582_v26, %v5570_v41  ;;  %v14215_v22 = vand.u32 4294901760, %v12244_v48  ;;  %v14219_v41 = vand.u32 4294901760, %v12267_v43 }
 0x1a9   :  { %9855 = vmatprep.subr.bf16.mxu1 %v14208_v24  ;;  %9955 = vmatprep.subr.bf16.mxu0 %v12238_v20  ;;  %v14212_v20 = vand.u32 4294901760, %v12232_v25  ;;  %v5576_v24 = vand.u32 4294901760, %v5575_v53  ;;  %v4959_v56 = vand.u32 4294901760, %v4958_v42  ;;  %v14220_v42 = vand.u32 4294901760, %v12299_v35 }
 0x1aa   :  { %v4940_v27 = vsub.f32 %v12222_v29, %v14209_v44  ;;  %v4929_v44 = vand.u32 4294901760, %v12382_v4  ;;  %v5605_v55 = vsub.f32 %v12244_v48, %v14215_v22  ;;  %v14218_v22 = vand.u32 4294901760, %v12255_v63 }
 0x1ab   :  { %v4946_v51 = vsub.f32 %v12232_v25, %v14212_v20  ;;  %9957 = vmatpush1.bf16.msra.mxu0 %v12265_v57  ;;  %v5593_v20 = vsub.f32 %v12240_v30, %v14214_v54  ;;  %v5588_v54 = vand.u32 4294901760, %v5587_v50 }
 0x1ac   :  { %9857 = vmatpush1.bf16.msra.mxu1 %v12218_v34  ;;  %v4941_v4 = vand.u32 4294901760, %v4940_v27  ;;  %9959 = vmatprep.subr.bf16.mxu0 %v12280_v15  ;;  %v14216_v27 = vld [vmem:[#allocation29_spill] sm:$0xff]  ;;  %v14217_v15 = vld [vmem:[#allocation34_spill] sm:$0xff]  ;;  %v5599_v26 = vsub.f32 %v12255_v63, %v14218_v22  ;;  %v5611_v34 = vsub.f32 %v12267_v43, %v14219_v41  ;;  %v5606_v50 = vand.u32 4294901760, %v5605_v55 }
 0x1ad   :  { %9859 = vmatprep.subr.bf16.mxu1 %v12230_v47  ;;  %v13756_v47 = vand.u32 4294901760, %v12282_v46  ;;  %v4947_v0 = vand.u32 4294901760, %v4946_v51  ;;  %v5594_v53 = vand.u32 4294901760, %v5593_v20  ;;  %v5629_v22 = vsub.f32 %v12299_v35, %v14220_v42 }
 0x1ae   :  { %v14222_v60 = vand.u32 4294901760, %v14216_v27  ;;  %v14224_v55 = vand.u32 4294901760, %v12278_v1  ;;  %v9872_v42 = vpack.c.bf16 %v4941_v4, %v4929_v44 }
 0x1af   :  { %9961 = vmatpush1.bf16.msra.mxu0 %v12333_v13  ;;  %v5617_v51 = vsub.f32 %v12282_v46, %v13756_v47  ;;  %v14221_v13 = vand.u32 4294901760, %v12250_v49  ;;  %v9970_v44 = vpack.c.bf16 %v5606_v50, %v5594_v53 }
 0x1b0   :  { %9861 = vmatpush1.bf16.msra.mxu1 %v14217_v15  ;;  %9963 = vmatprep.subr.bf16.mxu0 %v12348_v23  ;;  %v4964_v57 = vsub.f32 %v14216_v27, %v14222_v60  ;;  %v14223_v23 = vand.u32 4294901760, %v12276_v11  ;;  %v4982_v47 = vsub.f32 %v12278_v1, %v14224_v55  ;;  %v9968_v15 = vpack.c.bf16 %v5588_v54, %v5576_v24 }
 0x1b1   :  { %9863 = vmatprep.subr.bf16.mxu1 %v12272_v9  ;;  %v4952_v41 = vsub.f32 %v12250_v49, %v14221_v13  ;;  %v14225_v9 = vld [vmem:[#allocation17_spill] sm:$0xff]  ;;  %v13767_v13 = vand.u32 4294901760, %v12316_v16  ;;  %v5600_v60 = vand.u32 4294901760, %v5599_v26  ;;  %v9874_v24 = vpack.c.bf16 %v4959_v56, %v4947_v0 }
 0x1b2   :  { %v4970_v20 = vsub.f32 %v12276_v11, %v14223_v23  ;;  %5536 = vmatmul.mubr.f32.vlgmr.msra.gmra.mrb[8].mxu0 %v14225_v9  ;;  %v5612_v23 = vand.u32 4294901760, %v5611_v34  ;;  %v14226_v11 = vand.u32 4294901760, %v12328_v31  ;;  %v5618_v4 = vand.u32 4294901760, %v5617_v51 }
 0x1b3   :  { %9965 = vmatpush1.bf16.msra.mxu0 %v12366_v52  ;;  %v5630_v54 = vand.u32 4294901760, %v5629_v22  ;;  %5686 = vmatprep.mubr.f32.mxu0 %v13883_v40  ;;  %v4953_v52 = vand.u32 4294901760, %v4952_v41  ;;  %v4965_v34 = vand.u32 4294901760, %v4964_v57  ;;  %v4983_v49 = vand.u32 4294901760, %v4982_v47 }
 0x1b4   :  { %9865 = vmatpush1.bf16.msra.mxu1 %v12308_v59  ;;  %v5623_v55 = vsub.f32 %v12328_v31, %v14226_v11  ;;  %v14227_v59 = vand.u32 4294901760, %v12344_v21  ;;  %9967 = vmatprep.subr.bf16.mxu0 %v9966_v37  ;;  %v4971_v26 = vand.u32 4294901760, %v4970_v20  ;;  %v14228_v11 = vrot.slane %v14203_v19, %v12351_v3 }
 0x1b5   :  { %9867 = vmatprep.subr.bf16.mxu1 %v12346_v32  ;;  %v2210_v32 = vpop.f32.mrb[2].mxu0  ;;  %v4976_v56 = vsub.f32 %v12316_v16, %v13767_v13  ;;  %v14229_v0 = vand.u32 4294901760, %v12318_v10  ;;  %v14230_v47 = vrot.slane %v14203_v19, %v12377_v18  ;;  %v14231_v41 = vrot.slane %v14204_v5, %v12351_v3  ;;  %v116_v3 = vld [vmem:[#allocation5 + $0x170] sm:$0xff] }
 0x1b6   :  { %v5635_v1 = vsub.f32 %v12344_v21, %v14227_v59  ;;  %v8712_v59 = vsub.f32 %v2210_v32, %v14228_v11  ;;  %v2212_v37 = vpop.f32.mrb[3].mxu0  ;;  %v5624_v50 = vand.u32 4294901760, %v5623_v55  ;;  %v8756_v32 = vrot.slane %v14204_v5, %v12373_v17 }
 0x1b7   :  { %4889 = vmatmul.mubr.f32.vlgmr.msra.gmra.mrb[8].mxu1 %v14225_v9  ;;  %v4988_v53 = vsub.f32 %v12318_v10, %v14229_v0  ;;  %v8713_v57 = vsub.f32 %v2212_v37, %v14230_v47  ;;  %9969 = vmatpush1.bf16.msra.mxu0 %v9968_v15  ;;  %v9974_v11 = vpack.c.bf16 %v5630_v54, %v5618_v4  ;;  %v4977_v13 = vand.u32 4294901760, %v4976_v56  ;;  %v213_v9 = vld [vmem:[#allocation5 + $0x478] sm:$0xff] }
 0x1b8   :  { %9869 = vmatpush1.bf16.msra.mxu1 %v12355_v28  ;;  %5039 = vmatprep.mubr.f32.mxu1 %v13883_v40  ;;  %v9972_v28 = vpack.c.bf16 %v5612_v23, %v5600_v60  ;;  %v5636_v51 = vand.u32 4294901760, %v5635_v1  ;;  %v8870_v20 = vmul.f32 %v14231_v41, %v8712_v59  ;;  %v14232_v0 = vrot.slane %v14203_v19, %v12331_v45 }
 0x1b9   :  { %9871 = vmatprep.subr.bf16.mxu1 %v12408_v14  ;;  %9971 = vmatprep.subr.bf16.mxu0 %v9970_v44  ;;  %v14233_v15 = vrot.slane %v14204_v5, %v12377_v18  ;;  %v9876_v1 = vpack.c.bf16 %v4965_v34, %v4953_v52  ;;  %v9878_v60 = vpack.c.bf16 %v4983_v49, %v4971_v26  ;;  %v4989_v44 = vand.u32 4294901760, %v4988_v53  ;;  %v14236_v49 = vld [vmem:[#allocation19_spill] sm:$0xff] }
 0x1ba   :  { %v1563_v22 = vpop.f32.mrb[2].mxu1  ;;  %v8895_v23 = vmul.f32 %v8870_v20, %v8712_v59  ;;  %v14234_v55 = vrot.slane %v14203_v19, %v12373_v17  ;;  %v14235_v4 = vrot.slane %v14204_v5, %v12331_v45  ;;  %v9978_v52 = vpack.c.bf16 %v14236_v49, %v12189_v39  ;;  %v14237_v5 = vld [vmem:[#allocation32_spill] sm:$0xff]  ;;  %v88_v45 = vld [vmem:[#allocation5 + $0x90] sm:$0xff] }
 0x1bb   :  { %v8710_v37 = vsub.f32 %v1563_v22, %v14232_v0  ;;  %v1565_v47 = vpop.f32.mrb[3].mxu1  ;;  %v8871_v14 = vmul.f32 %v14233_v15, %v8713_v57  ;;  %9973 = vmatpush1.bf16.msra.mxu0 %v9972_v28  ;;  %v9976_v0 = vpack.c.bf16 %v5636_v51, %v5624_v50  ;;  %v9880_v26 = vpack.c.bf16 %v4989_v44, %v4977_v13  ;;  %v14240_v13 = vld [vmem:[#allocation25_spill] sm:$0xff]  ;;  %v14242_v44 = vld [vmem:[#allocation35_spill] sm:$0xff] }
 0x1bc   :  { %v8711_v41 = vsub.f32 %v1565_v47, %v14234_v55  ;;  %9873 = vmatpush1.bf16.msra.mxu1 %v9872_v42  ;;  %v8924_v18 = vmul.f32 1.442695, %v8895_v23  ;;  %9975 = vmatprep.subr.bf16.mxu0 %v9974_v11  ;;  %v9980_v53 = vpack.c.bf16 %v12203_v7, %v12201_v8  ;;  %v9982_v28 = vpack.c.bf16 %v12215_v62, %v12211_v36  ;;  %v14241_v23 = vld [vmem:[#allocation36_spill] sm:$0xff] }
 0x1bd   :  { %v8868_v54 = vmul.f32 %v14235_v4, %v8710_v37  ;;  %v8896_v22 = vmul.f32 %v8871_v14, %v8713_v57  ;;  %9875 = vmatprep.subr.bf16.mxu1 %v9874_v24  ;;  %v14238_v24 = vld [vmem:[#allocation31_spill] sm:$0xff]  ;;  %v9886_v51 = vpack.c.bf16 %v12209_v61, %v12207_v33  ;;  %v9984_v20 = vpack.c.bf16 %v12228_v6, %v12224_v2  ;;  %v14243_v4 = vld [vmem:[#allocation44_spill] sm:$0xff] }
 0x1be   :  { %v8869_v15 = vmul.f32 %v8756_v32, %v8711_v41  ;;  %10546 = vpow2.f32 %v8924_v18  ;;  %v9882_v56 = vpack.c.bf16 %v14238_v24, %v14237_v5  ;;  %v14239_v18 = vld [vmem:[#allocation28_spill] sm:$0xff]  ;;  %v9986_v32 = vpack.c.bf16 %v12244_v48, %v12240_v30 }
 0x1bf   :  { %v8893_v34 = vmul.f32 %v8868_v54, %v8710_v37  ;;  %v8926_v19 = vmul.f32 1.442695, %v8896_v22  ;;  %9977 = vmatpush1.bf16.msra.mxu0 %v9976_v0  ;;  %v9884_v50 = vpack.c.bf16 %v14240_v13, %v14239_v18  ;;  %v9888_v11 = vpack.c.bf16 %v12222_v29, %v12220_v38  ;;  %v91_v17 = vld [vmem:[#allocation5 + $0xa8] sm:$0xff] }
 0x1c0   :  { %v8894_v42 = vmul.f32 %v8869_v15, %v8711_v41  ;;  %9877 = vmatpush1.bf16.msra.mxu1 %v9876_v1  ;;  %9979 = vmatprep.subr.bf16.mxu0 %v9978_v52  ;;  %v9890_v37 = vpack.c.bf16 %v12236_v58, %v12232_v25  ;;  %v9988_v47 = vpack.c.bf16 %v12267_v43, %v12255_v63  ;;  %v14244_v52 = vld [vmem:[#allocation24_spill] sm:$0xff] }
 0x1c1   :  { %v8920_v59 = vmul.f32 1.442695, %v8893_v34  ;;  %10548 = vpow2.f32 %v8926_v19  ;;  %9879 = vmatprep.subr.bf16.mxu1 %v9878_v60  ;;  %v9990_v1 = vpack.c.bf16 %v12299_v35, %v12282_v46  ;;  %v9892_v55 = vpack.c.bf16 %v14216_v27, %v14241_v23  ;;  %v14245_v34 = vld [vmem:[#allocation15_spill] sm:$0xff] }
 0x1c2   :  { %v8922_v57 = vmul.f32 1.442695, %v8894_v42  ;;  %5688 = vmatmul.mubr.f32.vlgmr.msra.gmra.mrb[8].mxu0 %v10872_v12  ;;  %v9894_v54 = vpack.c.bf16 %v14243_v4, %v14242_v44  ;;  %v9992_v22 = vpack.c.bf16 %v12344_v21, %v12328_v31  ;;  %v9896_v15 = vpack.c.bf16 %v12318_v10, %v12316_v16  ;;  %v14246_v19 = vld [vmem:[#allocation27_spill] sm:$0xff]  ;;  %v14247_v42 = vld [vmem:[#allocation30_spill] sm:$0xff] }
 0x1c3   :  { %10550 = vpow2.f32 %v8920_v59  ;;  %9981 = vmatpush1.bf16.msra.mxu0 %v9980_v53  ;;  %5790 = vmatprep.mubr.f32.mxu0 %v13883_v40  ;;  %v14249_v59 = vld [vmem:[#allocation37_spill] sm:$0xff]  ;;  %v14251_v53 = vld [vmem:[#allocation22_spill] sm:$0xff] }
 0x1c4   :  { %10552 = vpow2.f32 %v8922_v57  ;;  %9881 = vmatpush1.bf16.msra.mxu1 %v9880_v26  ;;  %9983 = vmatprep.subr.bf16.mxu0 %v9982_v28  ;;  %v14248_v26 = vld [vmem:[#allocation23_spill] sm:$0xff]  ;;  %v14252_v57 = vld [vmem:[#allocation18_spill] sm:$0xff] }
 0x1c5   :  { %9883 = vmatprep.subr.bf16.mxu1 %v9882_v56  ;;  %v14250_v56 = vld [vmem:[#allocation21_spill] sm:$0xff]  ;;  %v14253_v28 = vld [vmem:[#allocation26_spill] sm:$0xff] }
 0x1c7   :  { %5041 = vmatmul.mubr.f32.vlgmr.msra.gmra.mrb[8].mxu1 %v10872_v12  ;;  %9985 = vmatpush1.bf16.msra.mxu0 %v9984_v20  ;;  %v14256_v20 = vld [vmem:[#allocation45_spill] sm:$0xff] }
 0x1c8   :  { %9885 = vmatpush1.bf16.msra.mxu1 %v9884_v50  ;;  %5143 = vmatprep.mubr.f32.mxu1 %v13883_v40  ;;  %v10547_v14 = vpop.eup %10546  ;;  %v14254_v50 = vld [vmem:[#allocation20_spill] sm:$0xff] }
 0x1c9   :  { %9887 = vmatprep.subr.bf16.mxu1 %v9886_v51  ;;  %9987 = vmatprep.subr.bf16.mxu0 %v9986_v32  ;;  %8970 = vst [vmem:[#allocation10 + $0x20] sm:$0xff] %v10547_v14  ;;  %v14255_v51 = vld [vmem:[#allocation33_spill] sm:$0xff]  ;;  %v14257_v32 = vand.u32 4294901760, %v12189_v39  ;;  %v14260_v14 = vld [vmem:[#allocation38_spill] sm:$0xff]  ;;  %v14266_v39 = vand.u32 4294901760, %v12211_v36  ;;  %v14272_v36 = vand.u32 4294901760, %v12207_v33 }
 0x1ca   :  { %v6744_v33 = vand.u32 4294901760, %v91_v17 }
 0x1cb   :  { %v10549_v60 = vpop.eup %10548  ;;  %9989 = vmatpush1.bf16.msra.mxu0 %v9988_v47  ;;  %v14259_v47 = vld [vmem:[#allocation34_spill] sm:$0xff] }
 0x1cc   :  { %8971 = vst [vmem:[#allocation10 + $0x28] sm:$0xff] %v10549_v60  ;;  %9889 = vmatpush1.bf16.msra.mxu1 %v9888_v11  ;;  %9991 = vmatprep.subr.bf16.mxu0 %v9990_v1  ;;  %v14258_v11 = vand.u32 4294901760, %v14236_v49  ;;  %v14261_v1 = vld [vmem:[#allocation48_spill] sm:$0xff]  ;;  %v14262_v60 = vand.u32 4294901760, %v14237_v5  ;;  %v14267_v49 = vand.u32 4294901760, %v12215_v62  ;;  %v113_v5 = vld [vmem:[#allocation5 + $0x158] sm:$0xff] }
 0x1cd   :  { %v10551_v41 = vpop.eup %10550  ;;  %9891 = vmatprep.subr.bf16.mxu1 %v9890_v37  ;;  %v14273_v62 = vand.u32 4294901760, %v12209_v61  ;;  %v6748_v61 = vand.u32 4294901760, %v116_v3 }
 0x1ce   :  { %v10553_v0 = vpop.eup %10552  ;;  %8968 = vst [vmem:[#allocation10 + $0x10] sm:$0xff] %v10551_v41  ;;  %v10010_v37 = vpack.c.bf16 %v14258_v11, %v14257_v32  ;;  %v89_v32 = vld [vmem:[#allocation5 + $0x98] sm:$0xff]  ;;  %v114_v11 = vld [vmem:[#allocation5 + $0x160] sm:$0xff] }
 0x1cf   :  { %8969 = vst [vmem:[#allocation10 + $0x18] sm:$0xff] %v10553_v0  ;;  %9993 = vmatpush1.bf16.msra.mxu0 %v9992_v22  ;;  %v14265_v22 = vand.u32 4294901760, %v12203_v7 }
 0x1d0   :  { %9893 = vmatpush1.bf16.msra.mxu1 %v9892_v55  ;;  %9995 = vmatprep.subr.bf16.mxu0 %v14244_v52  ;;  %v14263_v55 = vand.u32 4294901760, %v14238_v24  ;;  %v14269_v24 = vand.u32 4294901760, %v14239_v18  ;;  %v14277_v18 = vand.u32 4294901760, %v12244_v48  ;;  %v14281_v48 = vand.u32 4294901760, %v12236_v58 }
 0x1d1   :  { %9895 = vmatprep.subr.bf16.mxu1 %v9894_v54  ;;  %v14264_v54 = vand.u32 4294901760, %v12201_v8  ;;  %v14270_v8 = vand.u32 4294901760, %v14240_v13  ;;  %v14288_v58 = vand.u32 4294901760, %v12282_v46 }
 0x1d2   :  { %5793 = vmatmul.mubr.f32.vlgmr.msra.gmra.mrb[8].mxu0 %v14245_v34  ;;  %v9914_v41 = vpack.c.bf16 %v14263_v55, %v14262_v60  ;;  %v14271_v60 = vld [vmem:[#allocation16_spill] sm:$0xff]  ;;  %v14274_v55 = vand.u32 4294901760, %v12224_v2  ;;  %v14278_v2 = vand.u32 4294901760, %v12220_v38  ;;  %v14285_v38 = vand.u32 4294901760, %v12267_v43 }
 0x1d3   :  { %9997 = vmatpush1.bf16.msra.mxu0 %v14247_v42  ;;  %5879 = vmatprep.mubr.f32.mxu0 %v13883_v40  ;;  %v10012_v0 = vpack.c.bf16 %v14265_v22, %v14264_v54  ;;  %v9916_v7 = vpack.c.bf16 %v14270_v8, %v14269_v24  ;;  %v14275_v54 = vand.u32 4294901760, %v12228_v6  ;;  %v6101_v24 = vand.u32 4294901760, %v114_v11 }
 0x1d4   :  { %9897 = vmatpush1.bf16.msra.mxu1 %v9896_v15  ;;  %9999 = vmatprep.subr.bf16.mxu0 %v14248_v26  ;;  %v10014_v15 = vpack.c.bf16 %v14267_v49, %v14266_v39  ;;  %v14276_v39 = vand.u32 4294901760, %v12240_v30  ;;  %v6097_v49 = vand.u32 4294901760, %v89_v32  ;;  %v6099_v8 = vand.u32 4294901760, %v88_v45 }
 0x1d5   :  { %9899 = vmatprep.subr.bf16.mxu1 %v14246_v19  ;;  %v10016_v22 = vpack.c.bf16 %v14275_v54, %v14274_v55  ;;  %v14279_v6 = vand.u32 4294901760, %v12222_v29  ;;  %v14280_v30 = vand.u32 4294901760, %v12232_v25  ;;  %v90_v54 = vld [vmem:[#allocation5 + $0xa0] sm:$0xff]  ;;  %v14286_v29 = vand.u32 4294901760, %v14242_v44 }
 0x1d6   :  { %v10018_v13 = vpack.c.bf16 %v14277_v18, %v14276_v39  ;;  %v115_v39 = vld [vmem:[#allocation5 + $0x168] sm:$0xff]  ;;  %v14284_v18 = vand.u32 4294901760, %v12255_v63  ;;  %v14287_v25 = vand.u32 4294901760, %v14243_v4  ;;  %v14290_v63 = vand.u32 4294901760, %v12316_v16 }
 0x1d7   :  { %5146 = vmatmul.mubr.f32.vlgmr.msra.gmra.mrb[8].mxu1 %v14245_v34  ;;  %10001 = vmatpush1.bf16.msra.mxu0 %v14251_v53  ;;  %v14268_v34 = vld [vmem:[#allocation46_spill] sm:$0xff]  ;;  %v14291_v43 = vand.u32 4294901760, %v12318_v10  ;;  %v14292_v44 = vand.u32 4294901760, %v12328_v31  ;;  %v14293_v4 = vand.u32 4294901760, %v12344_v21  ;;  %v6750_v16 = vand.u32 4294901760, %v115_v39  ;;  %v163_v10 = vld [vmem:[#allocation5 + $0x2e8] sm:$0xff] }
 0x1d8   :  { %9901 = vmatpush1.bf16.msra.mxu1 %v14249_v59  ;;  %5232 = vmatprep.mubr.f32.mxu1 %v13883_v40 }
 0x1d9   :  { %9903 = vmatprep.subr.bf16.mxu1 %v14250_v56  ;;  %10003 = vmatprep.subr.bf16.mxu0 %v14252_v57  ;;  %v10024_v46 = vpack.c.bf16 %v14293_v4, %v14292_v44  ;;  %v12657_v44 = vsub.f32 %v88_v45, %v6099_v8 }
 0x1db   :  { %10005 = vmatpush1.bf16.msra.mxu0 %v14255_v51 }
 0x1dc   :  { %9905 = vmatpush1.bf16.msra.mxu1 %v14253_v28  ;;  %10007 = vmatprep.subr.bf16.mxu0 %v14256_v20 }
 0x1dd   :  { %9907 = vmatprep.subr.bf16.mxu1 %v14254_v50 }
 0x1df   :  { %10009 = vmatpush1.bf16.msra.mxu0 %v14261_v1 }
 0x1e0   :  { %9909 = vmatpush1.bf16.msra.mxu1 %v14259_v47  ;;  %10011 = vmatprep.subr.bf16.mxu0 %v10010_v37  ;;  %v9918_v37 = vpack.c.bf16 %v14273_v62, %v14272_v36  ;;  %v9922_v36 = vpack.c.bf16 %v14281_v48, %v14280_v30  ;;  %v14283_v62 = vand.u32 4294901760, %v14216_v27  ;;  %v139_v27 = vld [vmem:[#allocation5 + $0x228] sm:$0xff]  ;;  %v164_v30 = vld [vmem:[#allocation5 + $0x2f0] sm:$0xff]  ;;  %v12643_v48 = vpack.c.bf16 %v6101_v24, %v6097_v49 }
 0x1e1   :  { %9911 = vmatprep.subr.bf16.mxu1 %v14260_v14  ;;  %v6105_v31 = vand.u32 4294901760, %v139_v27  ;;  %v6109_v21 = vand.u32 4294901760, %v164_v30 }
 0x1e2   :  { %5883 = vmatmul.mubr.f32.vlgmr.msra.gmra.mrb[8].mxu0 %v14271_v60  ;;  %14294 = vst [vmem:[#allocation29_spill] sm:$0xff] %v12643_v48 }
 0x1e3   :  { %10013 = vmatpush1.bf16.msra.mxu0 %v10012_v0  ;;  %6001 = vmatprep.mubr.f32.mxu0 %v13883_v40  ;;  %v9920_v0 = vpack.c.bf16 %v14279_v6, %v14278_v2  ;;  %v9926_v2 = vpack.c.bf16 %v14287_v25, %v14286_v29  ;;  %v12651_v29 = vsub.f32 %v114_v11, %v6101_v24  ;;  %v6111_v11 = vand.u32 4294901760, %v163_v10  ;;  %v214_v24 = vld [vmem:[#allocation5 + $0x480] sm:$0xff] }
 0x1e4   :  { %9913 = vmatpush1.bf16.msra.mxu1 %v14268_v34  ;;  %10015 = vmatprep.subr.bf16.mxu0 %v10014_v15  ;;  %v14282_v15 = vand.u32 4294901760, %v14241_v23  ;;  %v14289_v23 = vand.u32 4294901760, %v12299_v35  ;;  %v141_v35 = vld [vmem:[#allocation5 + $0x238] sm:$0xff]  ;;  %v12653_v25 = vsub.f32 %v91_v17, %v6744_v33  ;;  %v12671_v45 = vsub.f32 %v164_v30, %v6109_v21 }
 0x1e5   :  { %9915 = vmatprep.subr.bf16.mxu1 %v9914_v41  ;;  %v6103_v41 = vand.u32 4294901760, %v113_v5  ;;  %14298 = vst [vmem:[#allocation28_spill] sm:$0xff] %v12651_v29 }
 0x1e6   :  { %v9924_v55 = vpack.c.bf16 %v14283_v62, %v14282_v15  ;;  %v10022_v6 = vpack.c.bf16 %v14289_v23, %v14288_v58  ;;  %v166_v15 = vld [vmem:[#allocation5 + $0x300] sm:$0xff]  ;;  %v12645_v62 = vpack.c.bf16 %v6748_v61, %v6744_v33  ;;  %v12655_v58 = vsub.f32 %v116_v3, %v6748_v61  ;;  %v191_v61 = vld [vmem:[#allocation5 + $0x3c8] sm:$0xff]  ;;  %14302 = vst [vmem:[#allocation44_spill] sm:$0xff] %v12671_v45 }
 0x1e7   :  { %5236 = vmatmul.mubr.f32.vlgmr.msra.gmra.mrb[8].mxu1 %v14271_v60  ;;  %v10020_v60 = vpack.c.bf16 %v14285_v38, %v14284_v18  ;;  %10017 = vmatpush1.bf16.msra.mxu0 %v10016_v22  ;;  %v6746_v22 = vand.u32 4294901760, %v90_v54  ;;  %v138_v18 = vld [vmem:[#allocation5 + $0x220] sm:$0xff]  ;;  %v12649_v38 = vsub.f32 %v89_v32, %v6097_v49  ;;  %v6756_v23 = vand.u32 4294901760, %v166_v15  ;;  %v189_v49 = vld [vmem:[#allocation5 + $0x3b8] sm:$0xff] }
 0x1e8   :  { %9917 = vmatpush1.bf16.msra.mxu1 %v9916_v7  ;;  %5354 = vmatprep.mubr.f32.mxu1 %v13883_v40  ;;  %v12637_v7 = vpack.c.bf16 %v14291_v43, %v14290_v63  ;;  %14295 = vst [vmem:[#allocation19_spill] sm:$0xff] %v12645_v62  ;;  %v140_v63 = vld [vmem:[#allocation5 + $0x230] sm:$0xff]  ;;  %v165_v43 = vld [vmem:[#allocation5 + $0x2f8] sm:$0xff]  ;;  %v12659_v4 = vsub.f32 %v113_v5, %v6103_v41  ;;  %v6107_v32 = vand.u32 4294901760, %v138_v18 }
 0x1e9   :  { %9919 = vmatprep.subr.bf16.mxu1 %v9918_v37  ;;  %10019 = vmatprep.subr.bf16.mxu0 %v10018_v13  ;;  %v12647_v37 = vpack.c.bf16 %v6103_v41, %v6099_v8  ;;  %14297 = vst [vmem:[#allocation31_spill] sm:$0xff] %v12649_v38  ;;  %v6752_v13 = vand.u32 4294901760, %v141_v35  ;;  %v12663_v17 = vsub.f32 %v90_v54, %v6746_v22  ;;  %v6754_v5 = vand.u32 4294901760, %v140_v63  ;;  %v188_v41 = vld [vmem:[#allocation5 + $0x3b0] sm:$0xff] }
 0x1ea   :  { %v12665_v3 = vsub.f32 %v115_v39, %v6750_v16  ;;  %v12667_v33 = vsub.f32 %v139_v27, %v6105_v31  ;;  %v6758_v8 = vand.u32 4294901760, %v165_v43  ;;  %v6113_v54 = vand.u32 4294901760, %v189_v49 }
 0x1eb   :  { %14296 = vst [vmem:[#allocation32_spill] sm:$0xff] %v12647_v37  ;;  %10021 = vmatpush1.bf16.msra.mxu0 %v10020_v60  ;;  %v12669_v60 = vpack.c.bf16 %v6109_v21, %v6105_v31  ;;  %v12675_v37 = vsub.f32 %v141_v35, %v6752_v13  ;;  %v6117_v39 = vand.u32 4294901760, %v214_v24  ;;  %v12677_v27 = vsub.f32 %v166_v15, %v6756_v23  ;;  %v190_v31 = vld [vmem:[#allocation5 + $0x3c0] sm:$0xff]  ;;  %v215_v21 = vld [vmem:[#allocation5 + $0x488] sm:$0xff] }
 0x1ec   :  { %9921 = vmatpush1.bf16.msra.mxu1 %v9920_v0  ;;  %10023 = vmatprep.subr.bf16.mxu0 %v10022_v6  ;;  %v12661_v0 = vpack.c.bf16 %v6750_v16, %v6746_v22  ;;  %14300 = vst [vmem:[#allocation36_spill] sm:$0xff] %v12667_v33  ;;  %v12673_v6 = vpack.c.bf16 %v6756_v23, %v6752_v13  ;;  %v6760_v16 = vand.u32 4294901760, %v191_v61  ;;  %v6115_v35 = vand.u32 4294901760, %v188_v41  ;;  %v239_v23 = vld [vmem:[#allocation5 + $0x548] sm:$0xff] }
 0x1ed   :  { %9923 = vmatprep.subr.bf16.mxu1 %v9922_v36  ;;  %v216_v36 = vld [vmem:[#allocation5 + $0x490] sm:$0xff]  ;;  %14301 = vst [vmem:[#allocation35_spill] sm:$0xff] %v12669_v60  ;;  %v12679_v22 = vpack.c.bf16 %v6111_v11, %v6107_v32  ;;  %v12682_v60 = vsub.f32 %v138_v18, %v6107_v32  ;;  %v6119_v13 = vand.u32 4294901760, %v213_v9  ;;  %v12692_v15 = vsub.f32 %v189_v49, %v6113_v54  ;;  %v241_v49 = vld [vmem:[#allocation5 + $0x558] sm:$0xff] }
 0x1ee   :  { %14299 = vst [vmem:[#allocation25_spill] sm:$0xff] %v12661_v0  ;;  %14303 = vst [vmem:[#allocation24_spill] sm:$0xff] %v12673_v6  ;;  %v6764_v30 = vand.u32 4294901760, %v216_v36  ;;  %v12686_v6 = vpack.c.bf16 %v6758_v8, %v6754_v5  ;;  %v12698_v18 = vsub.f32 %v214_v24, %v6117_v39  ;;  %v6766_v32 = vand.u32 4294901760, %v215_v21 }
 0x1ef   :  { %10025 = vmatpush1.bf16.msra.mxu0 %v10024_v46  ;;  %14304 = vst [vmem:[#allocation27_spill] sm:$0xff] %v12679_v22  ;;  %14305 = vst [vmem:[#allocation30_spill] sm:$0xff] %v12682_v60  ;;  %v12690_v46 = vsub.f32 %v165_v43, %v6758_v8  ;;  %v264_v22 = vld [vmem:[#allocation5 + $0x610] sm:$0xff]  ;;  %v12704_v43 = vsub.f32 %v191_v61, %v6760_v16  ;;  %v12710_v24 = vpack.c.bf16 %v6119_v13, %v6115_v35 }
 0x1f0   :  { %9925 = vmatpush1.bf16.msra.mxu1 %v9924_v55  ;;  %10027 = vmatprep.subr.bf16.mxu0 %v14244_v52  ;;  %v12684_v55 = vsub.f32 %v163_v10, %v6111_v11  ;;  %14306 = vst [vmem:[#allocation23_spill] sm:$0xff] %v12686_v6  ;;  %14307 = vst [vmem:[#allocation37_spill] sm:$0xff] %v12692_v15  ;;  %v12696_v52 = vpack.c.bf16 %v6117_v39, %v6113_v54  ;;  %v6762_v10 = vand.u32 4294901760, %v190_v31  ;;  %v240_v39 = vld [vmem:[#allocation5 + $0x550] sm:$0xff] }
 0x1f1   :  { %9927 = vmatprep.subr.bf16.mxu1 %v9926_v2  ;;  %v12688_v2 = vsub.f32 %v140_v63, %v6754_v5  ;;  %14309 = vst [vmem:[#allocation22_spill] sm:$0xff] %v12698_v18  ;;  %v12702_v63 = vpack.c.bf16 %v6764_v30, %v6760_v16  ;;  %v12706_v11 = vsub.f32 %v216_v36, %v6764_v30  ;;  %v238_v5 = vld [vmem:[#allocation5 + $0x540] sm:$0xff]  ;;  %14311 = vst [vmem:[#allocation26_spill] sm:$0xff] %v12710_v24 }
 0x1f2   :  { %6003 = vmatmul.mubr.f32.vlgmr.msra.gmra.mrb[8].mxu0 %v10872_v12  ;;  %14308 = vst [vmem:[#allocation21_spill] sm:$0xff] %v12696_v52  ;;  %v12712_v8 = vsub.f32 %v188_v41, %v6115_v35  ;;  %v6125_v54 = vand.u32 4294901760, %v264_v22  ;;  %v12715_v61 = vsub.f32 %v213_v9, %v6119_v13  ;;  %v12717_v36 = vsub.f32 %v190_v31, %v6762_v10 }
 0x1f3   :  { %10029 = vmatpush1.bf16.msra.mxu0 %v14247_v42  ;;  %14310 = vst [vmem:[#allocation18_spill] sm:$0xff] %v12702_v63  ;;  %6089 = vmatprep.mubr.f32.mxu0 %v13883_v40  ;;  %v263_v42 = vld [vmem:[#allocation5 + $0x608] sm:$0xff]  ;;  %v6768_v41 = vand.u32 4294901760, %v241_v49  ;;  %v6123_v35 = vand.u32 4294901760, %v238_v5  ;;  %v12727_v9 = vsub.f32 %v215_v21, %v6766_v32  ;;  %v13789_v24 = vand.u32 4294901760, %v12657_v44 }
 0x1f4   :  { %9929 = vmatpush1.bf16.msra.mxu1 %v12637_v7  ;;  %v266_v7 = vld [vmem:[#allocation5 + $0x620] sm:$0xff]  ;;  %10031 = vmatprep.subr.bf16.mxu0 %v14248_v26  ;;  %14312 = vst [vmem:[#allocation20_spill] sm:$0xff] %v12712_v8  ;;  %14313 = vst [vmem:[#allocation33_spill] sm:$0xff] %v12715_v61  ;;  %v12723_v26 = vpack.c.bf16 %v6766_v32, %v6762_v10  ;;  %v6127_v31 = vand.u32 4294901760, %v263_v42  ;;  %v12738_v61 = vsub.f32 %v264_v22, %v6125_v54 }
 0x1f5   :  { %9931 = vmatprep.subr.bf16.mxu1 %v14246_v19  ;;  %v6121_v19 = vand.u32 4294901760, %v239_v23  ;;  %v6772_v30 = vand.u32 4294901760, %v266_v7  ;;  %v14317_v21 = vand.u32 4294901760, %v12649_v38  ;;  %v14318_v16 = vand.u32 4294901760, %v12651_v29 }
 0x1f6   :  { %14314 = vst [vmem:[#allocation45_spill] sm:$0xff] %v12723_v26  ;;  %v12774_v22 = vsub.f32 %v263_v42, %v6127_v31 }
 0x1f7   :  { %5356 = vmatmul.mubr.f32.vlgmr.msra.gmra.mrb[8].mxu1 %v10872_v12  ;;  %10033 = vmatpush1.bf16.msra.mxu0 %v14251_v53  ;;  %v12734_v10 = vsub.f32 %v239_v23, %v6121_v19  ;;  %v265_v53 = vld [vmem:[#allocation5 + $0x618] sm:$0xff]  ;;  %v6192_v32 = vsub.f32 %v12649_v38, %v14317_v21  ;;  %v12748_v23 = vpack.c.bf16 %v6772_v30, %v6768_v41  ;;  %v6770_v21 = vand.u32 4294901760, %v240_v39 }
 0x1f8   :  { %9933 = vmatpush1.bf16.msra.mxu1 %v14249_v59  ;;  %5442 = vmatprep.mubr.f32.mxu1 %v13883_v40  ;;  %v12732_v59 = vpack.c.bf16 %v6125_v54, %v6121_v19  ;;  %v12750_v19 = vsub.f32 %v241_v49, %v6768_v41  ;;  %v12757_v54 = vpack.c.bf16 %v6127_v31, %v6123_v35  ;;  %v6774_v41 = vand.u32 4294901760, %v265_v53 }
 0x1f9   :  { %9935 = vmatprep.subr.bf16.mxu1 %v14250_v56  ;;  %10035 = vmatprep.subr.bf16.mxu0 %v14252_v57  ;;  %14316 = vst [vmem:[#allocation38_spill] sm:$0xff] %v12734_v10  ;;  %v6204_v57 = vsub.f32 %v12651_v29, %v14318_v16  ;;  %14319 = vst [vmem:[#allocation48_spill] sm:$0xff] %v12748_v23  ;;  %v12752_v56 = vsub.f32 %v266_v7, %v6772_v30  ;;  %v14321_v16 = vand.u32 4294901760, %v12653_v25 }
 0x1fa   :  { %14315 = vst [vmem:[#allocation34_spill] sm:$0xff] %v12732_v59  ;;  %14320 = vst [vmem:[#allocation46_spill] sm:$0xff] %v12757_v54  ;;  %v12766_v7 = vsub.f32 %v238_v5, %v6123_v35  ;;  %v14324_v38 = vand.u32 4294901760, %v12663_v17  ;;  %v14325_v5 = vand.u32 4294901760, %v12665_v3 }
 0x1fb   :  { %10037 = vmatpush1.bf16.msra.mxu0 %v14255_v51  ;;  %v6839_v13 = vsub.f32 %v12653_v25, %v14321_v16  ;;  %v14323_v51 = vand.u32 4294901760, %v12659_v4  ;;  %v6193_v16 = vand.u32 4294901760, %v6192_v32  ;;  %v6205_v29 = vand.u32 4294901760, %v6204_v57  ;;  %v12789_v32 = vld [vmem:[#allocation7 + $0x8] sm:$0xff] }
 0x1fc   :  { %9937 = vmatpush1.bf16.msra.mxu1 %v14253_v28  ;;  %v14322_v28 = vand.u32 4294901760, %v12655_v58  ;;  %10039 = vmatprep.subr.bf16.mxu0 %v14256_v20  ;;  %v12780_v20 = vsub.f32 %v240_v39, %v6770_v21  ;;  %v6857_v35 = vsub.f32 %v12665_v3, %v14325_v5  ;;  %v12794_v39 = vpack.c.bf16 %v6774_v41, %v6770_v21  ;;  %v14334_v21 = vld [vmem:[#allocation24_spill] sm:$0xff] }
 0x1fd   :  { %9939 = vmatprep.subr.bf16.mxu1 %v14254_v50  ;;  %v6198_v50 = vsub.f32 %v12657_v44, %v13789_v24  ;;  %v6210_v30 = vsub.f32 %v12659_v4, %v14323_v51  ;;  %v6840_v42 = vand.u32 4294901760, %v6839_v13  ;;  %v14327_v24 = vld [vmem:[#allocation39_spill] sm:$0xff] }
 0x1fe   :  { %v6851_v49 = vsub.f32 %v12655_v58, %v14322_v28  ;;  %v6845_v28 = vsub.f32 %v12663_v17, %v14324_v38  ;;  %14326 = vst [vmem:[#allocation50_spill] sm:$0xff] %v12794_v39  ;;  %v12797_v51 = vsub.s32 6, %v14327_v24  ;;  %v6858_v38 = vand.u32 4294901760, %v6857_v35 }
 0x1ff   :  { %10041 = vmatpush1.bf16.msra.mxu0 %v14261_v1  ;;  %v6199_v57 = vand.u32 4294901760, %v6198_v50  ;;  %v6211_v5 = vand.u32 4294901760, %v6210_v30  ;;  %v12801_v1 = vpack.c.bf16 %v6205_v29, %v6193_v16  ;;  %v14330_v50 = vand.u32 4294901760, %v12667_v33 }
 0x200   :  { %9941 = vmatpush1.bf16.msra.mxu1 %v14259_v47  ;;  %v6852_v31 = vand.u32 4294901760, %v6851_v49  ;;  %10139 = vmatprep.subr.bf16.mxu0 %v12645_v62  ;;  %14328 = vst [vmem:[#allocation39_spill] sm:$0xff] %v12797_v51  ;;  %v6846_v13 = vand.u32 4294901760, %v6845_v28  ;;  %v14329_v47 = vld [vmem:[#allocation40_spill] sm:$0xff]  ;;  %v14333_v28 = vand.u32 4294901760, %v12677_v27  ;;  %v14343_v62 = vand.u32 4294901760, %v12690_v46 }
 0x201   :  { %9943 = vmatprep.subr.bf16.mxu1 %v14260_v14  ;;  %v12799_v14 = vsub.f32 %v265_v53, %v6774_v41  ;;  %v6216_v30 = vsub.f32 %v12667_v33, %v14330_v50  ;;  %v14331_v53 = vand.u32 4294901760, %v12671_v45  ;;  %v12829_v49 = vld [vmem:[#allocation7] sm:$0xff]  ;;  %v12841_v50 = vsub.s32 7, %v14327_v24 }
 0x202   :  { %6091 = vmatmul.mubr.f32.vlgmr.msra.gmra.mrb[8].mxu0 %v10872_v12  ;;  %v12816_v41 = vpack.c.bf16 %v6852_v31, %v6840_v42  ;;  %v6875_v35 = vsub.f32 %v12677_v27, %v14333_v28  ;;  %v12833_v31 = vld [vmem:[#allocation8] sm:$0xff]  ;;  %v12838_v28 = vld [vmem:[#allocation8 + $0x8] sm:$0xff]  ;;  %v14344_v24 = vand.u32 4294901760, %v12692_v15 }
 0x203   :  { %v6228_v29 = vsub.f32 %v12671_v45, %v14331_v53  ;;  %10141 = vmatpush1.bf16.msra.mxu0 %v12661_v0  ;;  %6824 = vmatprep.mubr.f32.mxu0 %v13883_v40  ;;  %v12827_v53 = vpack.c.bf16 %v6211_v5, %v6199_v57  ;;  %14335 = vst [vmem:[#allocation51_spill] sm:$0xff] %v12841_v50  ;;  %v14336_v57 = vand.u32 4294901760, %v12682_v60  ;;  %v14337_v0 = vld [vmem:[#allocation32_spill] sm:$0xff]  ;;  %v14338_v45 = vld [vmem:[#allocation35_spill] sm:$0xff] }
 0x204   :  { %9945 = vmatpush1.bf16.msra.mxu1 %v14268_v34  ;;  %v14332_v34 = vand.u32 4294901760, %v12675_v37  ;;  %10143 = vmatprep.subr.bf16.mxu0 %v14334_v21  ;;  %v6876_v33 = vand.u32 4294901760, %v6875_v35  ;;  %v14339_v21 = vand.u32 4294901760, %v12684_v55 }
 0x205   :  { %10043 = vmatprep.subr.bf16.mxu1 %v12643_v48  ;;  %v12846_v5 = vsub.f32 %v12682_v60, %v14336_v57  ;;  %v6229_v48 = vand.u32 4294901760, %v6228_v29  ;;  %v10156_v57 = vpack.c.bf16 %v6858_v38, %v6846_v13  ;;  %v14340_v29 = vld [vmem:[#allocation42_spill] sm:$0xff]  ;;  %v6240_v38 = vsub.f32 %v12692_v15, %v14344_v24 }
 0x206   :  { %v6863_v16 = vsub.f32 %v12675_v37, %v14332_v34  ;;  %v6217_v34 = vand.u32 4294901760, %v6216_v30  ;;  %v6234_v42 = vsub.f32 %v12684_v55, %v14339_v21  ;;  %v14342_v30 = vld [vmem:[#allocation27_spill] sm:$0xff]  ;;  %v14345_v13 = vand.u32 4294901760, %v12698_v18 }
 0x207   :  { %5444 = vmatmul.mubr.f32.vlgmr.msra.gmra.mrb[8].mxu1 %v10872_v12  ;;  %10145 = vmatpush1.bf16.msra.mxu0 %v12686_v6  ;;  %v6223_v21 = vand.u32 4294901760, %v12846_v5  ;;  %v14347_v6 = vand.u32 4294901760, %v12706_v11 }
 0x208   :  { %10045 = vmatpush1.bf16.msra.mxu1 %v14337_v0  ;;  %6177 = vmatprep.mubr.f32.mxu1 %v13883_v40  ;;  %v6864_v60 = vand.u32 4294901760, %v6863_v16  ;;  %v14341_v16 = vand.u32 4294901760, %v12688_v2  ;;  %v6252_v5 = vsub.f32 %v12698_v18, %v14345_v13  ;;  %v6241_v18 = vand.u32 4294901760, %v6240_v38 }
 0x209   :  { %10047 = vmatprep.subr.bf16.mxu1 %v14338_v45  ;;  %10147 = vmatprep.subr.bf16.mxu0 %v12702_v63  ;;  %v12875_v63 = vpack.c.bf16 %v6229_v48, %v6217_v34  ;;  %v6881_v45 = vsub.f32 %v12690_v46, %v14343_v62  ;;  %v14346_v62 = vand.u32 4294901760, %v12704_v43  ;;  %v6899_v13 = vsub.f32 %v12706_v11, %v14347_v6 }
 0x20a   :  { %v6869_v35 = vsub.f32 %v12688_v2, %v14341_v16  ;;  %v10158_v16 = vpack.c.bf16 %v6876_v33, %v6864_v60  ;;  %v14348_v60 = vld [vmem:[#allocation33_spill] sm:$0xff]  ;;  %v6253_v15 = vand.u32 4294901760, %v6252_v5  ;;  %v14350_v6 = vand.u32 4294901760, %v12717_v36 }
 0x20b   :  { %10149 = vmatpush1.bf16.msra.mxu0 %v12723_v26  ;;  %v6887_v24 = vsub.f32 %v12704_v43, %v14346_v62  ;;  %v6882_v62 = vand.u32 4294901760, %v6881_v45  ;;  %v6900_v38 = vand.u32 4294901760, %v6899_v13  ;;  %v14352_v5 = vand.u32 4294901760, %v12752_v56 }
 0x20c   :  { %10049 = vmatpush1.bf16.msra.mxu1 %v14342_v30  ;;  %v6235_v30 = vand.u32 4294901760, %v6234_v42  ;;  %10151 = vmatprep.subr.bf16.mxu0 %v12748_v23  ;;  %v14349_v23 = vld [vmem:[#allocation26_spill] sm:$0xff]  ;;  %v6870_v0 = vand.u32 4294901760, %v6869_v35  ;;  %v6893_v33 = vsub.f32 %v12717_v36, %v14350_v6  ;;  %v14351_v42 = vand.u32 4294901760, %v12727_v9 }
 0x20d   :  { %10051 = vmatprep.subr.bf16.mxu1 %v12696_v52  ;;  %v13818_v52 = vand.u32 4294901760, %v12750_v19  ;;  %v6888_v45 = vand.u32 4294901760, %v6887_v24  ;;  %v6923_v6 = vsub.f32 %v12752_v56, %v14352_v5  ;;  %v14354_v48 = vand.u32 4294901760, %v14348_v60 }
 0x20e   :  { %v6905_v34 = vsub.f32 %v12727_v9, %v14351_v42  ;;  %v14356_v13 = vand.u32 4294901760, %v12738_v61  ;;  %v10064_v5 = vpack.c.bf16 %v6235_v30, %v6223_v21  ;;  %v10066_v30 = vpack.c.bf16 %v6253_v15, %v6241_v18 }
 0x20f   :  { %10153 = vmatpush1.bf16.msra.mxu0 %v12794_v39  ;;  %v6911_v35 = vsub.f32 %v12750_v19, %v13818_v52  ;;  %v14353_v39 = vand.u32 4294901760, %v12712_v8  ;;  %v6258_v26 = vsub.f32 %v14348_v60, %v14354_v48  ;;  %v6894_v48 = vand.u32 4294901760, %v6893_v33 }
 0x210   :  { %10053 = vmatpush1.bf16.msra.mxu1 %v14349_v23  ;;  %10155 = vmatprep.subr.bf16.mxu0 %v12816_v41  ;;  %v14355_v41 = vand.u32 4294901760, %v12734_v10  ;;  %v6276_v52 = vsub.f32 %v12738_v61, %v14356_v13  ;;  %v10160_v23 = vpack.c.bf16 %v6882_v62, %v6870_v0  ;;  %v6906_v60 = vand.u32 4294901760, %v6905_v34 }
 0x211   :  { %10055 = vmatprep.subr.bf16.mxu1 %v12732_v59  ;;  %v6246_v42 = vsub.f32 %v12712_v8, %v14353_v39  ;;  %v14357_v59 = vld [vmem:[#allocation17_spill] sm:$0xff]  ;;  %v13828_v39 = vand.u32 4294901760, %v12766_v7  ;;  %v14359_v13 = vand.u32 4294901760, %v12799_v14  ;;  %v10162_v0 = vpack.c.bf16 %v6900_v38, %v6888_v45 }
 0x212   :  { %v6264_v24 = vsub.f32 %v12734_v10, %v14355_v41  ;;  %6830 = vmatmul.mubr.f32.vlgmr.msra.gmra.mrb[10].mxu0 %v14357_v59  ;;  %v14358_v41 = vand.u32 4294901760, %v12780_v20  ;;  %v6912_v21 = vand.u32 4294901760, %v6911_v35  ;;  %v6924_v62 = vand.u32 4294901760, %v6923_v6 }
 0x213   :  { %10157 = vmatpush1.bf16.msra.mxu0 %v10156_v57  ;;  %6980 = vmatprep.mubr.f32.mxu0 %v13883_v40  ;;  %v6247_v57 = vand.u32 4294901760, %v6246_v42  ;;  %v6259_v34 = vand.u32 4294901760, %v6258_v26  ;;  %v6277_v8 = vand.u32 4294901760, %v6276_v52  ;;  %v6270_v15 = vsub.f32 %v12766_v7, %v13828_v39 }
 0x214   :  { %10057 = vmatpush1.bf16.msra.mxu1 %v12757_v54  ;;  %v6917_v10 = vsub.f32 %v12780_v20, %v14358_v41  ;;  %v6929_v54 = vsub.f32 %v12799_v14, %v14359_v13  ;;  %10159 = vmatprep.subr.bf16.mxu0 %v10158_v16  ;;  %v6265_v33 = vand.u32 4294901760, %v6264_v24  ;;  %v14360_v41 = vrot.slane %v12789_v32, %v14329_v47 }
 0x215   :  { %10059 = vmatprep.subr.bf16.mxu1 %v12801_v1  ;;  %v3504_v1 = vpop.f32.mrb[4].mxu0  ;;  %v14361_v18 = vand.u32 4294901760, %v12774_v22  ;;  %v14362_v52 = vrot.slane %v12789_v32, %v14340_v29  ;;  %v14363_v42 = vrot.slane %v12838_v28, %v14329_v47  ;;  %v6271_v39 = vand.u32 4294901760, %v6270_v15 }
 0x216   :  { %v8716_v13 = vsub.f32 %v3504_v1, %v14360_v41  ;;  %v3506_v16 = vpop.f32.mrb[5].mxu0  ;;  %v6918_v38 = vand.u32 4294901760, %v6917_v10  ;;  %v6930_v35 = vand.u32 4294901760, %v6929_v54  ;;  %v8772_v1 = vrot.slane %v12833_v31, %v12841_v50 }
 0x217   :  { %6183 = vmatmul.mubr.f32.vlgmr.msra.gmra.mrb[10].mxu1 %v14357_v59  ;;  %v6282_v45 = vsub.f32 %v12774_v22, %v14361_v18  ;;  %v8717_v26 = vsub.f32 %v3506_v16, %v14362_v52  ;;  %10161 = vmatpush1.bf16.msra.mxu0 %v10160_v23  ;;  %v10166_v41 = vpack.c.bf16 %v6924_v62, %v6912_v21 }
 0x218   :  { %10061 = vmatpush1.bf16.msra.mxu1 %v12827_v53  ;;  %6333 = vmatprep.mubr.f32.mxu1 %v13883_v40  ;;  %v10164_v53 = vpack.c.bf16 %v6906_v60, %v6894_v48  ;;  %v8874_v24 = vmul.f32 %v14363_v42, %v8716_v13  ;;  %v14364_v18 = vrot.slane %v12829_v49, %v12797_v51 }
 0x219   :  { %10063 = vmatprep.subr.bf16.mxu1 %v12875_v63  ;;  %10163 = vmatprep.subr.bf16.mxu0 %v10162_v0  ;;  %v14365_v63 = vrot.slane %v12838_v28, %v14340_v29  ;;  %v10068_v23 = vpack.c.bf16 %v6259_v34, %v6247_v57  ;;  %v10070_v54 = vpack.c.bf16 %v6277_v8, %v6265_v33  ;;  %v6283_v0 = vand.u32 4294901760, %v6282_v45 }
 0x21a   :  { %v2857_v6 = vpop.f32.mrb[4].mxu1  ;;  %v8899_v60 = vmul.f32 %v8874_v24, %v8716_v13  ;;  %v14366_v48 = vrot.slane %v12829_v49, %v12841_v50  ;;  %v14367_v21 = vrot.slane %v12833_v31, %v12797_v51  ;;  %v10170_v8 = vpack.c.bf16 %v12655_v58, %v12653_v25  ;;  %v14368_v31 = vld [vmem:[#allocation31_spill] sm:$0xff] }
 0x21b   :  { %v8714_v16 = vsub.f32 %v2857_v6, %v14364_v18  ;;  %v2859_v52 = vpop.f32.mrb[5].mxu1  ;;  %v8875_v10 = vmul.f32 %v14365_v63, %v8717_v26  ;;  %10165 = vmatpush1.bf16.msra.mxu0 %v10164_v53  ;;  %v10168_v18 = vpack.c.bf16 %v6930_v35, %v6918_v38  ;;  %v10072_v34 = vpack.c.bf16 %v6283_v0, %v6271_v39  ;;  %v14370_v39 = vld [vmem:[#allocation36_spill] sm:$0xff]  ;;  %v14376_v0 = vld [vmem:[#allocation33_spill] sm:$0xff] }
 0x21c   :  { %v8715_v42 = vsub.f32 %v2859_v52, %v14366_v48  ;;  %10065 = vmatpush1.bf16.msra.mxu1 %v10064_v5  ;;  %v8932_v29 = vmul.f32 1.442695, %v8899_v60  ;;  %10167 = vmatprep.subr.bf16.mxu0 %v10166_v41  ;;  %v10172_v15 = vpack.c.bf16 %v12665_v3, %v12663_v17  ;;  %v14371_v53 = vld [vmem:[#allocation44_spill] sm:$0xff]  ;;  %v10176_v35 = vpack.c.bf16 %v12690_v46, %v12688_v2  ;;  %v14374_v52 = vld [vmem:[#allocation22_spill] sm:$0xff] }
 0x21d   :  { %v8872_v62 = vmul.f32 %v14367_v21, %v8714_v16  ;;  %v8900_v6 = vmul.f32 %v8875_v10, %v8717_v26  ;;  %10067 = vmatprep.subr.bf16.mxu1 %v10066_v30  ;;  %v14369_v30 = vld [vmem:[#allocation28_spill] sm:$0xff]  ;;  %v10174_v26 = vpack.c.bf16 %v12677_v27, %v12675_v37  ;;  %v10078_v38 = vpack.c.bf16 %v14371_v53, %v14370_v39 }
 0x21e   :  { %v8873_v63 = vmul.f32 %v8772_v1, %v8715_v42  ;;  %10554 = vpow2.f32 %v8932_v29  ;;  %v10074_v13 = vpack.c.bf16 %v14369_v30, %v14368_v31  ;;  %v10076_v29 = vpack.c.bf16 %v12659_v4, %v12657_v44  ;;  %v14372_v1 = vld [vmem:[#allocation30_spill] sm:$0xff] }
 0x21f   :  { %v8897_v57 = vmul.f32 %v8872_v62, %v8714_v16  ;;  %v8934_v49 = vmul.f32 1.442695, %v8900_v6  ;;  %10169 = vmatpush1.bf16.msra.mxu0 %v10168_v18  ;;  %v10178_v24 = vpack.c.bf16 %v12706_v11, %v12704_v43  ;;  %v10080_v41 = vpack.c.bf16 %v12684_v55, %v14372_v1  ;;  %v14373_v16 = vld [vmem:[#allocation37_spill] sm:$0xff]  ;;  %v14377_v6 = vld [vmem:[#allocation38_spill] sm:$0xff] }
 0x220   :  { %v8898_v5 = vmul.f32 %v8873_v63, %v8715_v42  ;;  %10069 = vmatpush1.bf16.msra.mxu1 %v10068_v23  ;;  %10171 = vmatprep.subr.bf16.mxu0 %v10170_v8  ;;  %v10082_v10 = vpack.c.bf16 %v14374_v52, %v14373_v16  ;;  %v10180_v23 = vpack.c.bf16 %v12727_v9, %v12717_v36  ;;  %v14375_v42 = vld [vmem:[#allocation20_spill] sm:$0xff]  ;;  %v14403_v51 = vand.u32 4294901760, %v12657_v44 }
 0x221   :  { %v8928_v33 = vmul.f32 1.442695, %v8897_v57  ;;  %10556 = vpow2.f32 %v8934_v49  ;;  %10071 = vmatprep.subr.bf16.mxu1 %v10070_v54  ;;  %v10182_v60 = vpack.c.bf16 %v12752_v56, %v12750_v19  ;;  %v10084_v21 = vpack.c.bf16 %v14376_v0, %v14375_v42  ;;  %v14378_v49 = vld [vmem:[#allocation19_spill] sm:$0xff] }
 0x222   :  { %v8930_v45 = vmul.f32 1.442695, %v8898_v5  ;;  %6982 = vmatmul.mubr.f32.vlgmr.msra.gmra.mrb[10].mxu0 %v10872_v12  ;;  %v10086_v18 = vpack.c.bf16 %v12738_v61, %v14377_v6  ;;  %v10184_v63 = vpack.c.bf16 %v12799_v14, %v12780_v20  ;;  %v10088_v57 = vpack.c.bf16 %v12774_v22, %v12766_v7  ;;  %v14379_v5 = vld [vmem:[#allocation15_spill] sm:$0xff] }
 0x223   :  { %10558 = vpow2.f32 %v8928_v33  ;;  %10173 = vmatpush1.bf16.msra.mxu0 %v10172_v15  ;;  %7084 = vmatprep.mubr.f32.mxu0 %v13883_v40  ;;  %v14381_v33 = vld [vmem:[#allocation25_spill] sm:$0xff]  ;;  %v14383_v15 = vld [vmem:[#allocation32_spill] sm:$0xff]  ;;  %v14410_v44 = vand.u32 4294901760, %v12704_v43 }
 0x224   :  { %10560 = vpow2.f32 %v8930_v45  ;;  %10073 = vmatpush1.bf16.msra.mxu1 %v10072_v34  ;;  %10175 = vmatprep.subr.bf16.mxu0 %v10174_v26  ;;  %v14380_v34 = vld [vmem:[#allocation29_spill] sm:$0xff]  ;;  %v14384_v45 = vld [vmem:[#allocation35_spill] sm:$0xff] }
 0x225   :  { %10075 = vmatprep.subr.bf16.mxu1 %v10074_v13  ;;  %v14382_v13 = vld [vmem:[#allocation24_spill] sm:$0xff]  ;;  %v14385_v26 = vld [vmem:[#allocation23_spill] sm:$0xff] }
 0x227   :  { %6335 = vmatmul.mubr.f32.vlgmr.msra.gmra.mrb[10].mxu1 %v10872_v12  ;;  %10177 = vmatpush1.bf16.msra.mxu0 %v10176_v35  ;;  %v14388_v35 = vld [vmem:[#allocation21_spill] sm:$0xff] }
 0x228   :  { %10077 = vmatpush1.bf16.msra.mxu1 %v10076_v29  ;;  %6437 = vmatprep.mubr.f32.mxu1 %v13883_v40  ;;  %v10555_v54 = vpop.eup %10554  ;;  %v14386_v29 = vld [vmem:[#allocation18_spill] sm:$0xff] }
 0x229   :  { %10079 = vmatprep.subr.bf16.mxu1 %v10078_v38  ;;  %10179 = vmatprep.subr.bf16.mxu0 %v10178_v24  ;;  %8974 = vst [vmem:[#allocation10 + $0x40] sm:$0xff] %v10555_v54  ;;  %v14387_v38 = vld [vmem:[#allocation27_spill] sm:$0xff]  ;;  %v14389_v24 = vld [vmem:[#allocation45_spill] sm:$0xff] }
 0x22b   :  { %v10557_v48 = vpop.eup %10556  ;;  %10181 = vmatpush1.bf16.msra.mxu0 %v10180_v23  ;;  %v14392_v23 = vand.u32 4294901760, %v12655_v58  ;;  %v14401_v58 = vand.u32 4294901760, %v12677_v27  ;;  %v14409_v27 = vand.u32 4294901760, %v12690_v46  ;;  %v14415_v46 = vand.u32 4294901760, %v14374_v52 }
 0x22c   :  { %8975 = vst [vmem:[#allocation10 + $0x48] sm:$0xff] %v10557_v48  ;;  %10081 = vmatpush1.bf16.msra.mxu1 %v10080_v41  ;;  %10183 = vmatprep.subr.bf16.mxu0 %v10182_v60  ;;  %v14390_v41 = vld [vmem:[#allocation48_spill] sm:$0xff]  ;;  %v14393_v60 = vld [vmem:[#allocation26_spill] sm:$0xff]  ;;  %v14422_v52 = vand.u32 4294901760, %v14377_v6 }
 0x22d   :  { %v10559_v62 = vpop.eup %10558  ;;  %10083 = vmatprep.subr.bf16.mxu1 %v10082_v10  ;;  %v14391_v10 = vand.u32 4294901760, %v12653_v25  ;;  %v14394_v48 = vld [vmem:[#allocation34_spill] sm:$0xff]  ;;  %v14400_v25 = vand.u32 4294901760, %v12675_v37  ;;  %v14408_v37 = vand.u32 4294901760, %v12688_v2  ;;  %v14414_v2 = vand.u32 4294901760, %v14373_v16  ;;  %v94_v6 = vld [vmem:[#allocation5 + $0xc0] sm:$0xff] }
 0x22e   :  { %v10561_v8 = vpop.eup %10560  ;;  %8972 = vst [vmem:[#allocation10 + $0x30] sm:$0xff] %v10559_v62  ;;  %v14396_v62 = vand.u32 4294901760, %v14368_v31  ;;  %v14404_v31 = vand.u32 4294901760, %v12659_v4  ;;  %v14411_v4 = vand.u32 4294901760, %v12706_v11  ;;  %v14416_v11 = vand.u32 4294901760, %v12717_v36 }
 0x22f   :  { %8973 = vst [vmem:[#allocation10 + $0x38] sm:$0xff] %v10561_v8  ;;  %10185 = vmatpush1.bf16.msra.mxu0 %v10184_v63  ;;  %v10202_v54 = vpack.c.bf16 %v14392_v23, %v14391_v10  ;;  %v14398_v8 = vand.u32 4294901760, %v12663_v17  ;;  %v10206_v10 = vpack.c.bf16 %v14401_v58, %v14400_v25  ;;  %v14402_v23 = vld [vmem:[#allocation46_spill] sm:$0xff]  ;;  %v14406_v17 = vand.u32 4294901760, %v14370_v39 }
 0x230   :  { %10085 = vmatpush1.bf16.msra.mxu1 %v10084_v21  ;;  %10187 = vmatprep.subr.bf16.mxu0 %v14378_v49  ;;  %v14395_v21 = vld [vmem:[#allocation50_spill] sm:$0xff]  ;;  %v10108_v47 = vpack.c.bf16 %v14404_v31, %v14403_v51  ;;  %v10210_v51 = vpack.c.bf16 %v14411_v4, %v14410_v44  ;;  %v14413_v39 = vand.u32 4294901760, %v12684_v55  ;;  %v10114_v43 = vpack.c.bf16 %v14415_v46, %v14414_v2 }
 0x231   :  { %10087 = vmatprep.subr.bf16.mxu1 %v10086_v18  ;;  %v14397_v18 = vand.u32 4294901760, %v14369_v30  ;;  %v14405_v30 = vld [vmem:[#allocation16_spill] sm:$0xff]  ;;  %v14419_v55 = vand.u32 4294901760, %v12752_v56  ;;  %v14423_v36 = vand.u32 4294901760, %v12738_v61  ;;  %v14424_v25 = vand.u32 4294901760, %v12780_v20  ;;  %v93_v56 = vld [vmem:[#allocation5 + $0xb8] sm:$0xff] }
 0x232   :  { %7087 = vmatmul.mubr.f32.vlgmr.msra.gmra.mrb[10].mxu0 %v14379_v5  ;;  %v92_v31 = vld [vmem:[#allocation5 + $0xb0] sm:$0xff]  ;;  %v7391_v61 = vand.u32 4294901760, %v93_v56 }
 0x233   :  { %10189 = vmatpush1.bf16.msra.mxu0 %v14381_v33  ;;  %7173 = vmatprep.mubr.f32.mxu0 %v13883_v40  ;;  %v10106_v63 = vpack.c.bf16 %v14397_v18, %v14396_v62  ;;  %v10208_v62 = vpack.c.bf16 %v14409_v27, %v14408_v37  ;;  %v14417_v18 = vand.u32 4294901760, %v12727_v9  ;;  %v10118_v9 = vpack.c.bf16 %v14423_v36, %v14422_v52  ;;  %v143_v27 = vld [vmem:[#allocation5 + $0x248] sm:$0xff]  ;;  %v168_v4 = vld [vmem:[#allocation5 + $0x310] sm:$0xff] }
 0x234   :  { %10089 = vmatpush1.bf16.msra.mxu1 %v10088_v57  ;;  %10191 = vmatprep.subr.bf16.mxu0 %v14382_v13  ;;  %v14399_v57 = vand.u32 4294901760, %v12665_v3  ;;  %v14407_v3 = vand.u32 4294901760, %v14371_v53  ;;  %v7393_v37 = vand.u32 4294901760, %v92_v31  ;;  %v7399_v2 = vand.u32 4294901760, %v143_v27 }
 0x235   :  { %10091 = vmatprep.subr.bf16.mxu1 %v14380_v34  ;;  %v7403_v46 = vand.u32 4294901760, %v168_v4 }
 0x236   :  { %v10204_v50 = vpack.c.bf16 %v14399_v57, %v14398_v8  ;;  %v14420_v8 = vand.u32 4294901760, %v14375_v42  ;;  %v14421_v57 = vand.u32 4294901760, %v14376_v0  ;;  %v117_v42 = vld [vmem:[#allocation5 + $0x178] sm:$0xff]  ;;  %v14426_v0 = vand.u32 4294901760, %v12766_v7 }
 0x237   :  { %6440 = vmatmul.mubr.f32.vlgmr.msra.gmra.mrb[10].mxu1 %v14379_v5  ;;  %10193 = vmatpush1.bf16.msra.mxu0 %v14385_v26  ;;  %v169_v7 = vld [vmem:[#allocation5 + $0x318] sm:$0xff]  ;;  %v13131_v36 = vsub.f32 %v143_v27, %v7399_v2  ;;  %v242_v27 = vld [vmem:[#allocation5 + $0x560] sm:$0xff] }
 0x238   :  { %10093 = vmatpush1.bf16.msra.mxu1 %v14383_v15  ;;  %6526 = vmatprep.mubr.f32.mxu1 %v13883_v40  ;;  %v10116_v16 = vpack.c.bf16 %v14421_v57, %v14420_v8  ;;  %v192_v57 = vld [vmem:[#allocation5 + $0x3d0] sm:$0xff] }
 0x239   :  { %10095 = vmatprep.subr.bf16.mxu1 %v14384_v45  ;;  %10195 = vmatprep.subr.bf16.mxu0 %v14386_v29 }
 0x23b   :  { %10197 = vmatpush1.bf16.msra.mxu0 %v14389_v24 }
 0x23c   :  { %10097 = vmatpush1.bf16.msra.mxu1 %v14387_v38  ;;  %10199 = vmatprep.subr.bf16.mxu0 %v14390_v41 }
 0x23d   :  { %10099 = vmatprep.subr.bf16.mxu1 %v14388_v35 }
 0x23f   :  { %10201 = vmatpush1.bf16.msra.mxu0 %v14395_v21 }
 0x240   :  { %10101 = vmatpush1.bf16.msra.mxu1 %v14393_v60  ;;  %10203 = vmatprep.subr.bf16.mxu0 %v10202_v54  ;;  %v10110_v54 = vpack.c.bf16 %v14407_v3, %v14406_v17  ;;  %v14427_v17 = vand.u32 4294901760, %v12774_v22  ;;  %v144_v22 = vld [vmem:[#allocation5 + $0x250] sm:$0xff] }
 0x241   :  { %10103 = vmatprep.subr.bf16.mxu1 %v14394_v48 }
 0x242   :  { %7177 = vmatmul.mubr.f32.vlgmr.msra.gmra.mrb[10].mxu0 %v14405_v30  ;;  %v10120_v3 = vpack.c.bf16 %v14427_v17, %v14426_v0 }
 0x243   :  { %10205 = vmatpush1.bf16.msra.mxu0 %v10204_v50  ;;  %7295 = vmatprep.mubr.f32.mxu0 %v13883_v40  ;;  %v14412_v50 = vand.u32 4294901760, %v14372_v1 }
 0x244   :  { %10105 = vmatpush1.bf16.msra.mxu1 %v14402_v23  ;;  %10207 = vmatprep.subr.bf16.mxu0 %v10206_v10  ;;  %v118_v10 = vld [vmem:[#allocation5 + $0x180] sm:$0xff] }
 0x245   :  { %10107 = vmatprep.subr.bf16.mxu1 %v10106_v63  ;;  %v10112_v53 = vpack.c.bf16 %v14413_v39, %v14412_v50  ;;  %v10212_v63 = vpack.c.bf16 %v14417_v18, %v14416_v11  ;;  %v7395_v20 = vand.u32 4294901760, %v118_v10  ;;  %v167_v50 = vld [vmem:[#allocation5 + $0x308] sm:$0xff]  ;;  %v193_v18 = vld [vmem:[#allocation5 + $0x3d8] sm:$0xff] }
 0x246   :  { %v7405_v11 = vand.u32 4294901760, %v167_v50 }
 0x247   :  { %6530 = vmatmul.mubr.f32.vlgmr.msra.gmra.mrb[10].mxu1 %v14405_v30  ;;  %10209 = vmatpush1.bf16.msra.mxu0 %v10208_v62  ;;  %v8039_v62 = vand.u32 4294901760, %v94_v6  ;;  %v13106_v39 = vpack.c.bf16 %v7395_v20, %v7391_v61 }
 0x248   :  { %10109 = vmatpush1.bf16.msra.mxu1 %v10108_v47  ;;  %6648 = vmatprep.mubr.f32.mxu1 %v13883_v40  ;;  %v14418_v47 = vand.u32 4294901760, %v12750_v19  ;;  %v14425_v19 = vand.u32 4294901760, %v12799_v14  ;;  %v7397_v14 = vand.u32 4294901760, %v117_v42 }
 0x249   :  { %10111 = vmatprep.subr.bf16.mxu1 %v10110_v54  ;;  %10211 = vmatprep.subr.bf16.mxu0 %v10210_v51  ;;  %v119_v54 = vld [vmem:[#allocation5 + $0x188] sm:$0xff]  ;;  %v142_v51 = vld [vmem:[#allocation5 + $0x240] sm:$0xff]  ;;  %v13125_v8 = vsub.f32 %v94_v6, %v8039_v62 }
 0x24a   :  { %v10214_v1 = vpack.c.bf16 %v14419_v55, %v14418_v47  ;;  %v10216_v58 = vpack.c.bf16 %v14425_v19, %v14424_v25  ;;  %v8042_v44 = vand.u32 4294901760, %v119_v54  ;;  %v8045_v47 = vand.u32 4294901760, %v144_v22  ;;  %v194_v25 = vld [vmem:[#allocation5 + $0x3e0] sm:$0xff]  ;;  %v219_v19 = vld [vmem:[#allocation5 + $0x4a8] sm:$0xff] }
 0x24b   :  { %10213 = vmatpush1.bf16.msra.mxu0 %v10212_v63  ;;  %v218_v63 = vld [vmem:[#allocation5 + $0x4a0] sm:$0xff]  ;;  %v8048_v55 = vand.u32 4294901760, %v169_v7  ;;  %v8054_v6 = vand.u32 4294901760, %v219_v19 }
 0x24c   :  { %10113 = vmatpush1.bf16.msra.mxu1 %v10112_v53  ;;  %10215 = vmatprep.subr.bf16.mxu0 %v10214_v1  ;;  %v13108_v53 = vsub.f32 %v93_v56, %v7391_v61  ;;  %v13123_v1 = vsub.f32 %v117_v42, %v7397_v14  ;;  %v13129_v52 = vsub.f32 %v119_v54, %v8042_v44  ;;  %v7409_v42 = vand.u32 4294901760, %v192_v57  ;;  %v243_v54 = vld [vmem:[#allocation5 + $0x568] sm:$0xff]  ;;  %v268_v61 = vld [vmem:[#allocation5 + $0x630] sm:$0xff] }
 0x24d   :  { %10115 = vmatprep.subr.bf16.mxu1 %v10114_v43  ;;  %v7401_v43 = vand.u32 4294901760, %v142_v51  ;;  %v13136_v56 = vsub.f32 %v168_v4, %v7403_v46  ;;  %v13147_v17 = vsub.f32 %v144_v22, %v8045_v47  ;;  %v7419_v22 = vand.u32 4294901760, %v268_v61 }
 0x24f   :  { %10217 = vmatpush1.bf16.msra.mxu0 %v10216_v58  ;;  %v13134_v58 = vpack.c.bf16 %v7403_v46, %v7399_v2 }
 0x250   :  { %10117 = vmatpush1.bf16.msra.mxu1 %v10116_v16  ;;  %10219 = vmatprep.subr.bf16.mxu0 %v14378_v49  ;;  %v13110_v49 = vpack.c.bf16 %v7397_v14, %v7393_v37  ;;  %v217_v16 = vld [vmem:[#allocation5 + $0x498] sm:$0xff] }
 0x251   :  { %10119 = vmatprep.subr.bf16.mxu1 %v10118_v9  ;;  %v7407_v9 = vand.u32 4294901760, %v193_v18  ;;  %14430 = vst [vmem:[#allocation28_spill] sm:$0xff] %v13134_v58  ;;  %v7413_v0 = vand.u32 4294901760, %v217_v16 }
 0x252   :  { %7297 = vmatmul.mubr.f32.vlgmr.msra.gmra.mrb[10].mxu0 %v10872_v12  ;;  %14428 = vst [vmem:[#allocation17_spill] sm:$0xff] %v13110_v49 }
 0x253   :  { %10221 = vmatpush1.bf16.msra.mxu0 %v14381_v33  ;;  %7383 = vmatprep.mubr.f32.mxu0 %v13883_v40  ;;  %v13117_v33 = vpack.c.bf16 %v8042_v44, %v8039_v62  ;;  %v13840_v62 = vand.u32 4294901760, %v13108_v53 }
 0x254   :  { %10121 = vmatpush1.bf16.msra.mxu1 %v10120_v3  ;;  %10223 = vmatprep.subr.bf16.mxu0 %v14382_v13  ;;  %v13121_v13 = vsub.f32 %v92_v31, %v7393_v37  ;;  %v13140_v31 = vsub.f32 %v142_v51, %v7401_v43  ;;  %v13149_v3 = vsub.f32 %v169_v7, %v8048_v55 }
 0x255   :  { %10123 = vmatprep.subr.bf16.mxu1 %v14380_v34  ;;  %v13115_v34 = vsub.f32 %v118_v10, %v7395_v20  ;;  %14429 = vst [vmem:[#allocation31_spill] sm:$0xff] %v13117_v33  ;;  %v13138_v10 = vpack.c.bf16 %v7405_v11, %v7401_v43  ;;  %v13155_v37 = vsub.f32 %v193_v18, %v7407_v9  ;;  %v244_v43 = vld [vmem:[#allocation5 + $0x570] sm:$0xff] }
 0x256   :  { %v13836_v4 = vand.u32 4294901760, %v13121_v13  ;;  %v13164_v51 = vpack.c.bf16 %v7413_v0, %v7409_v42  ;;  %v13169_v7 = vsub.f32 %v217_v16, %v7413_v0 }
 0x257   :  { %6650 = vmatmul.mubr.f32.vlgmr.msra.gmra.mrb[10].mxu1 %v10872_v12  ;;  %10225 = vmatpush1.bf16.msra.mxu0 %v14385_v26  ;;  %14431 = vst [vmem:[#allocation36_spill] sm:$0xff] %v13138_v10  ;;  %v13144_v26 = vpack.c.bf16 %v8048_v55, %v8045_v47  ;;  %v13839_v44 = vand.u32 4294901760, %v13115_v34  ;;  %v13838_v47 = vand.u32 4294901760, %v13125_v8  ;;  %v13845_v55 = vmov 0.0|0.0  }
 0x258   :  { %10125 = vmatpush1.bf16.msra.mxu1 %v14383_v15  ;;  %6736 = vmatprep.mubr.f32.mxu1 %v13883_v40  ;;  %v7411_v15 = vand.u32 4294901760, %v218_v63  ;;  %14434 = vst [vmem:[#allocation37_spill] sm:$0xff] %v13164_v51  ;;  %v14445_v30 = vand.u32 4294901760, %v13155_v37 }
 0x259   :  { %10127 = vmatprep.subr.bf16.mxu1 %v14384_v45  ;;  %10227 = vmatprep.subr.bf16.mxu0 %v14386_v29  ;;  %v13142_v45 = vsub.f32 %v167_v50, %v7405_v11  ;;  %14432 = vst [vmem:[#allocation44_spill] sm:$0xff] %v13144_v26  ;;  %v8051_v29 = vand.u32 4294901760, %v194_v25  ;;  %v7415_v50 = vand.u32 4294901760, %v243_v54  ;;  %v269_v11 = vld [vmem:[#allocation5 + $0x638] sm:$0xff] }
 0x25a   :  { %v13153_v20 = vpack.c.bf16 %v7411_v15, %v7407_v9  ;;  %v13157_v14 = vsub.f32 %v218_v63, %v7411_v15  ;;  %v13177_v63 = vsub.f32 %v219_v19, %v8054_v6  ;;  %v8057_v15 = vand.u32 4294901760, %v244_v43 }
 0x25b   :  { %10229 = vmatpush1.bf16.msra.mxu0 %v14389_v24  ;;  %v13166_v24 = vsub.f32 %v192_v57, %v7409_v42  ;;  %v13171_v2 = vpack.c.bf16 %v8054_v6, %v8051_v29  ;;  %v13175_v18 = vsub.f32 %v194_v25, %v8051_v29  ;;  %v7486_v57 = vsub.f32 %v13108_v53, %v13840_v62 }
 0x25c   :  { %10129 = vmatpush1.bf16.msra.mxu1 %v14387_v38  ;;  %14433 = vst [vmem:[#allocation30_spill] sm:$0xff] %v13153_v20  ;;  %v267_v38 = vld [vmem:[#allocation5 + $0x628] sm:$0xff]  ;;  %10231 = vmatprep.subr.bf16.mxu0 %v14390_v41  ;;  %v7417_v41 = vand.u32 4294901760, %v242_v27  ;;  %v13194_v9 = vpack.c.bf16 %v7419_v22, %v7415_v50  ;;  %v8060_v25 = vand.u32 4294901760, %v269_v11  ;;  %v13198_v19 = vsub.f32 %v243_v54, %v7415_v50 }
 0x25d   :  { %10131 = vmatprep.subr.bf16.mxu1 %v14388_v35  ;;  %v13835_v35 = vand.u32 4294901760, %v13123_v1  ;;  %14435 = vst [vmem:[#allocation22_spill] sm:$0xff] %v13171_v2  ;;  %v7421_v46 = vand.u32 4294901760, %v267_v38  ;;  %v13200_v42 = vsub.f32 %v268_v61, %v7419_v22  ;;  %v8125_v6 = vsub.f32 %v13125_v8, %v13838_v47 }
 0x25e   :  { %14436 = vst [vmem:[#allocation20_spill] sm:$0xff] %v13194_v9  ;;  %v13206_v29 = vsub.f32 %v242_v27, %v7417_v41  ;;  %v7487_v54 = vand.u32 4294901760, %v7486_v57  ;;  %v13841_v57 = vand.u32 4294901760, %v13131_v36  ;;  %v13851_v47 = vand.u32 4294901760, %v13142_v45 }
 0x25f   :  { %10233 = vmatpush1.bf16.msra.mxu0 %v14395_v21  ;;  %v7492_v21 = vsub.f32 %v13121_v13, %v13836_v4  ;;  %v7504_v16 = vsub.f32 %v13123_v1, %v13835_v35  ;;  %v13202_v0 = vpack.c.bf16 %v7421_v46, %v7417_v41  ;;  %v13218_v27 = vsub.f32 %v267_v38, %v7421_v46 }
 0x260   :  { %10133 = vmatpush1.bf16.msra.mxu1 %v14393_v60  ;;  %v13837_v60 = vand.u32 4294901760, %v13129_v52  ;;  %10330 = vmatprep.subr.bf16.mxu0 %v13845_v55  ;;  %v13220_v41 = vpack.c.bf16 %v8060_v25, %v8057_v15  ;;  %v13222_v35 = vsub.f32 %v244_v43, %v8057_v15  ;;  %v13224_v4 = vsub.f32 %v269_v11, %v8060_v25  ;;  %v14439_v43 = vld [vmem:[#allocation47_spill] sm:$0xff] }
 0x261   :  { %10135 = vmatprep.subr.bf16.mxu1 %v14394_v48  ;;  %v7498_v48 = vsub.f32 %v13115_v34, %v13839_v44  ;;  %14437 = vst [vmem:[#allocation33_spill] sm:$0xff] %v13202_v0  ;;  %v7493_v50 = vand.u32 4294901760, %v7492_v21  ;;  %v7505_v22 = vand.u32 4294901760, %v7504_v16  ;;  %v13843_v21 = vand.u32 4294901760, %v13147_v17  ;;  %v14440_v16 = vld [vmem:[#allocation49_spill] sm:$0xff] }
 0x262   :  { %7385 = vmatmul.mubr.f32.vlgmr.msra.gmra.mrb[10].mxu0 %v10872_v12  ;;  %14438 = vst [vmem:[#allocation38_spill] sm:$0xff] %v13220_v41  ;;  %v8126_v38 = vand.u32 4294901760, %v8125_v6  ;;  %v14443_v6 = vld [vmem:[#allocation43_spill] sm:$0xff]  ;;  %v14446_v15 = vand.u32 4294901760, %v13157_v14 }
 0x263   :  { %10332 = vmatpush3.bf16.msra.mxu0 %v13117_v33  ;;  %v7499_v61 = vand.u32 4294901760, %v7498_v48  ;;  %9080 = vmatprep.mubr.msk.f32.mxu0 %vm10722_vm1, %v13883_v40  ;;  %v13842_v48 = vand.u32 4294901760, %v13136_v56 }
 0x264   :  { %10137 = vmatpush1.bf16.msra.mxu1 %v14402_v23  ;;  %v8132_v23 = vsub.f32 %v13129_v52, %v13837_v60  ;;  %10333 = vmatprep.subr.bf16.mxu0 %v13845_v55  ;;  %v13238_v60 = vpack.c.bf16 %v7505_v22, %v7493_v50  ;;  %v8139_v50 = vsub.f32 %v13147_v17, %v13843_v21  ;;  %v14442_v22 = vand.u32 4294901760, %v13149_v3 }
 0x265   :  { %10235 = vmatprep.subr.bf16.mxu1 %v13106_v39  ;;  %v10250_v25 = vpack.c.bf16 %v7499_v61, %v7487_v54  ;;  %v7510_v54 = vsub.f32 %v13131_v36, %v13841_v57  ;;  %v7522_v61 = vsub.f32 %v13136_v56, %v13842_v48  ;;  %v8638_v57 = vrot.slane %v12789_v32, %v14443_v6 }
 0x266   :  { %v8133_v46 = vand.u32 4294901760, %v8132_v23  ;;  %v14441_v23 = vld [vmem:[#allocation41_spill] sm:$0xff]  ;;  %v8146_v62 = vsub.f32 %v13149_v3, %v14442_v22  ;;  %v14444_v21 = vand.u32 4294901760, %v13140_v31  ;;  %v7528_v22 = vsub.f32 %v13142_v45, %v13851_v47 }
 0x267   :  { %6738 = vmatmul.mubr.f32.vlgmr.msra.gmra.mrb[10].mxu1 %v10872_v12  ;;  %10335 = vmatpush3.bf16.msra.mxu0 %v13144_v26  ;;  %v7546_v48 = vsub.f32 %v13157_v14, %v14446_v15  ;;  %v7523_v47 = vand.u32 4294901760, %v7522_v61 }
 0x268   :  { %10237 = vmatpush1.bf16.msra.mxu1 %v13110_v49  ;;  %7471 = vmatprep.mubr.f32.mxu1 %v13883_v40  ;;  %v10343_v11 = vpack.c.bf16 %v8133_v46, %v8126_v38  ;;  %v7516_v44 = vsub.f32 %v13140_v31, %v14444_v21  ;;  %v7534_v38 = vsub.f32 %v13155_v37, %v14445_v30  ;;  %v8147_v26 = vand.u32 4294901760, %v8146_v62 }
 0x269   :  { %10239 = vmatprep.subr.bf16.mxu1 %v13134_v58  ;;  %10336 = vmatprep.subr.bf16.mxu0 %v13845_v55  ;;  %v14447_v30 = vand.u32 4294901760, %v13175_v18  ;;  %v7529_v62 = vand.u32 4294901760, %v7528_v22  ;;  %v14453_v46 = vand.u32 4294901760, %v13200_v42 }
 0x26a   :  { %v7517_v61 = vand.u32 4294901760, %v7516_v44 }
 0x26b   :  { %10338 = vmatpush3.bf16.msra.mxu0 %v13171_v2  ;;  %v8153_v15 = vsub.f32 %v13175_v18, %v14447_v30  ;;  %v14451_v30 = vand.u32 4294901760, %v13169_v7  ;;  %v7570_v49 = vsub.f32 %v13200_v42, %v14453_v46  ;;  %v14455_v46 = vand.u32 4294901760, %v13224_v4 }
 0x26c   :  { %10241 = vmatpush1.bf16.msra.mxu1 %v13138_v10  ;;  %10339 = vmatprep.subr.bf16.mxu0 %v13845_v55  ;;  %v8140_v10 = vand.u32 4294901760, %v8139_v50  ;;  %v14448_v55 = vand.u32 4294901760, %v13177_v63  ;;  %v7535_v50 = vand.u32 4294901760, %v7534_v38 }
 0x26d   :  { %10243 = vmatprep.subr.bf16.mxu1 %v13153_v20  ;;  %v7511_v20 = vand.u32 4294901760, %v7510_v54  ;;  %v14449_v54 = vmov 0.0|0.0   ;;  %v7552_v58 = vsub.f32 %v13169_v7, %v14451_v30  ;;  %v8154_v38 = vand.u32 4294901760, %v8153_v15 }
 0x26e   :  { %v8160_v2 = vsub.f32 %v13177_v63, %v14448_v55  ;;  %v14452_v55 = vand.u32 4294901760, %v13198_v19  ;;  %v10346_v22 = vpack.c.bf16 %v8147_v26, %v8140_v10  ;;  %v8796_v10 = vrot.slane %v12838_v28, %v14443_v6 }
 0x26f   :  { %10341 = vmatpush3.bf16.msra.mxu0 %v13220_v41  ;;  %v10254_v44 = vpack.c.bf16 %v7523_v47, %v7511_v20  ;;  %v8792_v20 = vrot.slane %v12838_v28, %v14440_v16  ;;  %v10256_v26 = vpack.c.bf16 %v7529_v62, %v7517_v61  ;;  %v14457_v61 = vand.u32 4294901760, %v13206_v29 }
 0x270   :  { %10245 = vmatpush1.bf16.msra.mxu1 %v13164_v51  ;;  %10342 = vmatprep.subr.bf16.mxu0 %v14449_v54  ;;  %v7547_v51 = vand.u32 4294901760, %v7546_v48  ;;  %v7558_v21 = vsub.f32 %v13198_v19, %v14452_v55  ;;  %v8161_v30 = vand.u32 4294901760, %v8160_v2  ;;  %v14454_v55 = vand.u32 4294901760, %v13222_v35 }
 0x271   :  { %10247 = vmatprep.subr.bf16.mxu1 %v13194_v9  ;;  %v14450_v9 = vand.u32 4294901760, %v13166_v24  ;;  %v14458_v62 = vand.u32 4294901760, %v13218_v27 }
 0x272   :  { %9081 = vmatmul.mubr.f32.vlgmr.msra.gmra.mrb[12].mxu0 %v14357_v59  ;;  %v8167_v33 = vsub.f32 %v13222_v35, %v14454_v55  ;;  %v7559_v15 = vand.u32 4294901760, %v7558_v21  ;;  %v7571_v55 = vand.u32 4294901760, %v7570_v49  ;;  %v10349_v49 = vpack.c.bf16 %v8161_v30, %v8154_v38 }
 0x273   :  { %v7540_v41 = vsub.f32 %v13166_v24, %v14450_v9  ;;  %10344 = vmatpush3.bf16.msra.mxu0 %v10343_v11  ;;  %9099 = vmatprep.mubr.msk.f32.mxu0 %vm10722_vm1, %v13883_v40  ;;  %v10258_v11 = vpack.c.bf16 %v7547_v51, %v7535_v50  ;;  %v14461_v38 = vrot.slane %v12838_v28, %v14439_v43 }
 0x274   :  { %10249 = vmatpush1.bf16.msra.mxu1 %v13202_v0  ;;  %v8174_v0 = vsub.f32 %v13224_v4, %v14455_v46  ;;  %10345 = vmatprep.subr.bf16.mxu0 %v14449_v54  ;;  %v14456_v46 = vrot.slane %v12789_v32, %v14440_v16  ;;  %v8168_v51 = vand.u32 4294901760, %v8167_v33  ;;  %v14460_v33 = vrot.slane %v12789_v32, %v14441_v23 }
 0x275   :  { %10251 = vmatprep.subr.bf16.mxu1 %v10250_v25  ;;  %v7541_v47 = vand.u32 4294901760, %v7540_v41  ;;  %v4798_v2 = vpop.f32.mrb[6].mxu0  ;;  %v7553_v25 = vand.u32 4294901760, %v7552_v58  ;;  %v7564_v41 = vsub.f32 %v13206_v29, %v14457_v61 }
 0x276   :  { %v8720_v48 = vsub.f32 %v4798_v2, %v14456_v46  ;;  %v4800_v9 = vpop.f32.mrb[7].mxu0  ;;  %v8788_v2 = vrot.slane %v12838_v28, %v14441_v23  ;;  %v14459_v46 = vrot.slane %v12789_v32, %v14439_v43  ;;  %v10266_v28 = vpack.c.bf16 %v13115_v34, %v13108_v53 }
 0x277   :  { %7477 = vmatmul.mubr.f32.vlgmr.msra.gmra.mrb[12].mxu1 %v14357_v59  ;;  %v7576_v59 = vsub.f32 %v13218_v27, %v14458_v62  ;;  %v8721_v58 = vsub.f32 %v4800_v9, %v8638_v57  ;;  %10347 = vmatpush3.bf16.msra.mxu0 %v10346_v22  ;;  %v10260_v16 = vpack.c.bf16 %v7553_v25, %v7541_v47  ;;  %v7565_v22 = vand.u32 4294901760, %v7564_v41 }
 0x278   :  { %10253 = vmatpush1.bf16.msra.mxu1 %v13238_v60  ;;  %7627 = vmatprep.mubr.f32.mxu1 %v13883_v40  ;;  %v8175_v60 = vand.u32 4294901760, %v8174_v0  ;;  %v8878_v50 = vmul.f32 %v8792_v20, %v8720_v48  ;;  %v10262_v57 = vpack.c.bf16 %v7571_v55, %v7559_v15  ;;  %v10270_v15 = vpack.c.bf16 %v13136_v56, %v13131_v36 }
 0x279   :  { %10255 = vmatprep.subr.bf16.mxu1 %v10254_v44  ;;  %10348 = vmatprep.subr.bf16.mxu0 %v14449_v54  ;;  %v8879_v6 = vmul.f32 %v8796_v10, %v8721_v58  ;;  %v7577_v9 = vand.u32 4294901760, %v7576_v59  ;;  %v10358_v55 = vpack.c.bf16 %v13149_v3, %v13147_v17  ;;  %v10272_v41 = vpack.c.bf16 %v13142_v45, %v13140_v31 }
 0x27a   :  { %v4151_v21 = vpop.f32.mrb[6].mxu1  ;;  %v8903_v44 = vmul.f32 %v8878_v50, %v8720_v48  ;;  %v10274_v59 = vpack.c.bf16 %v13157_v14, %v13155_v37 }
 0x27b   :  { %v8718_v61 = vsub.f32 %v4151_v21, %v14459_v46  ;;  %v4153_v62 = vpop.f32.mrb[7].mxu1  ;;  %v8904_v20 = vmul.f32 %v8879_v6, %v8721_v58  ;;  %10350 = vmatpush3.bf16.msra.mxu0 %v10349_v49  ;;  %v10352_v21 = vpack.c.bf16 %v8175_v60, %v8168_v51  ;;  %v10355_v6 = vpack.c.bf16 %v13129_v52, %v13125_v8 }
 0x27c   :  { %v8719_v0 = vsub.f32 %v4153_v62, %v14460_v33  ;;  %10257 = vmatpush1.bf16.msra.mxu1 %v10256_v26  ;;  %v8940_v46 = vmul.f32 1.442695, %v8903_v44  ;;  %10351 = vmatprep.subr.bf16.mxu0 %v14449_v54  ;;  %v10264_v26 = vpack.c.bf16 %v7577_v9, %v7565_v22  ;;  %v10361_v58 = vpack.c.bf16 %v13177_v63, %v13175_v18  ;;  %v14462_v44 = vld [vmem:[#allocation31_spill] sm:$0xff]  ;;  %v14463_v33 = vld [vmem:[#allocation17_spill] sm:$0xff]  ;;  %v14465_v22 = vld [vmem:[#allocation44_spill] sm:$0xff] }
 0x27d   :  { %v8876_v30 = vmul.f32 %v14461_v38, %v8718_v61  ;;  %10259 = vmatprep.subr.bf16.mxu1 %v10258_v11  ;;  %v8942_v47 = vmul.f32 1.442695, %v8904_v20  ;;  %v10276_v60 = vpack.c.bf16 %v13169_v7, %v13166_v24  ;;  %v14466_v9 = vld [vmem:[#allocation36_spill] sm:$0xff]  ;;  %v14467_v38 = vld [vmem:[#allocation30_spill] sm:$0xff]  ;;  %v14469_v20 = vld [vmem:[#allocation37_spill] sm:$0xff] }
 0x27e   :  { %v8877_v10 = vmul.f32 %v8788_v2, %v8719_v0  ;;  %10562 = vpow2.f32 %v8940_v46  ;;  %v10278_v2 = vpack.c.bf16 %v13200_v42, %v13198_v19  ;;  %v14472_v46 = vand.u32 4294901760, %v13108_v53 }
 0x27f   :  { %v8901_v48 = vmul.f32 %v8876_v30, %v8718_v61  ;;  %10564 = vpow2.f32 %v8942_v47  ;;  %10353 = vmatpush3.bf16.msra.mxu0 %v10352_v21  ;;  %v10364_v61 = vpack.c.bf16 %v13224_v4, %v13222_v35  ;;  %v14468_v30 = vld [vmem:[#allocation22_spill] sm:$0xff]  ;;  %v14474_v47 = vand.u32 4294901760, %v13125_v8 }
 0x280   :  { %v8902_v32 = vmul.f32 %v8877_v10, %v8719_v0  ;;  %10261 = vmatpush1.bf16.msra.mxu1 %v10260_v16  ;;  %10354 = vmatprep.subr.bf16.mxu0 %v14449_v54  ;;  %v10268_v16 = vpack.c.bf16 %v13123_v1, %v13121_v13  ;;  %v14464_v0 = vld [vmem:[#allocation28_spill] sm:$0xff]  ;;  %v14471_v21 = vld [vmem:[#allocation38_spill] sm:$0xff]  ;;  %v14473_v10 = vand.u32 4294901760, %v13115_v34  ;;  %v14480_v53 = vand.u32 4294901760, %v13131_v36 }
 0x281   :  { %v8936_v25 = vmul.f32 1.442695, %v8901_v48  ;;  %10263 = vmatprep.subr.bf16.mxu1 %v10262_v57  ;;  %v10280_v57 = vpack.c.bf16 %v13218_v27, %v13206_v29  ;;  %v14481_v34 = vand.u32 4294901760, %v13136_v56  ;;  %v14486_v56 = vand.u32 4294901760, %v13155_v37 }
 0x282   :  { %v8938_v11 = vmul.f32 1.442695, %v8902_v32  ;;  %9100 = vmatmul.mubr.f32.vlgmr.msra.gmra.mrb[12].mxu0 %v10872_v12  ;;  %v10298_v48 = vpack.c.bf16 %v14473_v10, %v14472_v46  ;;  %v14475_v32 = vand.u32 4294901760, %v13129_v52  ;;  %v14482_v52 = vand.u32 4294901760, %v13147_v17 }
 0x283   :  { %10566 = vpow2.f32 %v8936_v25  ;;  %10356 = vmatpush3.bf16.msra.mxu0 %v10355_v6  ;;  %9118 = vmatprep.mubr.msk.f32.mxu0 %vm10722_vm1, %v13883_v40  ;;  %v14476_v25 = vld [vmem:[#allocation33_spill] sm:$0xff]  ;;  %v14478_v6 = vand.u32 4294901760, %v13123_v1  ;;  %v10302_v8 = vpack.c.bf16 %v14481_v34, %v14480_v53  ;;  %v14485_v1 = vand.u32 4294901760, %v13142_v45 }
 0x284   :  { %10568 = vpow2.f32 %v8938_v11  ;;  %10265 = vmatpush1.bf16.msra.mxu1 %v10264_v26  ;;  %10357 = vmatprep.subr.bf16.mxu0 %v14449_v54  ;;  %v10379_v26 = vpack.c.bf16 %v14475_v32, %v14474_v47  ;;  %v14487_v17 = vand.u32 4294901760, %v13157_v14  ;;  %v14491_v45 = vand.u32 4294901760, %v13169_v7 }
 0x285   :  { %10267 = vmatprep.subr.bf16.mxu1 %v10266_v28  ;;  %v14477_v28 = vand.u32 4294901760, %v13121_v13  ;;  %v14484_v13 = vand.u32 4294901760, %v13140_v31  ;;  %v14490_v31 = vand.u32 4294901760, %v13166_v24  ;;  %v14492_v37 = vand.u32 4294901760, %v13198_v19  ;;  %v14499_v19 = vld [vmem:[#allocation42_spill] sm:$0xff] }
 0x286   :  { %v14493_v14 = vand.u32 4294901760, %v13200_v42  ;;  %v14496_v24 = vand.u32 4294901760, %v13206_v29  ;;  %v14497_v7 = vand.u32 4294901760, %v13218_v27  ;;  %v10594_v27 = vld [vmem:[#allocation7 + $0x8] sm:$0xff] }
 0x287   :  { %7629 = vmatmul.mubr.f32.vlgmr.msra.gmra.mrb[12].mxu1 %v10872_v12  ;;  %10359 = vmatpush3.bf16.msra.mxu0 %v10358_v55  ;;  %v10300_v11 = vpack.c.bf16 %v14478_v6, %v14477_v28  ;;  %v10304_v36 = vpack.c.bf16 %v14485_v1, %v14484_v13  ;;  %v14503_v1 = vld [vmem:[#allocation43_spill] sm:$0xff] }
 0x288   :  { %10269 = vmatpush1.bf16.msra.mxu1 %v10268_v16  ;;  %7731 = vmatprep.mubr.f32.mxu1 %v13883_v40  ;;  %v10563_v49 = vpop.eup %10562  ;;  %v14479_v16 = vld [vmem:[#allocation16_spill] sm:$0xff] }
 0x289   :  { %10271 = vmatprep.subr.bf16.mxu1 %v10270_v15  ;;  %10360 = vmatprep.subr.bf16.mxu0 %v14449_v54  ;;  %v10565_v51 = vpop.eup %10564  ;;  %8978 = vst [vmem:[#allocation10 + $0x60] sm:$0xff] %v10563_v49  ;;  %v14483_v15 = vand.u32 4294901760, %v13149_v3  ;;  %v10306_v3 = vpack.c.bf16 %v14487_v17, %v14486_v56  ;;  %v10308_v49 = vpack.c.bf16 %v14491_v45, %v14490_v31 }
 0x28a   :  { %8979 = vst [vmem:[#allocation10 + $0x68] sm:$0xff] %v10565_v51  ;;  %v10310_v51 = vpack.c.bf16 %v14493_v14, %v14492_v37 }
 0x28b   :  { %10362 = vmatpush3.bf16.msra.mxu0 %v10361_v58  ;;  %v10382_v55 = vpack.c.bf16 %v14483_v15, %v14482_v52 }
 0x28c   :  { %10273 = vmatpush1.bf16.msra.mxu1 %v10272_v41  ;;  %10363 = vmatprep.subr.bf16.mxu0 %v14449_v54  ;;  %v14488_v41 = vand.u32 4294901760, %v13175_v18  ;;  %v14494_v18 = vand.u32 4294901760, %v13222_v35 }
 0x28d   :  { %v10567_v50 = vpop.eup %10566  ;;  %10275 = vmatprep.subr.bf16.mxu1 %v10274_v59  ;;  %v14489_v59 = vand.u32 4294901760, %v13177_v63  ;;  %v14495_v63 = vand.u32 4294901760, %v13224_v4  ;;  %v14498_v4 = vld [vmem:[#allocation40_spill] sm:$0xff] }
 0x28e   :  { %v10569_v62 = vpop.eup %10568  ;;  %8976 = vst [vmem:[#allocation10 + $0x50] sm:$0xff] %v10567_v50  ;;  %v10312_v50 = vpack.c.bf16 %v14497_v7, %v14496_v24 }
 0x28f   :  { %8977 = vst [vmem:[#allocation10 + $0x58] sm:$0xff] %v10569_v62  ;;  %10365 = vmatpush3.bf16.msra.mxu0 %v10364_v61  ;;  %v10385_v58 = vpack.c.bf16 %v14489_v59, %v14488_v41 }
 0x290   :  { %10277 = vmatpush1.bf16.msra.mxu1 %v10276_v60  ;;  %10366 = vmatprep.subr.bf16.mxu0 %v14449_v54  ;;  %v10388_v60 = vpack.c.bf16 %v14495_v63, %v14494_v18 }
 0x291   :  { %10279 = vmatprep.subr.bf16.mxu1 %v10278_v2 }
 0x292   :  { %9119 = vmatmul.mubr.f32.vlgmr.msra.gmra.mrb[12].mxu0 %v14379_v5 }
 0x293   :  { %10368 = vmatpush3.bf16.msra.mxu0 %v14462_v44  ;;  %9137 = vmatprep.mubr.msk.f32.mxu0 %vm10722_vm1, %v13883_v40 }
 0x294   :  { %10281 = vmatpush1.bf16.msra.mxu1 %v10280_v57  ;;  %10369 = vmatprep.subr.bf16.mxu0 %v14449_v54  ;;  %v14501_v57 = vld [vmem:[#allocation51_spill] sm:$0xff] }
 0x295   :  { %10283 = vmatprep.subr.bf16.mxu1 %v13106_v39 }
 0x297   :  { %7734 = vmatmul.mubr.f32.vlgmr.msra.gmra.mrb[12].mxu1 %v14379_v5  ;;  %10371 = vmatpush3.bf16.msra.mxu0 %v14465_v22  ;;  %v14470_v5 = vld [vmem:[#allocation20_spill] sm:$0xff] }
 0x298   :  { %10285 = vmatpush1.bf16.msra.mxu1 %v14463_v33  ;;  %7820 = vmatprep.mubr.f32.mxu1 %v13883_v40 }
 0x299   :  { %10287 = vmatprep.subr.bf16.mxu1 %v14464_v0  ;;  %10372 = vmatprep.subr.bf16.mxu0 %v14449_v54 }
 0x29b   :  { %10374 = vmatpush3.bf16.msra.mxu0 %v14468_v30 }
 0x29c   :  { %10289 = vmatpush1.bf16.msra.mxu1 %v14466_v9  ;;  %10375 = vmatprep.subr.bf16.mxu0 %v14449_v54 }
 0x29d   :  { %10291 = vmatprep.subr.bf16.mxu1 %v14467_v38 }
 0x29f   :  { %10377 = vmatpush3.bf16.msra.mxu0 %v14471_v21 }
 0x2a0   :  { %10293 = vmatpush1.bf16.msra.mxu1 %v14469_v20  ;;  %10378 = vmatprep.subr.bf16.mxu0 %v14449_v54 }
 0x2a1   :  { %10295 = vmatprep.subr.bf16.mxu1 %v14470_v5 }
 0x2a2   :  { %9138 = vmatmul.mubr.f32.vlgmr.msra.gmra.mrb[12].mxu0 %v14479_v16 }
 0x2a3   :  { %10380 = vmatpush3.bf16.msra.mxu0 %v10379_v26  ;;  %9156 = vmatprep.mubr.msk.f32.mxu0 %vm10722_vm1, %v13883_v40 }
 0x2a4   :  { %10297 = vmatpush1.bf16.msra.mxu1 %v14476_v25  ;;  %10381 = vmatprep.subr.bf16.mxu0 %v14449_v54 }
 0x2a5   :  { %10299 = vmatprep.subr.bf16.mxu1 %v10298_v48 }
 0x2a7   :  { %7824 = vmatmul.mubr.f32.vlgmr.msra.gmra.mrb[12].mxu1 %v14479_v16  ;;  %10383 = vmatpush3.bf16.msra.mxu0 %v10382_v55  ;;  %v14502_v55 = vld [vmem:[#allocation49_spill] sm:$0xff] }
 0x2a8   :  { %10301 = vmatpush1.bf16.msra.mxu1 %v10300_v11  ;;  %7942 = vmatprep.mubr.f32.mxu1 %v13883_v40 }
 0x2a9   :  { %10303 = vmatprep.subr.bf16.mxu1 %v10302_v8  ;;  %10384 = vmatprep.subr.bf16.mxu0 %v14449_v54 }
 0x2ab   :  { %10386 = vmatpush3.bf16.msra.mxu0 %v10385_v58 }
 0x2ac   :  { %10305 = vmatpush1.bf16.msra.mxu1 %v10304_v36  ;;  %10387 = vmatprep.subr.bf16.mxu0 %v14449_v54 }
 0x2ad   :  { %10307 = vmatprep.subr.bf16.mxu1 %v10306_v3 }
 0x2af   :  { %10389 = vmatpush3.bf16.msra.mxu0 %v10388_v60 }
 0x2b0   :  { %10309 = vmatpush1.bf16.msra.mxu1 %v10308_v49  ;;  %10390 = vmatprep.subr.bf16.mxu0 %v14449_v54 }
 0x2b1   :  { %10311 = vmatprep.subr.bf16.mxu1 %v10310_v51 }
 0x2b2   :  { %9157 = vmatmul.mubr.f32.vlgmr.msra.gmra.mrb[12].mxu0 %v10872_v12 }
 0x2b3   :  { %10392 = vmatpush3.bf16.msra.mxu0 %v14462_v44  ;;  %9175 = vmatprep.mubr.msk.f32.mxu0 %vm10722_vm1, %v13883_v40  ;;  %v8646_v44 = vrot.slane %v10594_v27, %v14501_v57 }
 0x2b4   :  { %10313 = vmatpush1.bf16.msra.mxu1 %v10312_v50  ;;  %10393 = vmatprep.subr.bf16.mxu0 %v14449_v54 }
 0x2b5   :  { %10315 = vmatprep.subr.bf16.mxu1 %v13106_v39  ;;  %v13487_v39 = vld [vmem:[#allocation8 + $0x10] sm:$0xff] }
 0x2b6   :  { %v8808_v29 = vrot.slane %v13487_v39, %v14498_v4  ;;  %v8824_v56 = vrot.slane %v13487_v39, %v14502_v55  ;;  %v8828_v41 = vrot.slane %v13487_v39, %v14503_v1  ;;  %v8816_v45 = vrot.slane %v13487_v39, %v14439_v43 }
 0x2b7   :  { %7944 = vmatmul.mubr.f32.vlgmr.msra.gmra.mrb[12].mxu1 %v10872_v12  ;;  %10395 = vmatpush3.bf16.msra.mxu0 %v14465_v22  ;;  %v8820_v51 = vrot.slane %v13487_v39, %v14441_v23 }
 0x2b8   :  { %10317 = vmatpush1.bf16.msra.mxu1 %v14463_v33  ;;  %8030 = vmatprep.mubr.f32.mxu1 %v13883_v40  ;;  %v13485_v40 = vld [vmem:[#allocation7 + $0x10] sm:$0xff] }
 0x2b9   :  { %10319 = vmatprep.subr.bf16.mxu1 %v14464_v0  ;;  %10396 = vmatprep.subr.bf16.mxu0 %v14449_v54  ;;  %v8650_v35 = vrot.slane %v13485_v40, %v14498_v4  ;;  %v8654_v42 = vrot.slane %v13485_v40, %v14499_v19  ;;  %v10595_v0 = vld [vmem:[#allocation8 + $0x8] sm:$0xff]  ;;  %v8666_v13 = vrot.slane %v13485_v40, %v14502_v55 }
 0x2ba   :  { %v8670_v36 = vrot.slane %v13485_v40, %v14503_v1  ;;  %v8658_v17 = vrot.slane %v13485_v40, %v14439_v43  ;;  %v8662_v58 = vrot.slane %v13485_v40, %v14441_v23 }
 0x2bb   :  { %10398 = vmatpush3.bf16.msra.mxu0 %v14468_v30 }
 0x2bc   :  { %10321 = vmatpush1.bf16.msra.mxu1 %v14466_v9  ;;  %10399 = vmatprep.subr.bf16.mxu0 %v14449_v54  ;;  %v14500_v54 = vld [vmem:[#allocation39_spill] sm:$0xff] }
 0x2bd   :  { %10323 = vmatprep.subr.bf16.mxu1 %v14467_v38  ;;  %v8642_v2 = vrot.slane %v10594_v27, %v14500_v54  ;;  %v8800_v22 = vrot.slane %v10595_v0, %v14500_v54 }
 0x2bf   :  { %10401 = vmatpush3.bf16.msra.mxu0 %v14471_v21 }
 0x2c0   :  { %10325 = vmatpush1.bf16.msra.mxu1 %v14469_v20  ;;  %v8804_v20 = vrot.slane %v10595_v0, %v14501_v57 }
 0x2c1   :  { %10327 = vmatprep.subr.bf16.mxu1 %v14470_v5 }
 0x2c2   :  { %9176 = vmatmul.mubr.f32.vlgmr.msra.gmra.mrb[12].mxu0 %v10872_v12 }
 0x2c4   :  { %10329 = vmatpush1.bf16.msra.mxu1 %v14476_v25 }
 0x2c7   :  { %8032 = vmatmul.mubr.f32.vlgmr.msra.gmra.mrb[12].mxu1 %v10872_v12  ;;  %v8812_v12 = vrot.slane %v13487_v39, %v14499_v19 }
 0x2d5   :  { %v6092_v61 = vpop.f32.mrb[8].mxu0 }
 0x2d6   :  { %v8724_v62 = vsub.f32 %v6092_v61, %v8650_v35  ;;  %v6094_v33 = vpop.f32.mrb[9].mxu0 }
 0x2d7   :  { %v8725_v9 = vsub.f32 %v6094_v33, %v8654_v42  ;;  %v8674_v33 = vrot.slane %v13485_v40, %v14500_v54 }
 0x2d8   :  { %v8882_v30 = vmul.f32 %v8808_v29, %v8724_v62 }
 0x2d9   :  { %v8883_v46 = vmul.f32 %v8812_v12, %v8725_v9 }
 0x2da   :  { %v5445_v38 = vpop.f32.mrb[8].mxu1  ;;  %v8907_v10 = vmul.f32 %v8882_v30, %v8724_v62 }
 0x2db   :  { %v8722_v5 = vsub.f32 %v5445_v38, %v8642_v2  ;;  %v5447_v21 = vpop.f32.mrb[9].mxu1  ;;  %v8908_v32 = vmul.f32 %v8883_v46, %v8725_v9  ;;  %v8678_v38 = vrot.slane %v13485_v40, %v14501_v57  ;;  %v8836_v46 = vrot.slane %v13487_v39, %v14501_v57 }
 0x2dc   :  { %v8723_v48 = vsub.f32 %v5447_v21, %v8646_v44  ;;  %v8948_v26 = vmul.f32 1.442695, %v8907_v10  ;;  %v9008_v44 = vld [vmem:[#allocation7 + $0x18] ss:$0 sm:$0xff] }
 0x2dd   :  { %v8880_v47 = vmul.f32 %v8800_v22, %v8722_v5  ;;  %v8950_v6 = vmul.f32 1.442695, %v8908_v32  ;;  %v9009_v22 = vld [vmem:[#allocation8 + $0x18] ss:$0 sm:$0xff] }
 0x2de   :  { %v8881_v25 = vmul.f32 %v8804_v20, %v8723_v48  ;;  %10570 = vpow2.f32 %v8948_v26  ;;  %v8832_v20 = vrot.slane %v13487_v39, %v14500_v54 }
 0x2df   :  { %v8905_v28 = vmul.f32 %v8880_v47, %v8722_v5  ;;  %10572 = vpow2.f32 %v8950_v6 }
 0x2e0   :  { %v8906_v11 = vmul.f32 %v8881_v25, %v8723_v48 }
 0x2e1   :  { %v8944_v16 = vmul.f32 1.442695, %v8905_v28 }
 0x2e2   :  { %v8946_v53 = vmul.f32 1.442695, %v8906_v11 }
 0x2e3   :  { %10574 = vpow2.f32 %v8944_v16 }
 0x2e4   :  { %10576 = vpow2.f32 %v8946_v53 }
 0x2e8   :  { %v10571_v34 = vpop.eup %10570 }
 0x2e9   :  { %v10573_v8 = vpop.eup %10572  ;;  %8982 = vst [vmem:[#allocation10 + $0x80] sm:$0xff] %v10571_v34 }
 0x2ea   :  { %8983 = vst [vmem:[#allocation10 + $0x88] sm:$0xff] %v10573_v8 }
 0x2ed   :  { %v10575_v52 = vpop.eup %10574 }
 0x2ee   :  { %v10577_v15 = vpop.eup %10576  ;;  %8980 = vst [vmem:[#allocation10 + $0x70] sm:$0xff] %v10575_v52 }
 0x2ef   :  { %8981 = vst [vmem:[#allocation10 + $0x78] sm:$0xff] %v10577_v15 }
 0x335   :  { %v7386_v3 = vpop.f32.mrb[10].mxu0 }
 0x336   :  { %v8728_v59 = vsub.f32 %v7386_v3, %v8666_v13  ;;  %v7388_v31 = vpop.f32.mrb[11].mxu0 }
 0x337   :  { %v8729_v49 = vsub.f32 %v7388_v31, %v8670_v36 }
 0x338   :  { %v8886_v14 = vmul.f32 %v8824_v56, %v8728_v59 }
 0x339   :  { %v8887_v60 = vmul.f32 %v8828_v41, %v8729_v49 }
 0x33a   :  { %v6739_v37 = vpop.f32.mrb[10].mxu1  ;;  %v8911_v24 = vmul.f32 %v8886_v14, %v8728_v59 }
 0x33b   :  { %v8726_v18 = vsub.f32 %v6739_v37, %v8658_v17  ;;  %v6741_v63 = vpop.f32.mrb[11].mxu1  ;;  %v8912_v4 = vmul.f32 %v8887_v60, %v8729_v49 }
 0x33c   :  { %v8727_v7 = vsub.f32 %v6741_v63, %v8662_v58  ;;  %v8956_v35 = vmul.f32 1.442695, %v8911_v24 }
 0x33d   :  { %v8884_v50 = vmul.f32 %v8816_v45, %v8726_v18  ;;  %v8958_v29 = vmul.f32 1.442695, %v8912_v4 }
 0x33e   :  { %v8885_v19 = vmul.f32 %v8820_v51, %v8727_v7  ;;  %10578 = vpow2.f32 %v8956_v35 }
 0x33f   :  { %v8909_v42 = vmul.f32 %v8884_v50, %v8726_v18  ;;  %10580 = vpow2.f32 %v8958_v29 }
 0x340   :  { %v8910_v27 = vmul.f32 %v8885_v19, %v8727_v7 }
 0x341   :  { %v8952_v43 = vmul.f32 1.442695, %v8909_v42 }
 0x342   :  { %v8954_v2 = vmul.f32 1.442695, %v8910_v27 }
 0x343   :  { %10582 = vpow2.f32 %v8952_v43 }
 0x344   :  { %10584 = vpow2.f32 %v8954_v2 }
 0x348   :  { %v10579_v61 = vpop.eup %10578 }
 0x349   :  { %v10581_v23 = vpop.eup %10580  ;;  %8986 = vst [vmem:[#allocation10 + $0xa0] sm:$0xff] %v10579_v61 }
 0x34a   :  { %8987 = vst [vmem:[#allocation10 + $0xa8] sm:$0xff] %v10581_v23 }
 0x34d   :  { %v10583_v12 = vpop.eup %10582 }
 0x34e   :  { %v10585_v62 = vpop.eup %10584  ;;  %8984 = vst [vmem:[#allocation10 + $0x90] sm:$0xff] %v10583_v12 }
 0x34f   :  { %8985 = vst [vmem:[#allocation10 + $0x98] sm:$0xff] %v10585_v62 }
 0x395   :  { %v8571_v0 = vpop.f32.mrb[12].mxu0 }
 0x396   :  { %v8732_v9 = vsub.f32 %v8571_v0, %v9008_v44  ;;  %v9177_v30 = vpop.f32.mrb[13].mxu0 }
 0x398   :  { %v8890_v21 = vmul.f32 %v9009_v22, %v8732_v9 }
 0x39a   :  { %v8033_v5 = vpop.f32.mrb[12].mxu1  ;;  %v8915_v47 = vmul.f32 %v8890_v21, %v8732_v9 }
 0x39b   :  { %v8730_v10 = vsub.f32 %v8033_v5, %v8674_v33  ;;  %v8035_v48 = vpop.f32.mrb[13].mxu1 }
 0x39c   :  { %v8731_v32 = vsub.f32 %v8035_v48, %v8678_v38  ;;  %v8964_v25 = vmul.f32 1.442695, %v8915_v47 }
 0x39d   :  { %v8888_v26 = vmul.f32 %v8832_v20, %v8730_v10 }
 0x39e   :  { %v8889_v28 = vmul.f32 %v8836_v46, %v8731_v32  ;;  %10586 = vpow2.f32 %v8964_v25 }
 0x39f   :  { %v8913_v6 = vmul.f32 %v8888_v26, %v8730_v10 }
 0x3a0   :  { %v8914_v11 = vmul.f32 %v8889_v28, %v8731_v32 }
 0x3a1   :  { %v8960_v40 = vmul.f32 1.442695, %v8913_v6 }
 0x3a2   :  { %v8962_v16 = vmul.f32 1.442695, %v8914_v11 }
 0x3a3   :  { %10588 = vpow2.f32 %v8960_v40 }
 0x3a4   :  { %10590 = vpow2.f32 %v8962_v16 }
 0x3a8   :  { %v10587_v54 = vpop.eup %10586 }
 0x3a9   :  { %8990 = vst [vmem:[#allocation10 + $0xc0] sm:$0xff] %v10587_v54 }
 0x3ad   :  { %v10589_v53 = vpop.eup %10588 }
 0x3ae   :  { %v10591_v39 = vpop.eup %10590  ;;  %8988 = vst [vmem:[#allocation10 + $0xb0] sm:$0xff] %v10589_v53 }
 0x3af   :  { %8989 = vst [vmem:[#allocation10 + $0xb8] sm:$0xff] %v10591_v39 }
 0x3b0   :  { %10695 = shalt.err (!%p10692_p8)
}
 0x3b1   :  { %s10696_s15 = scalar_lea.hbm %s13541_s4, 3200 }
 0x3b2   :  { %p10697_p9 = scmp.ne.s32.totalorder %s13541_s4, %s10696_s15  ;;  %p10700_p10 = scmp.lt.u32.totalorder %s10696_s15, %s13541_s4 }
 0x3b4   :  { %p10702_p11 = pnand %p10700_p10, %p10697_p9 }
 0x3b6   :  { %10705 = shalt.err (!%p10702_p11)
}
 0x3b7   :  { %9000 = dma.vmem_to_hbm [thread:$0]  %s8998_s12, 3200, %s13541_s4, [#allocation4]  }
 0x3b8   :  { %10712 = dma.done.wait [#allocation4], 3200  }
 0x3b9   :  { %10713 = vsyncadd [#allocation4], 4294964096 }
 0x3ba   :  { %9004 = vsyncpa [#allocation3], 1 }
 0x3bb   :  { %9005 = vsyncpa [#allocation6], 1 }
 0x3bc   :  { %9006 = vsyncpa [#allocation9], 1 }
 0x3bd   :  { %9007 = vsyncpa [#allocation4], 1 }

</bundles_post_ra>
